<compile_context>
chip_gen: v7x
topology: tpu7x:2x2x1
jax: 0.10.0
libtpu: 0.0.40
codegen_flags: <defaults>
</compile_context>

<pallas_src>
import jax
import jax.numpy as jnp
from jax.experimental import pallas as pl
from jax.experimental.pallas import tpu as pltpu

IN_DIM = 50
HID = 256
OUT_DIM = 3 * 256 * 256      # 196608
TN = 8192                    # output tile width for the big final matmul
NT = OUT_DIM // TN           # 24 grid steps


def generator_kernel(x_ref, w1_ref, b1_ref, w2_ref, b2_ref, w3_ref, b3_ref,
                     o_ref):
    # Tiny hidden MLP recomputed every grid step (cost is invisible next to the
    # 4 MB bf16 W3-tile DMA); this keeps grid steps independent so the grid
    # axis can be "parallel" (v7x dual-TC sharding).
    h1 = jnp.dot(x_ref[...], w1_ref[...],
                 preferred_element_type=jnp.float32) + b1_ref[...]
    h1 = jnp.maximum(h1, 0.0)                               # ReLU
    h2 = jnp.dot(h1, w2_ref[...],
                 preferred_element_type=jnp.float32) + b2_ref[...]
    h2 = jnp.maximum(h2, 0.0)                               # ReLU

    # Hot path: Linear(256, 196608) tile in bf16 weights, f32 accumulation.
    y = jnp.dot(h2.astype(jnp.bfloat16), w3_ref[...],
                preferred_element_type=jnp.float32) + b3_ref[...]
    o_ref[...] = jnp.tanh(y)                                # Tanh


@jax.jit
def generator_forward(x, w1, b1, w2, b2, w3_blocked, b3):
    B = x.shape[0]
    return pl.pallas_call(
        generator_kernel,
        out_shape=jax.ShapeDtypeStruct((B, OUT_DIM), jnp.float32),
        grid=(NT,),
        in_specs=[
            pl.BlockSpec((B, IN_DIM), lambda j: (0, 0)),        # x (resident)
            pl.BlockSpec((IN_DIM, HID), lambda j: (0, 0)),      # W1 (resident)
            pl.BlockSpec((1, HID), lambda j: (0, 0)),           # b1 (resident)
            pl.BlockSpec((HID, HID), lambda j: (0, 0)),         # W2 (resident)
            pl.BlockSpec((1, HID), lambda j: (0, 0)),           # b2 (resident)
            pl.BlockSpec((None, HID, TN), lambda j: (j, 0, 0)), # W3 tile (contiguous)
            pl.BlockSpec((1, TN), lambda j: (0, j)),            # b3 tile
        ],
        out_specs=pl.BlockSpec((B, TN), lambda j: (0, j)),
        compiler_params=pltpu.CompilerParams(
            # Grid steps are independent -> parallel (megacore / dual-TC).
            dimension_semantics=("parallel",),
            vmem_limit_bytes=48 << 20,
        ),
    )(x, w1, b1, w2, b2, w3_blocked, b3)


def init_params(key):
    """Deterministic PyTorch-style uniform(-1/sqrt(fan_in), 1/sqrt(fan_in)) init."""
    ks = jax.random.split(key, 6)

    def lin(kw, kb, fan_in, fan_out):
        bound = 1.0 / jnp.sqrt(jnp.float32(fan_in))
        w = jax.random.uniform(kw, (fan_in, fan_out), jnp.float32, -bound, bound)
        b = jax.random.uniform(kb, (1, fan_out), jnp.float32, -bound, bound)
        return w, b

    w1, b1 = lin(ks[0], ks[1], IN_DIM, HID)
    w2, b2 = lin(ks[2], ks[3], HID, HID)
    w3, b3 = lin(ks[4], ks[5], HID, OUT_DIM)
    return w1, b1, w2, b2, w3, b3


def preblock_w3(w3_f32):
    """One-time static-weight transform: bf16 cast + contiguous per-tile blocks."""
    w3_bf16 = w3_f32.astype(jnp.bfloat16)                   # (HID, OUT_DIM)
    w3_blocked = w3_bf16.reshape(HID, NT, TN).transpose(1, 0, 2)  # (NT, HID, TN)
    return w3_bf16, w3_blocked


def reference_forward(x, w1, b1, w2, b2, w3_bf16, b3):
    hp = jax.lax.Precision.HIGHEST
    h1 = jnp.maximum(jnp.dot(x, w1, precision=hp) + b1, 0.0)
    h2 = jnp.maximum(jnp.dot(h1, w2, precision=hp) + b2, 0.0)
    # Same bf16 quantization of the hot-path operands as the kernel.
    y = jnp.dot(h2.astype(jnp.bfloat16).astype(jnp.float32),
                w3_bf16.astype(jnp.float32), precision=hp) + b3
    return jnp.tanh(y)


if __name__ == "__main__":
    key = jax.random.PRNGKey(0)
    k_x, k_p = jax.random.split(key)

    batch = 2
    x = jax.random.normal(k_x, (batch, IN_DIM), jnp.float32)
    w1, b1, w2, b2, w3, b3 = init_params(k_p)

    # One-time weight prep (outside jit / the hot path).
    w3_bf16, w3_blocked = preblock_w3(w3)
    w3_blocked = jax.block_until_ready(w3_blocked)

    out = generator_forward(x, w1, b1, w2, b2, w3_blocked, b3)
    out = jax.block_until_ready(out)

    assert out.shape == (batch, OUT_DIM), out.shape
    assert out.dtype == jnp.float32

    # Correctness check against a plain-JAX reference (same bf16 quantization
    # of W3 / h2; tolerance loosened accordingly).
    ref = jax.block_until_ready(
        reference_forward(x, w1, b1, w2, b2, w3_bf16, b3))
    max_err = float(jnp.max(jnp.abs(out - ref)))
    assert max_err < 2e-2, max_err

    print("KERNEL_OK")
</pallas_src>

<mosaic_0001>
module attributes {stable_mosaic.version = 11 : i64} {
  func.func @generator_kernel(%arg0: i32, %arg1: memref<2x50xf32, #tpu.memory_space<vmem>>, %arg2: memref<50x256xf32, #tpu.memory_space<vmem>>, %arg3: memref<1x256xf32, #tpu.memory_space<vmem>>, %arg4: memref<256x256xf32, #tpu.memory_space<vmem>>, %arg5: memref<1x256xf32, #tpu.memory_space<vmem>>, %arg6: memref<1x256x8192xbf16, #tpu.memory_space<vmem>>, %arg7: memref<1x8192xf32, #tpu.memory_space<vmem>>, %arg8: memref<2x8192xf32, #tpu.memory_space<vmem>>) attributes {dimension_semantics = [#tpu.dimension_semantics<parallel>], iteration_bounds = array<i64: 24>, scalar_prefetch = 0 : i64, scratch_operands = 0 : i64, tpu.core_type = #tpu.core_type<tc>, window_params = [{pipeline_mode = #tpu.pipeline_mode<synchronous>, transform_indices = @transform_0, window_bounds = array<i64: 2, 50>}, {pipeline_mode = #tpu.pipeline_mode<synchronous>, transform_indices = @transform_1, window_bounds = array<i64: 50, 256>}, {pipeline_mode = #tpu.pipeline_mode<synchronous>, transform_indices = @transform_2, window_bounds = array<i64: 1, 256>}, {pipeline_mode = #tpu.pipeline_mode<synchronous>, transform_indices = @transform_3, window_bounds = array<i64: 256, 256>}, {pipeline_mode = #tpu.pipeline_mode<synchronous>, transform_indices = @transform_4, window_bounds = array<i64: 1, 256>}, {transform_indices = @transform_5, window_bounds = array<i64: 1, 256, 8192>}, {transform_indices = @transform_6, window_bounds = array<i64: 1, 8192>}, {transform_indices = @transform_7, window_bounds = array<i64: 2, 8192>}]} {
    %c0 = arith.constant 0 : index
    %c0_0 = arith.constant 0 : index
    %0 = vector.load %arg1[%c0, %c0_0] : memref<2x50xf32, #tpu.memory_space<vmem>>, vector<2x50xf32>
    %c0_1 = arith.constant 0 : index
    %c0_2 = arith.constant 0 : index
    %1 = vector.load %arg2[%c0_1, %c0_2] : memref<50x256xf32, #tpu.memory_space<vmem>>, vector<50x256xf32>
    %cst = arith.constant dense<0.000000e+00> : vector<2x256xf32>
    %2 = tpu.matmul %0, %1, %cst {dimension_numbers = #tpu.dot_dimension_numbers<[1], [0], [0], [1], [0, 0, 1, 1], [], []>} : vector<2x50xf32>, vector<50x256xf32>, vector<2x256xf32> -> vector<2x256xf32>
    %c0_3 = arith.constant 0 : index
    %c0_4 = arith.constant 0 : index
    %3 = vector.load %arg3[%c0_3, %c0_4] : memref<1x256xf32, #tpu.memory_space<vmem>>, vector<1x256xf32>
    %4 = vector.broadcast %3 : vector<1x256xf32> to vector<2x256xf32>
    %5 = arith.addf %2, %4 : vector<2x256xf32>
    %cst_5 = arith.constant 0.000000e+00 : f32
    %6 = vector.broadcast %cst_5 : f32 to vector<2x256xf32>
    %7 = arith.maximumf %5, %6 : vector<2x256xf32>
    %c0_6 = arith.constant 0 : index
    %c0_7 = arith.constant 0 : index
    %8 = vector.load %arg4[%c0_6, %c0_7] : memref<256x256xf32, #tpu.memory_space<vmem>>, vector<256x256xf32>
    %cst_8 = arith.constant dense<0.000000e+00> : vector<2x256xf32>
    %9 = tpu.matmul %7, %8, %cst_8 {dimension_numbers = #tpu.dot_dimension_numbers<[1], [0], [0], [1], [0, 0, 1, 1], [], []>} : vector<2x256xf32>, vector<256x256xf32>, vector<2x256xf32> -> vector<2x256xf32>
    %c0_9 = arith.constant 0 : index
    %c0_10 = arith.constant 0 : index
    %10 = vector.load %arg5[%c0_9, %c0_10] : memref<1x256xf32, #tpu.memory_space<vmem>>, vector<1x256xf32>
    %11 = vector.broadcast %10 : vector<1x256xf32> to vector<2x256xf32>
    %12 = arith.addf %9, %11 : vector<2x256xf32>
    %cst_11 = arith.constant 0.000000e+00 : f32
    %13 = vector.broadcast %cst_11 : f32 to vector<2x256xf32>
    %14 = arith.maximumf %12, %13 : vector<2x256xf32>
    %15 = arith.truncf %14 : vector<2x256xf32> to vector<2x256xbf16>
    %c0_12 = arith.constant 0 : index
    %c0_13 = arith.constant 0 : index
    %c0_14 = arith.constant 0 : index
    %16 = vector.load %arg6[%c0_12, %c0_13, %c0_14] : memref<1x256x8192xbf16, #tpu.memory_space<vmem>>, vector<1x256x8192xbf16>
    %17 = vector.shape_cast %16 : vector<1x256x8192xbf16> to vector<256x8192xbf16>
    %cst_15 = arith.constant dense<0.000000e+00> : vector<2x8192xf32>
    %18 = tpu.matmul %15, %17, %cst_15 {dimension_numbers = #tpu.dot_dimension_numbers<[1], [0], [0], [1], [0, 0, 1, 1], [], []>} : vector<2x256xbf16>, vector<256x8192xbf16>, vector<2x8192xf32> -> vector<2x8192xf32>
    %c0_16 = arith.constant 0 : index
    %c0_17 = arith.constant 0 : index
    %19 = vector.load %arg7[%c0_16, %c0_17] : memref<1x8192xf32, #tpu.memory_space<vmem>>, vector<1x8192xf32>
    %20 = vector.broadcast %19 : vector<1x8192xf32> to vector<2x8192xf32>
    %21 = arith.addf %18, %20 : vector<2x8192xf32>
    %22 = math.tanh %21 : vector<2x8192xf32>
    %c0_18 = arith.constant 0 : index
    %c0_19 = arith.constant 0 : index
    %23 = vector.load %arg8[%c0_18, %c0_19] : memref<2x8192xf32, #tpu.memory_space<vmem>>, vector<2x8192xf32>
    tpu.vector_store %arg8[%c0_18, %c0_19], %22 {strides = array<i32>} : memref<2x8192xf32, #tpu.memory_space<vmem>>, vector<2x8192xf32>,
    return
  }
  func.func @transform_0(%arg0: i32) -> (i32, i32) {
    %c0_i32 = arith.constant 0 : i32
    %c0_i32_0 = arith.constant 0 : i32
    %c0_i32_1 = arith.constant 0 : i32
    return %c0_i32, %c0_i32_0 : i32, i32
  }
  func.func @transform_1(%arg0: i32) -> (i32, i32) {
    %c0_i32 = arith.constant 0 : i32
    %c0_i32_0 = arith.constant 0 : i32
    %c0_i32_1 = arith.constant 0 : i32
    return %c0_i32, %c0_i32_0 : i32, i32
  }
  func.func @transform_2(%arg0: i32) -> (i32, i32) {
    %c0_i32 = arith.constant 0 : i32
    %c0_i32_0 = arith.constant 0 : i32
    %c0_i32_1 = arith.constant 0 : i32
    return %c0_i32, %c0_i32_0 : i32, i32
  }
  func.func @transform_3(%arg0: i32) -> (i32, i32) {
    %c0_i32 = arith.constant 0 : i32
    %c0_i32_0 = arith.constant 0 : i32
    %c0_i32_1 = arith.constant 0 : i32
    return %c0_i32, %c0_i32_0 : i32, i32
  }
  func.func @transform_4(%arg0: i32) -> (i32, i32) {
    %c0_i32 = arith.constant 0 : i32
    %c0_i32_0 = arith.constant 0 : i32
    %c0_i32_1 = arith.constant 0 : i32
    return %c0_i32, %c0_i32_0 : i32, i32
  }
  func.func @transform_5(%arg0: i32) -> (i32, i32, i32) {
    %c0_i32 = arith.constant 0 : i32
    %c0_i32_0 = arith.constant 0 : i32
    %c0_i32_1 = arith.constant 0 : i32
    return %arg0, %c0_i32, %c0_i32_0 : i32, i32, i32
  }
  func.func @transform_6(%arg0: i32) -> (i32, i32) {
    %c0_i32 = arith.constant 0 : i32
    %c0_i32_0 = arith.constant 0 : i32
    return %c0_i32, %arg0 : i32, i32
  }
  func.func @transform_7(%arg0: i32) -> (i32, i32) {
    %c0_i32 = arith.constant 0 : i32
    %c0_i32_0 = arith.constant 0 : i32
    return %c0_i32, %arg0 : i32, i32
  }
}

</mosaic_0001>

<bundles_post_ra>
// kernel: generator_forward.1
= control target key start
LH: loop header
LB: loop body
LE: loop exit
PB: predicated region body
PF: predicated region fallthrough
CT: control target
= control target key end

     0   :  { %s12396_s0 = inlined_call_operand.hbm [shape: f32[2,50], index: 0, kind: input, shape index: {}]   ;;  %s12397_s1 = inlined_call_operand.hbm [shape: f32[50,256], index: 1, kind: input, shape index: {}]   ;;  %s12398_s2 = inlined_call_operand.hbm [shape: f32[1,256], index: 2, kind: input, shape index: {}]   ;;  %s12399_s3 = inlined_call_operand.hbm [shape: f32[256,256], index: 3, kind: input, shape index: {}]   ;;  %s12400_s4 = inlined_call_operand.hbm [shape: f32[1,256], index: 4, kind: input, shape index: {}]   ;;  %s12401_s5 = inlined_call_operand.hbm [shape: bf16[24,256,8192], index: 5, kind: input, shape index: {}]   ;;  %s12402_s6 = inlined_call_operand.hbm [shape: f32[1,196608], index: 6, kind: input, shape index: {}]   ;;  %s12403_s7 = inlined_call_operand.hbm [shape: f32[2,196608], index: 7, kind: output, shape index: {}]  }
   0x1   :  { %12419 = sst [smem:[#allocation24_spill]] %s12397_s1 }
   0x2   :  { %12420 = sst [smem:[#allocation25_spill]] %s12399_s3 }
   0x3   :  { %12421 = sst [smem:[#allocation26_spill]] %s12401_s5 }
   0x4   :  { %12 = vsyncpa [#allocation3], 0 }
   0x5   :  { %13 = vsyncpa [#allocation6], 0 }
   0x6   :  { %14 = vsyncpa [#allocation9], 0 }
   0x7   :  { %15 = vsyncpa [#allocation12], 0 }
   0x8   :  { %17 = vsyncpa [#allocation12 + $0x1], 0 }
   0x9   :  { %18 = vsyncpa [#allocation4], 0 }
   0xa   :  { %20 = vsyncpa [#allocation4 + $0x1], 0  ;;  %s10744_s24 = smov 0   ;;  %s10746_s25 = smov 0  }
   0xb   :  { %s10748_s26 = smov 0   ;;  %s10750_s27 = smov 0  }
   0xc LB: > { %12422 = sst [smem:[#allocation20_spill]] %s10677_s24  ;;  %s10691_s28 = smov [#allocation5]   ;;  %s10689_s27 = sphi %s10750_s27, %s12455_s27   ;;  %s10685_s26 = sphi %s10748_s26, %s12459_s26   ;;  %s10681_s25 = sphi %s10746_s25, %s12458_s25   ;;  %s10677_s24 = sphi %s10744_s24, %s12457_s24  }
   0xd   : > { %s237_s29 = sshll.u32 %s10691_s28, 4  ;;  %s10765_s30 = sadd.s32 4294967295, %s10689_s27   ;;  %s10770_s29 = int_to_ptr.vmem [resolvable:$true] %s237_s29 }
   0xe   : > { %p9043_p0 = scmp.ge.s32.totalorder %s10689_s27, 1  ;;  %p12406_p1 = scmp.eq.s32.totalorder %s10765_s30, 0 }
   0xf   : > { %p214_p2 = scmp.lt.s32.totalorder %s10689_s27, 25  ;;  %s10692_s9 = smov [#allocation8]  }
  0x10   : > { %s261_s10 = sshll.u32 %s10692_s9, 4  ;;  %s12425_s1 = sld [smem:[#allocation24_spill]]  ;;  %s10784_s10 = int_to_ptr.vmem [resolvable:$true] %s261_s10 }
  0x11   : > { %p10772_p3 = pnand %p9043_p0, %p214_p2 }
  0x13   : > { %s12423_s8 = scalar_select %p10772_p3, 1, 0 }
  0x14   : > { %p10202_p4 = pneg %p10772_p3 }
  0x16   : > { %p10780_p5 = pnand %p10202_p4, %p12406_p1  ;;  %s10411_s14 = scalar_lea.hbm %s12425_s1, 1792 }
  0x17   : > { %p10412_p6 = scmp.ne.s32.totalorder %s12425_s1, %s10411_s14  ;;  %p10418_p10 = scmp.lt.u32.totalorder %s10411_s14, %s12425_s1 }
  0x18   : > { %s12424_s11 = scalar_select %p10780_p5, 1, 0 }
  0x19   : > { %p10794_p7 = pneg %p10780_p5 }
  0x1b   : > { %p10414_p8 = pnand %p10794_p7, %p10412_p6 }
  0x1d   : > { %p10415_p9 = pneg %p10414_p8 }
  0x1f   : > { %p10420_p11 = pnand %p10418_p10, %p10415_p9 }
  0x21   : > { %10423 = shalt.err (!%p10420_p11)
}
  0x22   : > { %s10424_s20 = scalar_lea.vmem %s10770_s29, 1792  ;;  %p10432_p2 = scmp.lt.s32.totalorder %s10770_s29, %s10770_s29 }
  0x23   : > { %p10425_p12 = scmp.ne.s32.totalorder %s10770_s29, %s10424_s20  ;;  %p10433_p4 = scmp.lt.s32.totalorder %s10424_s20, %s10424_s20 }
  0x25   : > { %p10427_p13 = pnand %p10425_p12, %p10794_p7  ;;  %p10434_p6 = por %p10433_p4, %p10432_p2 }
  0x27   : > { %p10428_p0 = pneg %p10427_p13 }
  0x29   : > { %p10435_p8 = pnand %p10434_p6, %p10428_p0 }
  0x2b   : > { %10438 = shalt.err (!%p10435_p8)
}
  0x2c   : > { %s12404_s21 = smov 256   ;;  %s10694_s22 = smov 16  }
  0x2d   : > { %10208 = dma.hbm_to_vmem [thread:$0]  (!%p10780_p5), %s12425_s1, 1792, %s10770_s29, [#allocation6], %s12404_s21, %s12404_s21, %s10694_s22  }
  0x2e   : > { %s12427_s3 = sld [smem:[#allocation25_spill]] }
  0x34   : > { %s10439_s13 = scalar_lea.hbm %s12427_s3, 8192 }
  0x35   : > { %p10440_p9 = scmp.ne.s32.totalorder %s12427_s3, %s10439_s13  ;;  %p10446_p12 = scmp.lt.u32.totalorder %s10439_s13, %s12427_s3 }
  0x37   : > { %p10442_p10 = pnand %p10440_p9, %p10794_p7 }
  0x39   : > { %p10443_p11 = pneg %p10442_p10 }
  0x3b   : > { %p10448_p13 = pnand %p10446_p12, %p10443_p11 }
  0x3d   : > { %10451 = shalt.err (!%p10448_p13)
}
  0x3e   : > { %s10452_s29 = scalar_lea.vmem %s10784_s10, 8192  ;;  %p10460_p6 = scmp.lt.s32.totalorder %s10784_s10, %s10784_s10 }
  0x3f   : > { %p10453_p0 = scmp.ne.s32.totalorder %s10784_s10, %s10452_s29  ;;  %p10461_p8 = scmp.lt.s32.totalorder %s10452_s29, %s10452_s29 }
  0x41   : > { %p10455_p2 = pnand %p10453_p0, %p10794_p7  ;;  %p10462_p9 = por %p10461_p8, %p10460_p6 }
  0x43   : > { %p10456_p4 = pneg %p10455_p2 }
  0x45   : > { %p10463_p10 = pnand %p10462_p9, %p10456_p4 }
  0x47   : > { %10466 = shalt.err (!%p10463_p10)
}
  0x48   : > { %10214 = dma.hbm_to_vmem [thread:$0]  (!%p10780_p5), %s12427_s3, 8192, %s10784_s10, [#allocation9], %s12404_s21, %s12404_s21, %s10694_s22  }
  0x49   : > { %s9042_s23 = sadd.s32 4294967294, %s10689_s27   ;;  %s10844_s28 = sadd.s32 1, %s10689_s27  }
  0x4a   : > { %12428 = sst [smem:[#allocation21_spill]] %s10844_s28  ;;  %s135_s9 = ssub.s32 %s10689_s27, %s10844_s28 }
  0x4b   : > { %s138_s12 = sadd.s32 1, %s10685_s26  ;;  %p136_p11 = scmp.eq.s32.totalorder %s135_s9, 0 }
  0x4c   : > { %p145_p12 = scmp.ne.s32.totalorder %s10685_s26, %s10681_s25  ;;  %p146_p13 = scmp.eq.s32.totalorder %s10689_s27, 0 }
  0x4d   : > { %p151_p0 = scmp.ne.s32.totalorder %s10681_s25, %s10677_s24  ;;  %p201_p6 = scmp.eq.s32.totalorder %s10765_s30, 23 }
  0x4e   : > { %s10855_s13 = scalar_select %p136_p11, %s10685_s26, %s138_s12  }
  0x4f   : > { %p10857_p2 = por %p146_p13, %p145_p12  ;;  %p10863_p4 = por %p12406_p1, %p151_p0 }
  0x50   : > { %12429 = sst [smem:[#allocation22_spill]] %s10855_s13  ;;  %p207_p8 = scmp.eq.s32.totalorder %s9042_s23, 23 }
  0x51   : > { %s12431_s10 = scalar_select %p10863_p4, 1, 0 }
  0x52   : > { %p10234_p9 = scmp.lt.s32.totalorder %s10689_s27, 24  ;;  %s286_s22 = sand.u32 1, %s10689_s27  }
  0x53   : > { %p10870_p10 = por %p201_p6, %p145_p12  ;;  %p10874_p11 = por %p207_p8, %p151_p0 }
  0x54   : > { %s12405_s18 = sand.u32 1, %s10685_s26   ;;  %s10097_s19 = sshll.u32 %s10689_s27, 17 }
  0x55   : > { %s12432_s15 = scalar_select %p10870_p10, 1, 0 }
  0x56   : > { %s12433_s16 = scalar_select %p10874_p11, 1, 0 }
  0x57   : > { %s9050_s29 = sshll.u32 %s12405_s18, 13  ;;  %s12435_s5 = sld [smem:[#allocation26_spill]] }
  0x58   : > { %12434 = sst [smem:[#allocation23_spill]] %s12433_s16  ;;  %s290_s23 = scalar_lea.vmem [#allocation11], %s9050_s29 }
  0x59   : > { %s297_s21 = sshll.u32 %s290_s23, 4  ;;  %p10889_p12 = pnand %p10234_p9, %p10857_p2  ;;  %s10893_s21 = int_to_ptr.vmem [resolvable:$true] %s297_s21 }
  0x5a   : > { %s10895_s18 = scalar_lea.sflag [#allocation12], %s286_s22 }
  0x5b   : > { %s12436_s1 = scalar_select %p10889_p12, 1, 0 }
  0x5c   : > { %p12416_p0 = pneg %p10889_p12 }
  0x5d   : > { %s10885_s12 = scalar_lea.hbm %s12435_s5, %s10097_s19  ;;  %s10472_s19 = scalar_lea.hbm %s12435_s5, 3145728 }
  0x5e   : > { %s10467_s20 = scalar_lea.hbm %s10885_s12, 131072  ;;  %p10473_p2 = scmp.lt.u32.totalorder %s10885_s12, %s12435_s5 }
  0x5f   : > { %p10468_p13 = scmp.ne.s32.totalorder %s10885_s12, %s10467_s20  ;;  %p10474_p9 = scmp.lt.u32.totalorder %s10472_s19, %s10467_s20 }
  0x60   : > { %p10476_p11 = scmp.lt.u32.totalorder %s10467_s20, %s10885_s12 }
  0x61   : > { %p10470_p6 = pnand %p12416_p0, %p10468_p13  ;;  %p10475_p1 = por %p10474_p9, %p10473_p2 }
  0x63   : > { %p10471_p8 = pneg %p10470_p6  ;;  %p10477_p10 = por %p10476_p11, %p10475_p1 }
  0x65   : > { %p10478_p4 = pnand %p10477_p10, %p10471_p8 }
  0x67   : > { %10481 = shalt.err (!%p10478_p4)
}
  0x68   : > { %s10482_s22 = scalar_lea.vmem %s10893_s21, 131072  ;;  %s10695_s29 = smov [#allocation11]  }
  0x69   : > { %p10483_p13 = scmp.ne.s32.totalorder %s10893_s21, %s10482_s22  ;;  %s10487_s14 = sshll.u32 %s10695_s29, 4  ;;  %s10488_s14 = int_to_ptr.vmem [resolvable:$false] %s10487_s14 }
  0x6a   : > { %s10489_s9 = scalar_lea.vmem %s10488_s14, 262144  ;;  %p10490_p5 = scmp.lt.s32.totalorder %s10893_s21, %s10488_s14 }
  0x6b   : > { %p10485_p6 = pnand %p10483_p13, %p12416_p0  ;;  %p10491_p2 = scmp.lt.s32.totalorder %s10489_s9, %s10482_s22 }
  0x6d   : > { %p10486_p3 = pneg %p10485_p6  ;;  %p10492_p9 = por %p10491_p2, %p10490_p5 }
  0x6f   : > { %p10493_p1 = pnand %p10492_p9, %p10486_p3 }
  0x71   : > { %10496 = shalt.err (!%p10493_p1)
}
  0x72   : > { %s10696_s20 = smov 4096   ;;  %s12437_s19 = smov 256  }
  0x73   : > { %10221 = dma.hbm_to_vmem [thread:$0]  (!%p10889_p12), %s10885_s12, 131072, %s10893_s21, %s10895_s18, %s10696_s20, %s10696_s20, %s12437_s19  }
  0x74   : > { %s10697_s23 = smov [#allocation2]   ;;  %s10698_s29 = smov [#allocation7]  }
  0x75   : > { %s227_s3 = sshll.u32 %s10697_s23, 4  ;;  %s251_s5 = sshll.u32 %s10698_s29, 4  ;;  %s228_s3 = int_to_ptr.vmem [resolvable:$true] %s227_s3  ;;  %s252_s5 = int_to_ptr.vmem [resolvable:$true] %s251_s5 }
  0x76   : > { %s10497_s22 = scalar_lea.hbm %s12396_s0, 32 }
  0x77   : > { %p10498_p3 = scmp.ne.s32.totalorder %s12396_s0, %s10497_s22  ;;  %p10504_p10 = scmp.lt.u32.totalorder %s10497_s22, %s12396_s0 }
  0x79   : > { %p10500_p5 = pnand %p10498_p3, %p10794_p7 }
  0x7b   : > { %p10501_p4 = pneg %p10500_p5 }
  0x7d   : > { %p10506_p11 = pnand %p10504_p10, %p10501_p4 }
  0x7f   : > { %10509 = shalt.err (!%p10506_p11)
}
  0x80   : > { %s10510_s21 = scalar_lea.vmem %s228_s3, 32  ;;  %p10518_p2 = scmp.lt.s32.totalorder %s228_s3, %s228_s3 }
  0x81   : > { %p10511_p8 = scmp.ne.s32.totalorder %s228_s3, %s10510_s21  ;;  %p10519_p9 = scmp.lt.s32.totalorder %s10510_s21, %s10510_s21 }
  0x83   : > { %p10513_p13 = pnand %p10511_p8, %p10794_p7  ;;  %p10520_p1 = por %p10519_p9, %p10518_p2 }
  0x85   : > { %p10514_p6 = pneg %p10513_p13 }
  0x87   : > { %p10521_p0 = pnand %p10520_p1, %p10514_p6 }
  0x89   : > { %10524 = shalt.err (!%p10521_p0)
}
  0x8a   : > { %p12438_p3 = scmp.ne.s32.totalorder %s12424_s11, 0  ;;  %s10525_s12 = scalar_lea.hbm %s12398_s2, 32 }
  0x8b   : > { %p10526_p5 = scmp.ne.s32.totalorder %s12398_s2, %s10525_s12  ;;  %p10532_p0 = scmp.lt.u32.totalorder %s10525_s12, %s12398_s2 }
  0x8c   : > { %10205 = dma.hbm_to_vmem [thread:$0]  (!%p12438_p3), %s12396_s0, 32, %s228_s3, [#allocation3]  }
  0x8d   : > { %p10528_p4 = pnand %p10526_p5, %p10794_p7 }
  0x8f   : > { %p10529_p10 = pneg %p10528_p4 }
  0x91   : > { %p10534_p11 = pnand %p10532_p0, %p10529_p10 }
  0x93   : > { %10537 = shalt.err (!%p10534_p11)
}
  0x94   : > { %s10538_s14 = scalar_lea.vmem %s252_s5, 32  ;;  %p10546_p2 = scmp.lt.s32.totalorder %s252_s5, %s252_s5 }
  0x95   : > { %p10539_p8 = scmp.ne.s32.totalorder %s252_s5, %s10538_s14  ;;  %p10547_p9 = scmp.lt.s32.totalorder %s10538_s14, %s10538_s14 }
  0x97   : > { %p10541_p13 = pnand %p10539_p8, %p10794_p7  ;;  %p10548_p1 = por %p10547_p9, %p10546_p2 }
  0x99   : > { %p10542_p6 = pneg %p10541_p13 }
  0x9b   : > { %p10549_p12 = pnand %p10548_p1, %p10542_p6 }
  0x9d   : > { %10552 = shalt.err (!%p10549_p12)
}
  0x9e   : > { %10211 = dma.hbm_to_vmem [thread:$0]  (!%p12438_p3), %s12398_s2, 32, %s252_s5, [#allocation6]  }
  0x9f   : > { %s10699_s9 = smov [#allocation10]   ;;  %s12439_s28 = sand.u32 1, %s10685_s26  }
  0xa0   : > { %s275_s21 = sshll.u32 %s10699_s9, 4  ;;  %s9053_s13 = sshll.u32 %s12439_s28, 6  ;;  %s276_s21 = int_to_ptr.vmem [resolvable:$true] %s275_s21 }
  0xa1   : > { %s10553_s12 = scalar_lea.hbm %s12400_s4, 32 }
  0xa2   : > { %p10554_p12 = scmp.ne.s32.totalorder %s12400_s4, %s10553_s12  ;;  %p10560_p10 = scmp.lt.u32.totalorder %s10553_s12, %s12400_s4 }
  0xa4   : > { %p10556_p5 = pnand %p10554_p12, %p10794_p7 }
  0xa6   : > { %p10557_p4 = pneg %p10556_p5 }
  0xa8   : > { %p10562_p0 = pnand %p10560_p10, %p10557_p4 }
  0xaa   : > { %10565 = shalt.err (!%p10562_p0)
}
  0xab   : > { %s10566_s5 = scalar_lea.vmem %s276_s21, 32  ;;  %p10574_p6 = scmp.lt.s32.totalorder %s276_s21, %s276_s21 }
  0xac   : > { %p10567_p11 = scmp.ne.s32.totalorder %s276_s21, %s10566_s5  ;;  %p10575_p2 = scmp.lt.s32.totalorder %s10566_s5, %s10566_s5 }
  0xae   : > { %p10569_p8 = pnand %p10567_p11, %p10794_p7  ;;  %p10576_p9 = por %p10575_p2, %p10574_p6 }
  0xb0   : > { %p10570_p13 = pneg %p10569_p8 }
  0xb2   : > { %p10577_p1 = pnand %p10576_p9, %p10570_p13 }
  0xb4   : > { %10580 = shalt.err (!%p10577_p1)
}
  0xb5   : > { %10217 = dma.hbm_to_vmem [thread:$0]  (!%p12438_p3), %s12400_s4, 32, %s276_s21, [#allocation9]  }
  0xb6   : > { %s10098_s22 = sshll.u32 %s10689_s27, 10  ;;  %s311_s9 = scalar_lea.vmem [#allocation13], %s9053_s13 }
  0xb7   : > { %s319_s28 = sshll.u32 %s311_s9, 4  ;;  %s317_s16 = scalar_lea.hbm %s12402_s6, %s10098_s22  ;;  %s320_s28 = int_to_ptr.vmem [resolvable:$true] %s319_s28 }
  0xb8   : > { %s10581_s12 = scalar_lea.hbm %s317_s16, 1024  ;;  %p12440_p12 = scmp.ne.s32.totalorder %s12436_s1, 0 }
  0xb9   : > { %p10582_p7 = scmp.ne.s32.totalorder %s317_s16, %s10581_s12  ;;  %s10586_s19 = scalar_lea.hbm %s12402_s6, 24576 }
  0xba   : > { %p12441_p5 = pneg %p12440_p12  ;;  %p10587_p3 = scmp.lt.u32.totalorder %s317_s16, %s12402_s6 }
  0xbb   : > { %p10588_p0 = scmp.lt.u32.totalorder %s10586_s19, %s10581_s12  ;;  %p10590_p8 = scmp.lt.u32.totalorder %s10581_s12, %s317_s16 }
  0xbc   : > { %p10584_p4 = pnand %p10582_p7, %p12441_p5 }
  0xbd   : > { %p10589_p11 = por %p10588_p0, %p10587_p3 }
  0xbe   : > { %p10585_p10 = pneg %p10584_p4 }
  0xbf   : > { %p10591_p13 = por %p10590_p8, %p10589_p11 }
  0xc1   : > { %p10592_p6 = pnand %p10591_p13, %p10585_p10 }
  0xc3   : > { %10595 = shalt.err (!%p10592_p6)
}
  0xc4   : > { %s10596_s13 = scalar_lea.vmem %s320_s28, 1024  ;;  %p12442_p9 = pmov %p12441_p5 }
  0xc5   : > { %p10597_p2 = scmp.ne.s32.totalorder %s320_s28, %s10596_s13  ;;  %s10700_s29 = smov [#allocation13]  }
  0xc6   : > { %s10601_s5 = sshll.u32 %s10700_s29, 4  ;;  %s10602_s5 = int_to_ptr.vmem [resolvable:$false] %s10601_s5 }
  0xc7   : > { %p10599_p1 = pnand %p10597_p2, %p12442_p9  ;;  %s10603_s14 = scalar_lea.vmem %s10602_s5, 2048 }
  0xc8   : > { %p10604_p5 = scmp.lt.s32.totalorder %s320_s28, %s10602_s5  ;;  %p10605_p4 = scmp.lt.s32.totalorder %s10603_s14, %s10596_s13 }
  0xc9   : > { %p10600_p7 = pneg %p10599_p1 }
  0xca   : > { %p10606_p0 = por %p10605_p4, %p10604_p5 }
  0xcc   : > { %p10607_p3 = pnand %p10606_p0, %p10600_p7 }
  0xce   : > { %10610 = shalt.err (!%p10607_p3)
}
  0xcf   : > { %10224 = dma.hbm_to_vmem [thread:$0]  (!%p12440_p12), %s317_s16, 1024, %s320_s28, %s10895_s18  }
  0xd0   : > { %p12443_p10 = scmp.ne.s32.totalorder %s12423_s8, 0 }
  0xd1   : > { %p12444_p11 = scmp.eq.s32.totalorder (!%p12443_p10), %s10765_s30, 0 }
  0xd2   : > { %328 = sbr.rel (%p12443_p10) target bundleno = 1893 (0x765), region = 48 }
  0xd9   : > { %10656 = dma.done.wait (%p12444_p11), [#allocation3], 32   ;;  %p12445_p8 = pmov %p12444_p11 }
  0xdb   : > { %10658 = vsyncadd (%p12445_p8), [#allocation3], 4294967264  ;;  %p12446_p13 = pmov %p12445_p8 }
  0xdc   : > { %p12447_p6 = pmov %p12445_p8 }
  0xdd   : > { %10660 = dma.done.wait (%p12446_p13), [#allocation6], 1824  }
  0xde   : > { %10662 = vsyncadd (%p12447_p6), [#allocation6], 4294965472  ;;  %p12448_p2 = pmov %p12447_p6 }
  0xe0   : > { %10664 = dma.done.wait (%p12448_p2), [#allocation9], 8224   ;;  %p12449_p12 = pmov %p12448_p2 }
  0xe1   : > { %s350_s1 = sand.u32 1, %s10765_s30   ;;  %s11015_s8 = sand.u32 1, %s10681_s25  }
  0xe2   : > { %10666 = vsyncadd (%p12449_p12), [#allocation9], 4294959072  ;;  %s9062_s18 = sshll.u32 %s11015_s8, 13  ;;  %s351_s3 = scalar_lea.sflag [#allocation12], %s350_s1 }
  0xe3   : > { %s11018_s22 = scalar_lea.vmem [#allocation11], %s9062_s18  ;;  %p12450_p9 = scmp.ne.s32.totalorder %s12431_s10, 0 }
  0xe5   : > { %10668 = dma.done.wait (%p12450_p9), %s351_s3, 132096  }
  0xe6   : > { %10670 = vsyncadd (%p12450_p9), %s351_s3, 4294835200  ;;  %v10701_v0 = vmov 0.0   ;;  %v403_v1 = vld [vmem:[#allocation5 + $0x8] sm:$0xff]  ;;  %v405_v2 = vld [vmem:[#allocation5 + $0x18] sm:$0xff]  ;;  %vm432_vm0 = vcmask 1041408   ;;  %vm428_vm1 = vcmask 408576  }
  0xe7   : > { %503 = vmatprep.mubr.f32.mxu0 %v10701_v0  ;;  %v402_v3 = vld [vmem:[#allocation5] sm:$0xff]  ;;  %v10100_v4 = vpack.c.bf16 %v405_v2, %v403_v1  ;;  %v404_v5 = vld [vmem:[#allocation5 + $0x10] sm:$0xff]  ;;  %v407_v6 = vld [vmem:[#allocation5 + $0x28] sm:$0xff]  ;;  %s9063_s10 = sshll.u32 %s11015_s8, 6  ;;  %s9064_s28 = sshll.u32 %s11015_s8, 7 }
  0xe8   : > { %v409_v7 = vld [vmem:[#allocation5 + $0x38] sm:$0xff]  ;;  %v10102_v8 = vpack.c.bf16 %v404_v5, %v402_v3  ;;  %v406_v10 = vld [vmem:[#allocation5 + $0x20] sm:$0xff]  ;;  %v408_v11 = vld [vmem:[#allocation5 + $0x30] sm:$0xff]  ;;  %s11355_s9 = scalar_lea.vmem [#allocation13], %s9063_s10  ;;  %s11405_s24 = scalar_lea.vmem [#allocation14], %s9064_s28 }
  0xe9   : > { %v10104_v9 = vpack.c.bf16 %v409_v7, %v407_v6  ;;  %v411_v12 = vld [vmem:[#allocation5 + $0x48] sm:$0xff]  ;;  %10101 = vmatprep.subr.bf16.mxu0 %v10100_v4  ;;  %v413_v13 = vld [vmem:[#allocation5 + $0x58] sm:$0xff]  ;;  %v10106_v14 = vpack.c.bf16 %v408_v11, %v406_v10  ;;  %v410_v15 = vld [vmem:[#allocation5 + $0x40] sm:$0xff]  ;;  %s10099_s17 = sshll.u32 %s10765_s30, 11  ;;  %s8902_s16 = sshll.u32 %s11405_s24, 4  ;;  %s12354_s16 = int_to_ptr.vmem [resolvable:$true] %s8902_s16 }
  0xea   : > { %10103 = vmatpush1.bf16.msra.mxu0 %v10102_v8  ;;  %v412_v16 = vld [vmem:[#allocation5 + $0x50] sm:$0xff]  ;;  %v10108_v17 = vpack.c.bf16 %v413_v13, %v411_v12  ;;  %v513_v18 = vld [vmem:[#allocation8 + $0x8] sm:$0xff]  ;;  %v514_v22 = vld [vmem:[#allocation8 + $0x10] sm:$0xff]  ;;  %s12352_s20 = scalar_lea.hbm %s12403_s7, %s10099_s17  ;;  %s8888_s19 = scalar_lea.sflag [#allocation4], %s11015_s8 }
  0xeb   : > { %10105 = vmatprep.subr.bf16.mxu0 %v10104_v9  ;;  %v515_v19 = vld [vmem:[#allocation8 + $0x18] sm:$0xff]  ;;  %v512_v20 = vld [vmem:[#allocation8] sm:$0xff]  ;;  %v517_v23 = vld [vmem:[#allocation8 + $0x28] sm:$0xff]  ;;  %v10110_v30 = vpack.c.bf16 %v412_v16, %v410_v15  ;;  %s10611_s23 = scalar_lea.vmem %s12354_s16, 2048  ;;  %p12451_p7 = scmp.ne.s32.totalorder %s12432_s15, 0 }
  0xec   : > { %v10112_v21 = vpack.c.bf16 %v515_v19, %v513_v18  ;;  %v519_v24 = vld [vmem:[#allocation8 + $0x38] sm:$0xff]  ;;  %v10114_v25 = vpack.c.bf16 %v514_v22, %v512_v20  ;;  %v516_v27 = vld [vmem:[#allocation8 + $0x20] sm:$0xff]  ;;  %v518_v28 = vld [vmem:[#allocation8 + $0x30] sm:$0xff]  ;;  %p10612_p1 = scmp.ne.s32.totalorder %s12354_s16, %s10611_s23  ;;  %s10703_s30 = smov [#allocation14]  }
  0xed   : > { %v10116_v26 = vpack.c.bf16 %v519_v24, %v517_v23  ;;  %v521_v29 = vld [vmem:[#allocation8 + $0x48] sm:$0xff]  ;;  %v523_v31 = vld [vmem:[#allocation8 + $0x58] sm:$0xff]  ;;  %v10118_v32 = vpack.c.bf16 %v518_v28, %v516_v27  ;;  %v415_v33 = vld [vmem:[#allocation5 + $0x68] sm:$0x3]  ;;  %s10615_s21 = sshll.u32 %s10703_s30, 4  ;;  %s10616_s21 = int_to_ptr.vmem [resolvable:$false] %s10615_s21 }
  0xee   : > { %10107 = vmatpush1.bf16.msra.mxu0 %v10106_v14  ;;  %10113 = vmatprep.subr.bf16.mxu1 %v10112_v21  ;;  %v10120_v34 = vpack.c.bf16 %v523_v31, %v521_v29  ;;  %v520_v35 = vld [vmem:[#allocation8 + $0x40] sm:$0xff]  ;;  %v522_v36 = vld [vmem:[#allocation8 + $0x50] sm:$0xff]  ;;  %v525_v37 = vld [vmem:[#allocation8 + $0x68] sm:$0xff]  ;;  %p10613_p5 = pnand %p10612_p1, %p12451_p7  ;;  %s10617_s13 = scalar_lea.vmem %s10616_s21, 4096 }
  0xef   : > { %10109 = vmatprep.subr.bf16.mxu0 %v10108_v17  ;;  %10115 = vmatpush1.bf16.msra.mxu1 %v10114_v25  ;;  %v527_v38 = vld [vmem:[#allocation8 + $0x78] sm:$0xff]  ;;  %v414_v39 = vld [vmem:[#allocation5 + $0x60] sm:$0x3]  ;;  %v10122_v40 = vpack.c.bf16 %v522_v36, %v520_v35  ;;  %v401_v41 = vld [vmem:[#allocation2] sm:$0x3]  ;;  %p10618_p0 = scmp.lt.s32.totalorder %s12354_s16, %s10616_s21  ;;  %p10619_p3 = scmp.lt.s32.totalorder %s10617_s13, %s10611_s23 }
  0xf0   : > { %10117 = vmatprep.subr.bf16.mxu1 %v10116_v26  ;;  %v10124_v42 = vpack.c.bf16 %v527_v38, %v525_v37  ;;  %v524_v43 = vld [vmem:[#allocation8 + $0x60] sm:$0xff]  ;;  %v526_v44 = vld [vmem:[#allocation8 + $0x70] sm:$0xff]  ;;  %v529_v45 = vld [vmem:[#allocation8 + $0x88] sm:$0xff]  ;;  %p10614_p4 = pneg %p10613_p5 }
  0xf1   : > { %v531_v46 = vld [vmem:[#allocation8 + $0x98] sm:$0xff]  ;;  %v10126_v47 = vpack.c.bf16 %v526_v44, %v524_v43  ;;  %v528_v49 = vld [vmem:[#allocation8 + $0x80] sm:$0xff]  ;;  %v530_v50 = vld [vmem:[#allocation8 + $0x90] sm:$0xff]  ;;  %p10620_p10 = por %p10619_p3, %p10618_p0 }
  0xf2   : > { %10111 = vmatpush1.bf16.msra.mxu0 %v10110_v30  ;;  %v10128_v48 = vpack.c.bf16 %v531_v46, %v529_v45  ;;  %v533_v51 = vld [vmem:[#allocation8 + $0xa8] sm:$0xff]  ;;  %v535_v52 = vld [vmem:[#allocation8 + $0xb8] sm:$0xff]  ;;  %v10130_v53 = vpack.c.bf16 %v530_v50, %v528_v49  ;;  %v532_v55 = vld [vmem:[#allocation8 + $0xa0] sm:$0xff] }
  0xf3   : > { %9065 = vmatprep.subr.msk.mxu0 %vm432_vm0, %v415_v33  ;;  %10119 = vmatpush1.bf16.msra.mxu1 %v10118_v32  ;;  %v10132_v54 = vpack.c.bf16 %v535_v52, %v533_v51  ;;  %v534_v56 = vld [vmem:[#allocation8 + $0xb0] sm:$0xff]  ;;  %v537_v57 = vld [vmem:[#allocation8 + $0xc8] sm:$0xff]  ;;  %v539_v58 = vld [vmem:[#allocation8 + $0xd8] sm:$0xff]  ;;  %p10621_p11 = pnand %p10620_p10, %p10614_p4 }
  0xf4   : > { %10121 = vmatprep.subr.bf16.mxu1 %v10120_v34  ;;  %v10134_v59 = vpack.c.bf16 %v534_v56, %v532_v55  ;;  %v10136_v60 = vpack.c.bf16 %v539_v58, %v537_v57  ;;  %v536_v61 = vld [vmem:[#allocation8 + $0xc0] sm:$0xff]  ;;  %v538_v62 = vld [vmem:[#allocation8 + $0xd0] sm:$0xff]  ;;  %v541_v63 = vld [vmem:[#allocation8 + $0xe8] sm:$0xff] }
  0xf5   : > { %v543_v0 = vld [vmem:[#allocation8 + $0xf8] sm:$0xff]  ;;  %v10138_v1 = vpack.c.bf16 %v538_v62, %v536_v61  ;;  %v540_v3 = vld [vmem:[#allocation8 + $0xe0] sm:$0xff]  ;;  %v542_v4 = vld [vmem:[#allocation8 + $0xf0] sm:$0xff] }
  0xf6   : > { %9066 = vmatpush1.msk.msra.mxu0 %vm432_vm0, %v414_v39  ;;  %v10140_v2 = vpack.c.bf16 %v543_v0, %v541_v63  ;;  %v545_v5 = vld [vmem:[#allocation8 + $0x108] sm:$0xff]  ;;  %v547_v6 = vld [vmem:[#allocation8 + $0x118] sm:$0xff]  ;;  %v10142_v7 = vpack.c.bf16 %v542_v4, %v540_v3  ;;  %v544_v9 = vld [vmem:[#allocation8 + $0x100] sm:$0xff] }
  0xf7   : > { %9067 = vmatmul.mubr.msk.f32.vlgmr.msra.gmra.mrb[0].mxu0 %vm428_vm1, %v401_v41  ;;  %10123 = vmatpush1.bf16.msra.mxu1 %v10122_v40  ;;  %v10144_v8 = vpack.c.bf16 %v547_v6, %v545_v5  ;;  %v546_v10 = vld [vmem:[#allocation8 + $0x110] sm:$0xff]  ;;  %v549_v11 = vld [vmem:[#allocation8 + $0x128] sm:$0xff]  ;;  %v551_v12 = vld [vmem:[#allocation8 + $0x138] sm:$0xff] }
  0xf8   : > { %10125 = vmatprep.subr.bf16.mxu1 %v10124_v42  ;;  %v10146_v13 = vpack.c.bf16 %v546_v10, %v544_v9  ;;  %v10148_v14 = vpack.c.bf16 %v551_v12, %v549_v11  ;;  %v548_v15 = vld [vmem:[#allocation8 + $0x120] sm:$0xff]  ;;  %v550_v16 = vld [vmem:[#allocation8 + $0x130] sm:$0xff]  ;;  %v553_v17 = vld [vmem:[#allocation8 + $0x148] sm:$0xff] }
  0xf9   : > { %v555_v18 = vld [vmem:[#allocation8 + $0x158] sm:$0xff]  ;;  %v10150_v19 = vpack.c.bf16 %v550_v16, %v548_v15  ;;  %v552_v21 = vld [vmem:[#allocation8 + $0x140] sm:$0xff]  ;;  %v554_v22 = vld [vmem:[#allocation8 + $0x150] sm:$0xff] }
  0xfa   : > { %v10152_v20 = vpack.c.bf16 %v555_v18, %v553_v17  ;;  %v557_v23 = vld [vmem:[#allocation8 + $0x168] sm:$0xff]  ;;  %v559_v24 = vld [vmem:[#allocation8 + $0x178] sm:$0xff]  ;;  %v10154_v25 = vpack.c.bf16 %v554_v22, %v552_v21  ;;  %v556_v27 = vld [vmem:[#allocation8 + $0x160] sm:$0xff] }
  0xfb   : > { %10127 = vmatpush1.bf16.msra.mxu1 %v10126_v47  ;;  %v10156_v26 = vpack.c.bf16 %v559_v24, %v557_v23  ;;  %v558_v28 = vld [vmem:[#allocation8 + $0x170] sm:$0xff]  ;;  %v561_v29 = vld [vmem:[#allocation8 + $0x188] sm:$0xff]  ;;  %v563_v30 = vld [vmem:[#allocation8 + $0x198] sm:$0xff] }
  0xfc   : > { %10129 = vmatprep.subr.bf16.mxu1 %v10128_v48  ;;  %v10158_v31 = vpack.c.bf16 %v558_v28, %v556_v27  ;;  %v10160_v32 = vpack.c.bf16 %v563_v30, %v561_v29  ;;  %v560_v33 = vld [vmem:[#allocation8 + $0x180] sm:$0xff]  ;;  %v562_v34 = vld [vmem:[#allocation8 + $0x190] sm:$0xff]  ;;  %v565_v35 = vld [vmem:[#allocation8 + $0x1a8] sm:$0xff] }
  0xfd   : > { %v567_v36 = vld [vmem:[#allocation8 + $0x1b8] sm:$0xff]  ;;  %v10162_v37 = vpack.c.bf16 %v562_v34, %v560_v33  ;;  %v564_v39 = vld [vmem:[#allocation8 + $0x1a0] sm:$0xff]  ;;  %v566_v40 = vld [vmem:[#allocation8 + $0x1b0] sm:$0xff] }
  0xfe   : > { %v10164_v38 = vpack.c.bf16 %v567_v36, %v565_v35  ;;  %v569_v41 = vld [vmem:[#allocation8 + $0x1c8] sm:$0xff]  ;;  %v571_v42 = vld [vmem:[#allocation8 + $0x1d8] sm:$0xff]  ;;  %v10166_v43 = vpack.c.bf16 %v566_v40, %v564_v39  ;;  %v568_v45 = vld [vmem:[#allocation8 + $0x1c0] sm:$0xff] }
  0xff   : > { %10131 = vmatpush1.bf16.msra.mxu1 %v10130_v53  ;;  %v10168_v44 = vpack.c.bf16 %v571_v42, %v569_v41  ;;  %v570_v46 = vld [vmem:[#allocation8 + $0x1d0] sm:$0xff]  ;;  %v573_v48 = vld [vmem:[#allocation8 + $0x1e8] sm:$0xff]  ;;  %v575_v49 = vld [vmem:[#allocation8 + $0x1f8] sm:$0xff] }
 0x100   : > { %10133 = vmatprep.subr.bf16.mxu1 %v10132_v54  ;;  %v10170_v47 = vpack.c.bf16 %v570_v46, %v568_v45  ;;  %v10172_v50 = vpack.c.bf16 %v575_v49, %v573_v48  ;;  %v572_v51 = vld [vmem:[#allocation8 + $0x1e0] sm:$0xff]  ;;  %v574_v52 = vld [vmem:[#allocation8 + $0x1f0] sm:$0xff] }
 0x101   : > { %v10174_v53 = vpack.c.bf16 %v574_v52, %v572_v51  ;;  %v663_v54 = vld [vmem:[%s11018_s22] sm:$0xff]  ;;  %v11029_v56 = vld [vmem:[%s11018_s22 + $0x8] sm:$0xff] }
 0x102   : > { %v695_v55 = vld [vmem:[%s11018_s22 + $0x100] sm:$0xff] }
 0x103   : > { %10135 = vmatpush1.bf16.msra.mxu1 %v10134_v59  ;;  %v9068_v57 = vcombine.low %v663_v54, %v695_v55  ;;  %v9069_v58 = vcombine.high %v663_v54, %v695_v55  ;;  %v11032_v59 = vld [vmem:[%s11018_s22 + $0x108] sm:$0xff]  ;;  %v759_v61 = vld [vmem:[%s11018_s22 + $0x300] sm:$0xff] }
 0x104   : > { %10137 = vmatprep.subr.bf16.mxu1 %v10136_v60  ;;  %v727_v60 = vld [vmem:[%s11018_s22 + $0x200] sm:$0xff]  ;;  %v9070_v62 = vcombine.low %v11029_v56, %v11032_v59  ;;  %v9071_v63 = vcombine.high %v11029_v56, %v11032_v59  ;;  %v984_v59 = vld [vmem:[%s11018_s22 + $0xa08] sm:$0xff] }
 0x105   : > { %v9133_v0 = vcombine.high %v727_v60, %v759_v61  ;;  %7143 = vmatprep.subr.bf16.mxu0 %v9069_v58  ;;  %v823_v3 = vld [vmem:[%s11018_s22 + $0x500] sm:$0xff] }
 0x106   : > { %7144 = vmatpush1.bf16.msra.mxu0 %v9068_v57  ;;  %v855_v6 = vld [vmem:[%s11018_s22 + $0x600] sm:$0xff] }
 0x107   : > { %10139 = vmatpush1.bf16.msra.mxu1 %v10138_v1  ;;  %v9132_v1 = vcombine.low %v727_v60, %v759_v61  ;;  %7145 = vmatprep.subr.bf16.mxu0 %v9133_v0  ;;  %v919_v10 = vld [vmem:[%s11018_s22 + $0x800] sm:$0xff]  ;;  %v728_v0 = vld [vmem:[%s11018_s22 + $0x208] sm:$0xff] }
 0x108   : > { %10141 = vmatprep.subr.bf16.mxu1 %v10140_v2  ;;  %v791_v2 = vld [vmem:[%s11018_s22 + $0x400] sm:$0xff] }
 0x109   : > { %v9197_v4 = vcombine.high %v791_v2, %v823_v3  ;;  %v9196_v5 = vcombine.low %v791_v2, %v823_v3  ;;  %v951_v11 = vld [vmem:[%s11018_s22 + $0x900] sm:$0xff] }
 0x10a   : > { %7146 = vmatpush1.bf16.msra.mxu0 %v9132_v1  ;;  %v9325_v12 = vcombine.high %v919_v10, %v951_v11  ;;  %v1015_v15 = vld [vmem:[%s11018_s22 + $0xb00] sm:$0xff]  ;;  %v760_v1 = vld [vmem:[%s11018_s22 + $0x308] sm:$0xff] }
 0x10b   : > { %10143 = vmatpush1.bf16.msra.mxu1 %v10142_v7  ;;  %7147 = vmatprep.subr.bf16.mxu0 %v9197_v4  ;;  %v887_v7 = vld [vmem:[%s11018_s22 + $0x700] sm:$0xff]  ;;  %v9135_v4 = vcombine.high %v728_v0, %v760_v1 }
 0x10c   : > { %10145 = vmatprep.subr.bf16.mxu1 %v10144_v8  ;;  %v9261_v8 = vcombine.high %v855_v6, %v887_v7  ;;  %v9260_v9 = vcombine.low %v855_v6, %v887_v7  ;;  %v1047_v18 = vld [vmem:[%s11018_s22 + $0xc00] sm:$0xff]  ;;  %v824_v6 = vld [vmem:[%s11018_s22 + $0x508] sm:$0xff]  ;;  %v9134_v7 = vcombine.low %v728_v0, %v760_v1 }
 0x10d   : > { %v1111_v22 = vld [vmem:[%s11018_s22 + $0xe00] sm:$0xff] }
 0x10e   : > { %7148 = vmatpush1.bf16.msra.mxu0 %v9196_v5  ;;  %v1143_v23 = vld [vmem:[%s11018_s22 + $0xf00] sm:$0xff]  ;;  %v792_v5 = vld [vmem:[%s11018_s22 + $0x408] sm:$0xff] }
 0x10f   : > { %10147 = vmatpush1.bf16.msra.mxu1 %v10146_v13  ;;  %7149 = vmatprep.subr.bf16.mxu0 %v9261_v8  ;;  %v9324_v13 = vcombine.low %v919_v10, %v951_v11  ;;  %v9517_v24 = vcombine.high %v1111_v22, %v1143_v23  ;;  %v1207_v27 = vld [vmem:[%s11018_s22 + $0x1100] sm:$0xff]  ;;  %v9199_v8 = vcombine.high %v792_v5, %v824_v6  ;;  %v888_v10 = vld [vmem:[%s11018_s22 + $0x708] sm:$0xff] }
 0x110   : > { %10149 = vmatprep.subr.bf16.mxu1 %v10148_v14  ;;  %v983_v14 = vld [vmem:[%s11018_s22 + $0xa00] sm:$0xff]  ;;  %v9198_v11 = vcombine.low %v792_v5, %v824_v6  ;;  %v1656_v5 = vld [vmem:[%s11018_s22 + $0x1f08] sm:$0xff] }
 0x111   : > { %v9389_v16 = vcombine.high %v983_v14, %v1015_v15  ;;  %v9388_v17 = vcombine.low %v983_v14, %v1015_v15  ;;  %v1239_v30 = vld [vmem:[%s11018_s22 + $0x1200] sm:$0xff]  ;;  %v952_v14 = vld [vmem:[%s11018_s22 + $0x908] sm:$0xff] }
 0x112   : > { %7150 = vmatpush1.bf16.msra.mxu0 %v9260_v9  ;;  %v1303_v34 = vld [vmem:[%s11018_s22 + $0x1400] sm:$0xff]  ;;  %v856_v9 = vld [vmem:[%s11018_s22 + $0x608] sm:$0xff] }
 0x113   : > { %10151 = vmatpush1.bf16.msra.mxu1 %v10150_v19  ;;  %7151 = vmatprep.subr.bf16.mxu0 %v9325_v12  ;;  %v1079_v19 = vld [vmem:[%s11018_s22 + $0xd00] sm:$0xff]  ;;  %v9263_v12 = vcombine.high %v856_v9, %v888_v10  ;;  %v9262_v15 = vcombine.low %v856_v9, %v888_v10  ;;  %v665_v9 = vld [vmem:[%s11018_s22 + $0x10] sm:$0xff] }
 0x114   : > { %10153 = vmatprep.subr.bf16.mxu1 %v10152_v20  ;;  %v9453_v20 = vcombine.high %v1047_v18, %v1079_v19  ;;  %v9452_v21 = vcombine.low %v1047_v18, %v1079_v19  ;;  %v1335_v35 = vld [vmem:[%s11018_s22 + $0x1500] sm:$0xff]  ;;  %v1048_v18 = vld [vmem:[%s11018_s22 + $0xc08] sm:$0xff]  ;;  %v697_v10 = vld [vmem:[%s11018_s22 + $0x110] sm:$0xff] }
 0x115   : > { %v9709_v36 = vcombine.high %v1303_v34, %v1335_v35  ;;  %v1399_v39 = vld [vmem:[%s11018_s22 + $0x1700] sm:$0xff]  ;;  %v1080_v19 = vld [vmem:[%s11018_s22 + $0xd08] sm:$0xff] }
 0x116   : > { %7152 = vmatpush1.bf16.msra.mxu0 %v9324_v13  ;;  %v1431_v42 = vld [vmem:[%s11018_s22 + $0x1800] sm:$0xff]  ;;  %v920_v13 = vld [vmem:[%s11018_s22 + $0x808] sm:$0xff] }
 0x117   : > { %10155 = vmatpush1.bf16.msra.mxu1 %v10154_v25  ;;  %7153 = vmatprep.subr.bf16.mxu0 %v9389_v16  ;;  %v9516_v25 = vcombine.low %v1111_v22, %v1143_v23  ;;  %v1495_v46 = vld [vmem:[%s11018_s22 + $0x1a00] sm:$0xff]  ;;  %v9327_v56 = vcombine.high %v920_v13, %v952_v14  ;;  %v9326_v16 = vcombine.low %v920_v13, %v952_v14  ;;  %v1112_v22 = vld [vmem:[%s11018_s22 + $0xe08] sm:$0xff]  ;;  %v698_v13 = vld [vmem:[%s11018_s22 + $0x118] sm:$0xff] }
 0x118   : > { %10157 = vmatprep.subr.bf16.mxu1 %v10156_v26  ;;  %v1175_v26 = vld [vmem:[%s11018_s22 + $0x1000] sm:$0xff]  ;;  %v1144_v23 = vld [vmem:[%s11018_s22 + $0xf08] sm:$0xff]  ;;  %v9072_v14 = vcombine.low %v665_v9, %v697_v10 }
 0x119   : > { %v9581_v28 = vcombine.high %v1175_v26, %v1207_v27  ;;  %v9580_v29 = vcombine.low %v1175_v26, %v1207_v27  ;;  %v1176_v26 = vld [vmem:[%s11018_s22 + $0x1008] sm:$0xff]  ;;  %v1623_v1 = vld [vmem:[%s11018_s22 + $0x1e00] sm:$0xff] }
 0x11a   : > { %7154 = vmatpush1.bf16.msra.mxu0 %v9388_v17  ;;  %v1208_v27 = vld [vmem:[%s11018_s22 + $0x1108] sm:$0xff] }
 0x11b   : > { %10159 = vmatpush1.bf16.msra.mxu1 %v10158_v31  ;;  %7155 = vmatprep.subr.bf16.mxu0 %v9453_v20  ;;  %v1271_v31 = vld [vmem:[%s11018_s22 + $0x1300] sm:$0xff] }
 0x11c   : > { %10161 = vmatprep.subr.bf16.mxu1 %v10160_v32  ;;  %v9645_v32 = vcombine.high %v1239_v30, %v1271_v31  ;;  %v9644_v33 = vcombine.low %v1239_v30, %v1271_v31  ;;  %v1240_v30 = vld [vmem:[%s11018_s22 + $0x1208] sm:$0xff] }
 0x11d   : > { %v1272_v31 = vld [vmem:[%s11018_s22 + $0x1308] sm:$0xff] }
 0x11e   : > { %7156 = vmatpush1.bf16.msra.mxu0 %v9452_v21  ;;  %v9455_v21 = vcombine.high %v1048_v18, %v1080_v19 }
 0x11f   : > { %10163 = vmatpush1.bf16.msra.mxu1 %v10162_v37  ;;  %7157 = vmatprep.subr.bf16.mxu0 %v9517_v24  ;;  %v9708_v37 = vcombine.low %v1303_v34, %v1335_v35  ;;  %v9454_v24 = vcombine.low %v1048_v18, %v1080_v19  ;;  %v1304_v34 = vld [vmem:[%s11018_s22 + $0x1408] sm:$0xff] }
 0x120   : > { %10165 = vmatprep.subr.bf16.mxu1 %v10164_v38  ;;  %v1367_v38 = vld [vmem:[%s11018_s22 + $0x1600] sm:$0xff]  ;;  %v1336_v35 = vld [vmem:[%s11018_s22 + $0x1508] sm:$0xff] }
 0x121   : > { %v9773_v40 = vcombine.high %v1367_v38, %v1399_v39  ;;  %v9772_v41 = vcombine.low %v1367_v38, %v1399_v39  ;;  %v1368_v38 = vld [vmem:[%s11018_s22 + $0x1608] sm:$0xff] }
 0x122   : > { %7158 = vmatpush1.bf16.msra.mxu0 %v9516_v25  ;;  %v9519_v25 = vcombine.high %v1112_v22, %v1144_v23  ;;  %v1400_v39 = vld [vmem:[%s11018_s22 + $0x1708] sm:$0xff] }
 0x123   : > { %10167 = vmatpush1.bf16.msra.mxu1 %v10166_v43  ;;  %7159 = vmatprep.subr.bf16.mxu0 %v9581_v28  ;;  %v1463_v43 = vld [vmem:[%s11018_s22 + $0x1900] sm:$0xff]  ;;  %v9518_v28 = vcombine.low %v1112_v22, %v1144_v23  ;;  %v729_v23 = vld [vmem:[%s11018_s22 + $0x210] sm:$0xff] }
 0x124   : > { %10169 = vmatprep.subr.bf16.mxu1 %v10168_v44  ;;  %v9837_v44 = vcombine.high %v1431_v42, %v1463_v43  ;;  %v9836_v45 = vcombine.low %v1431_v42, %v1463_v43  ;;  %v1432_v42 = vld [vmem:[%s11018_s22 + $0x1808] sm:$0xff] }
 0x125   : > { %v1464_v43 = vld [vmem:[%s11018_s22 + $0x1908] sm:$0xff] }
 0x126   : > { %7160 = vmatpush1.bf16.msra.mxu0 %v9580_v29  ;;  %v9583_v29 = vcombine.high %v1176_v26, %v1208_v27 }
 0x127   : > { %10171 = vmatpush1.bf16.msra.mxu1 %v10170_v47  ;;  %7161 = vmatprep.subr.bf16.mxu0 %v9645_v32  ;;  %v1527_v47 = vld [vmem:[%s11018_s22 + $0x1b00] sm:$0xff]  ;;  %v9582_v32 = vcombine.low %v1176_v26, %v1208_v27  ;;  %v762_v26 = vld [vmem:[%s11018_s22 + $0x318] sm:$0xff] }
 0x128   : > { %10173 = vmatprep.subr.bf16.mxu1 %v10172_v50  ;;  %v9901_v48 = vcombine.high %v1495_v46, %v1527_v47  ;;  %v9900_v49 = vcombine.low %v1495_v46, %v1527_v47  ;;  %v418_v50 = vlaneseq  ;;  %v1496_v46 = vld [vmem:[%s11018_s22 + $0x1a08] sm:$0xff] }
 0x129   : > { %v1528_v47 = vld [vmem:[%s11018_s22 + $0x1b08] sm:$0xff] }
 0x12a   : > { %7162 = vmatpush1.bf16.msra.mxu0 %v9644_v33  ;;  %v11064_v51 = vshrl.u32 %v418_v50, 7  ;;  %v9647_v33 = vcombine.high %v1240_v30, %v1272_v31  ;;  %v9902_v50 = vcombine.low %v1496_v46, %v1528_v47 }
 0x12b   : > { %10175 = vmatpush1.bf16.msra.mxu1 %v10174_v53  ;;  %7163 = vmatprep.subr.bf16.mxu0 %v9709_v36  ;;  %v416_v53 = vld [vmem:[#allocation7] sm:$0x3]  ;;  %v9646_v36 = vcombine.low %v1240_v30, %v1272_v31 }
 0x12c   : > { %7184 = vmatprep.subr.bf16.mxu1 %v9071_v63  ;;  %v11067_v52 = vsub.s32 0, %v11064_v51  ;;  %v11070_v54 = vsub.s32 1, %v11064_v51 }
 0x12e   : > { %7164 = vmatpush1.bf16.msra.mxu0 %v9708_v37  ;;  %v421_v55 = vrot.slane %v416_v53, %v11067_v52  ;;  %v425_v57 = vrot.slane %v416_v53, %v11070_v54  ;;  %v9711_v37 = vcombine.high %v1304_v34, %v1336_v35  ;;  %v1559_v53 = vld [vmem:[%s11018_s22 + $0x1c00] sm:$0xff] }
 0x12f   : > { %7165 = vmatprep.subr.bf16.mxu0 %v9773_v40  ;;  %v9710_v40 = vcombine.low %v1304_v34, %v1336_v35  ;;  %v826_v34 = vld [vmem:[%s11018_s22 + $0x518] sm:$0xff] }
 0x132   : > { %7166 = vmatpush1.bf16.msra.mxu0 %v9772_v41  ;;  %v9775_v41 = vcombine.high %v1368_v38, %v1400_v39 }
 0x133   : > { %7167 = vmatprep.subr.bf16.mxu0 %v9837_v44  ;;  %v9774_v44 = vcombine.low %v1368_v38, %v1400_v39  ;;  %v857_v39 = vld [vmem:[%s11018_s22 + $0x610] sm:$0xff] }
 0x136   : > { %7168 = vmatpush1.bf16.msra.mxu0 %v9836_v45  ;;  %v9839_v45 = vcombine.high %v1432_v42, %v1464_v43 }
 0x137   : > { %7169 = vmatprep.subr.bf16.mxu0 %v9901_v48  ;;  %v9838_v48 = vcombine.low %v1432_v42, %v1464_v43  ;;  %v890_v42 = vld [vmem:[%s11018_s22 + $0x718] sm:$0xff] }
 0x13a   : > { %7170 = vmatpush1.bf16.msra.mxu0 %v9900_v49  ;;  %v9903_v49 = vcombine.high %v1496_v46, %v1528_v47  ;;  %v921_v47 = vld [vmem:[%s11018_s22 + $0x810] sm:$0xff] }
 0x1ca   : > { %v505_v58 = vpop.f32.mrb[0].mxu0 }
 0x1cb   : > { %v506_v60 = vadd.f32 %v505_v58, %v421_v55  ;;  %v507_v61 = vpop.f32.mrb[1].mxu0  ;;  %v1591_v55 = vld [vmem:[%s11018_s22 + $0x1d00] sm:$0xff] }
 0x1cc   : > { %v508_v63 = vadd.f32 %v507_v61, %v425_v57  ;;  %v1560_v57 = vld [vmem:[%s11018_s22 + $0x1c08] sm:$0xff]  ;;  %v9965_v58 = vcombine.high %v1559_v53, %v1591_v55  ;;  %v9964_v61 = vcombine.low %v1559_v53, %v1591_v55 }
 0x1cd   : > { %v510_v3 = vmax.f32 %v506_v60, 0.0  ;;  %v1592_v60 = vld [vmem:[%s11018_s22 + $0x1d08] sm:$0xff] }
 0x1ce   : > { %v511_v2 = vmax.f32 %v508_v63, 0.0  ;;  %v9966_v63 = vcombine.low %v1560_v57, %v1592_v60  ;;  %v9967_v0 = vcombine.high %v1560_v57, %v1592_v60  ;;  %7171 = vmatprep.subr.bf16.mxu0 %v9965_v58  ;;  %v985_v60 = vld [vmem:[%s11018_s22 + $0xa10] sm:$0xff] }
 0x1cf   : > { %7172 = vmatpush1.bf16.msra.mxu0 %v9964_v61  ;;  %v1017_v61 = vld [vmem:[%s11018_s22 + $0xb10] sm:$0xff] }
 0x1d0   : > { %652 = vmatprep.mubr.f32.mxu1 %v511_v2  ;;  %v1655_v2 = vld [vmem:[%s11018_s22 + $0x1f00] sm:$0xff] }
 0x1d1   : > { %653 = vmatmul.mubr.f32.vlgmr.msra.gmra.mrb[0].mxu1 %v510_v3  ;;  %v1624_v3 = vld [vmem:[%s11018_s22 + $0x1e08] sm:$0xff]  ;;  %v10028_v6 = vcombine.low %v1623_v1, %v1655_v2 }
 0x1d2   : > { %7185 = vmatpush1.bf16.msra.mxu1 %v9070_v62  ;;  %v1016_v62 = vld [vmem:[%s11018_s22 + $0xb08] sm:$0xff] }
 0x1d3   : > { %7186 = vmatprep.subr.bf16.mxu1 %v9135_v4  ;;  %v9391_v17 = vcombine.high %v984_v59, %v1016_v62  ;;  %v9390_v20 = vcombine.low %v984_v59, %v1016_v62  ;;  %v10029_v4 = vcombine.high %v1623_v1, %v1655_v2  ;;  %v576_v59 = vld [vmem:[#allocation10] sm:$0x3] }
 0x1d4   : > { %v581_v62 = vrot.slane %v576_v59, %v11067_v52 }
 0x1d5   : > { %7173 = vmatprep.subr.bf16.mxu0 %v10029_v4 }
 0x1d6   : > { %7187 = vmatpush1.bf16.msra.mxu1 %v9134_v7  ;;  %v10030_v7 = vcombine.low %v1624_v3, %v1656_v5  ;;  %7174 = vmatpush1.bf16.msra.mxu0 %v10028_v6  ;;  %v1081_v6 = vld [vmem:[%s11018_s22 + $0xd10] sm:$0xff] }
 0x1d7   : > { %7188 = vmatprep.subr.bf16.mxu1 %v9199_v8  ;;  %v10031_v8 = vcombine.high %v1624_v3, %v1656_v5  ;;  %v9393_v3 = vcombine.high %v985_v60, %v1017_v61  ;;  %v1049_v5 = vld [vmem:[%s11018_s22 + $0xc10] sm:$0xff] }
 0x1da   : > { %7189 = vmatpush1.bf16.msra.mxu1 %v9198_v11  ;;  %v666_v11 = vld [vmem:[%s11018_s22 + $0x18] sm:$0xff] }
 0x1db   : > { %7190 = vmatprep.subr.bf16.mxu1 %v9263_v12  ;;  %v9073_v12 = vcombine.high %v665_v9, %v697_v10  ;;  %v9392_v9 = vcombine.low %v985_v60, %v1017_v61  ;;  %v1466_v60 = vld [vmem:[%s11018_s22 + $0x1918] sm:$0xff] }
 0x1dd   : > { %7225 = vmatprep.subr.bf16.mxu0 %v9073_v12 }
 0x1de   : > { %7191 = vmatpush1.bf16.msra.mxu1 %v9262_v15  ;;  %v9074_v15 = vcombine.low %v666_v11, %v698_v13 }
 0x1df   : > { %7192 = vmatprep.subr.bf16.mxu1 %v9327_v56  ;;  %v9075_v56 = vcombine.high %v666_v11, %v698_v13  ;;  %v9457_v11 = vcombine.high %v1049_v5, %v1081_v6  ;;  %v1113_v13 = vld [vmem:[%s11018_s22 + $0xe10] sm:$0xff] }
 0x1e2   : > { %7193 = vmatpush1.bf16.msra.mxu1 %v9326_v16  ;;  %v585_v16 = vrot.slane %v576_v59, %v11070_v54  ;;  %v9456_v59 = vcombine.low %v1049_v5, %v1081_v6  ;;  %v1530_v5 = vld [vmem:[%s11018_s22 + $0x1b18] sm:$0xff] }
 0x1e3   : > { %7194 = vmatprep.subr.bf16.mxu1 %v9391_v17 }
 0x1e6   : > { %7195 = vmatpush1.bf16.msra.mxu1 %v9390_v20 }
 0x1e7   : > { %7196 = vmatprep.subr.bf16.mxu1 %v9455_v21 }
 0x1ea   : > { %7197 = vmatpush1.bf16.msra.mxu1 %v9454_v24  ;;  %v761_v24 = vld [vmem:[%s11018_s22 + $0x310] sm:$0xff] }
 0x1eb   : > { %7198 = vmatprep.subr.bf16.mxu1 %v9519_v25  ;;  %v730_v25 = vld [vmem:[%s11018_s22 + $0x218] sm:$0xff]  ;;  %v9137_v30 = vcombine.high %v729_v23, %v761_v24  ;;  %v9136_v35 = vcombine.low %v729_v23, %v761_v24 }
 0x1ec   : > { %v9139_v31 = vcombine.high %v730_v25, %v762_v26 }
 0x1ee   : > { %7199 = vmatpush1.bf16.msra.mxu1 %v9518_v28 }
 0x1ef   : > { %7200 = vmatprep.subr.bf16.mxu1 %v9583_v29  ;;  %v793_v29 = vld [vmem:[%s11018_s22 + $0x410] sm:$0xff] }
 0x1f2   : > { %7201 = vmatpush1.bf16.msra.mxu1 %v9582_v32  ;;  %v825_v32 = vld [vmem:[%s11018_s22 + $0x510] sm:$0xff] }
 0x1f3   : > { %7202 = vmatprep.subr.bf16.mxu1 %v9647_v33  ;;  %v794_v33 = vld [vmem:[%s11018_s22 + $0x418] sm:$0xff]  ;;  %v9200_v43 = vcombine.low %v793_v29, %v825_v32 }
 0x1f4   : > { %v9203_v38 = vcombine.high %v794_v33, %v826_v34 }
 0x1f6   : > { %7203 = vmatpush1.bf16.msra.mxu1 %v9646_v36  ;;  %v9138_v36 = vcombine.low %v730_v25, %v762_v26  ;;  %v1241_v26 = vld [vmem:[%s11018_s22 + $0x1210] sm:$0xff] }
 0x1f7   : > { %7204 = vmatprep.subr.bf16.mxu1 %v9711_v37  ;;  %v9201_v37 = vcombine.high %v793_v29, %v825_v32  ;;  %v1273_v29 = vld [vmem:[%s11018_s22 + $0x1310] sm:$0xff] }
 0x1fa   : > { %7205 = vmatpush1.bf16.msra.mxu1 %v9710_v40  ;;  %v889_v40 = vld [vmem:[%s11018_s22 + $0x710] sm:$0xff] }
 0x1fb   : > { %7206 = vmatprep.subr.bf16.mxu1 %v9775_v41  ;;  %v858_v41 = vld [vmem:[%s11018_s22 + $0x618] sm:$0xff]  ;;  %v9264_v53 = vcombine.low %v857_v39, %v889_v40 }
 0x1fc   : > { %v9267_v46 = vcombine.high %v858_v41, %v890_v42  ;;  %v9266_v55 = vcombine.low %v858_v41, %v890_v42 }
 0x1fe   : > { %7207 = vmatpush1.bf16.msra.mxu1 %v9774_v44  ;;  %v9202_v44 = vcombine.low %v794_v33, %v826_v34  ;;  %v9649_v34 = vcombine.high %v1241_v26, %v1273_v29 }
 0x1ff   : > { %7208 = vmatprep.subr.bf16.mxu1 %v9839_v45  ;;  %v9265_v45 = vcombine.high %v857_v39, %v889_v40  ;;  %v1338_v39 = vld [vmem:[%s11018_s22 + $0x1518] sm:$0xff]  ;;  %v9648_v40 = vcombine.low %v1241_v26, %v1273_v29  ;;  %v700_v26 = vld [vmem:[%s11018_s22 + $0x128] sm:$0xff] }
 0x202   : > { %7209 = vmatpush1.bf16.msra.mxu1 %v9838_v48  ;;  %v953_v48 = vld [vmem:[%s11018_s22 + $0x910] sm:$0xff] }
 0x203   : > { %7210 = vmatprep.subr.bf16.mxu1 %v9903_v49  ;;  %v922_v49 = vld [vmem:[%s11018_s22 + $0x818] sm:$0xff]  ;;  %v9329_v57 = vcombine.high %v921_v47, %v953_v48  ;;  %v9328_v1 = vcombine.low %v921_v47, %v953_v48 }
 0x204   : > { %v1402_v47 = vld [vmem:[%s11018_s22 + $0x1718] sm:$0xff] }
 0x206   : > { %7211 = vmatpush1.bf16.msra.mxu1 %v9902_v50  ;;  %v954_v50 = vld [vmem:[%s11018_s22 + $0x918] sm:$0xff] }
 0x207   : > { %7212 = vmatprep.subr.bf16.mxu1 %v9967_v0  ;;  %v9331_v58 = vcombine.high %v922_v49, %v954_v50  ;;  %v1018_v0 = vld [vmem:[%s11018_s22 + $0xb18] sm:$0xff]  ;;  %v9330_v2 = vcombine.low %v922_v49, %v954_v50 }
 0x20a   : > { %7213 = vmatpush1.bf16.msra.mxu1 %v9966_v63  ;;  %v986_v63 = vld [vmem:[%s11018_s22 + $0xa18] sm:$0xff] }
 0x20b   : > { %7214 = vmatprep.subr.bf16.mxu1 %v10031_v8  ;;  %v9395_v4 = vcombine.high %v986_v63, %v1018_v0  ;;  %v1082_v8 = vld [vmem:[%s11018_s22 + $0xd18] sm:$0xff]  ;;  %v9394_v10 = vcombine.low %v986_v63, %v1018_v0 }
 0x20e   : > { %7215 = vmatpush1.bf16.msra.mxu1 %v10030_v7  ;;  %v1050_v7 = vld [vmem:[%s11018_s22 + $0xc18] sm:$0xff] }
 0x20f   : > { %7266 = vmatprep.subr.bf16.mxu1 %v9075_v56  ;;  %v9459_v12 = vcombine.high %v1050_v7, %v1082_v8  ;;  %v1146_v56 = vld [vmem:[%s11018_s22 + $0xf18] sm:$0xff] }
 0x2a4   : > { %v654_v17 = vpop.f32.mrb[0].mxu1 }
 0x2a5   : > { %v655_v18 = vadd.f32 %v654_v17, %v581_v62  ;;  %v656_v19 = vpop.f32.mrb[1].mxu1  ;;  %v9458_v62 = vcombine.low %v1050_v7, %v1082_v8 }
 0x2a6   : > { %v657_v20 = vadd.f32 %v656_v19, %v585_v16  ;;  %v1209_v19 = vld [vmem:[%s11018_s22 + $0x1110] sm:$0xff] }
 0x2a7   : > { %v659_v21 = vmax.f32 %v655_v18, 0.0  ;;  %v1177_v18 = vld [vmem:[%s11018_s22 + $0x1010] sm:$0xff] }
 0x2a8   : > { %v660_v22 = vmax.f32 %v657_v20, 0.0  ;;  %v1178_v20 = vld [vmem:[%s11018_s22 + $0x1018] sm:$0xff]  ;;  %v9585_v24 = vcombine.high %v1177_v18, %v1209_v19  ;;  %v9584_v32 = vcombine.low %v1177_v18, %v1209_v19 }
 0x2a9   : > { %v11123_v28 = vpack.c.bf16 %v659_v21, %v659_v21  ;;  %v1210_v21 = vld [vmem:[%s11018_s22 + $0x1118] sm:$0xff] }
 0x2aa   : > { %v11121_v27 = vpack.c.bf16 %v660_v22, %v660_v22  ;;  %v9587_v25 = vcombine.high %v1178_v20, %v1210_v21  ;;  %v9586_v33 = vcombine.low %v1178_v20, %v1210_v21  ;;  %v1658_v18 = vld [vmem:[%s11018_s22 + $0x1f18] sm:$0xff] }
 0x2ac   : > { %7175 = vmatprep.mubr.bf16.mxu0 %v11121_v27  ;;  %7216 = vmatprep.mubr.bf16.mxu1 %v11121_v27 }
 0x2ad   : > { %7176 = vmatmul.mubr.bf16.vlgmr.msra.gmra.mrb[4].mxu0 %v11123_v28  ;;  %7217 = vmatmul.mubr.bf16.vlgmr.msra.gmra.mrb[4].mxu1 %v11123_v28 }
 0x2ae   : > { %7226 = vmatpush1.bf16.msra.mxu0 %v9072_v14  ;;  %7267 = vmatpush1.bf16.msra.mxu1 %v9074_v15  ;;  %v1145_v14 = vld [vmem:[%s11018_s22 + $0xf10] sm:$0xff]  ;;  %v1114_v15 = vld [vmem:[%s11018_s22 + $0xe18] sm:$0xff] }
 0x2af   : > { %7257 = vmatprep.mubr.bf16.mxu0 %v11121_v27  ;;  %7298 = vmatprep.mubr.bf16.mxu1 %v11121_v27  ;;  %v9521_v16 = vcombine.high %v1113_v13, %v1145_v14  ;;  %v9523_v17 = vcombine.high %v1114_v15, %v1146_v56  ;;  %v9520_v22 = vcombine.low %v1113_v13, %v1145_v14  ;;  %v1594_v13 = vld [vmem:[%s11018_s22 + $0x1d18] sm:$0xff] }
 0x2b0   : > { %7227 = vmatprep.subr.bf16.mxu0 %v9137_v30  ;;  %7268 = vmatprep.subr.bf16.mxu1 %v9139_v31  ;;  %v9522_v23 = vcombine.low %v1114_v15, %v1146_v56  ;;  %v1242_v30 = vld [vmem:[%s11018_s22 + $0x1218] sm:$0xff] }
 0x2b1   : > { %v1274_v31 = vld [vmem:[%s11018_s22 + $0x1318] sm:$0xff] }
 0x2b2   : > { %7228 = vmatpush1.bf16.msra.mxu0 %v9136_v35  ;;  %7269 = vmatpush1.bf16.msra.mxu1 %v9138_v36  ;;  %v9651_v35 = vcombine.high %v1242_v30, %v1274_v31  ;;  %v1305_v36 = vld [vmem:[%s11018_s22 + $0x1410] sm:$0xff]  ;;  %v9650_v41 = vcombine.low %v1242_v30, %v1274_v31 }
 0x2b3   : > { %7229 = vmatprep.subr.bf16.mxu0 %v9201_v37  ;;  %7270 = vmatprep.subr.bf16.mxu1 %v9203_v38  ;;  %v1337_v37 = vld [vmem:[%s11018_s22 + $0x1510] sm:$0xff]  ;;  %v1306_v38 = vld [vmem:[%s11018_s22 + $0x1418] sm:$0xff] }
 0x2b4   : > { %v9713_v42 = vcombine.high %v1305_v36, %v1337_v37  ;;  %v9712_v48 = vcombine.low %v1305_v36, %v1337_v37  ;;  %v9714_v49 = vcombine.low %v1306_v38, %v1338_v39  ;;  %v764_v36 = vld [vmem:[%s11018_s22 + $0x328] sm:$0xff] }
 0x2b6   : > { %7230 = vmatpush1.bf16.msra.mxu0 %v9200_v43  ;;  %7271 = vmatpush1.bf16.msra.mxu1 %v9202_v44  ;;  %v9715_v43 = vcombine.high %v1306_v38, %v1338_v39  ;;  %v1369_v44 = vld [vmem:[%s11018_s22 + $0x1610] sm:$0xff] }
 0x2b7   : > { %7231 = vmatprep.subr.bf16.mxu0 %v9265_v45  ;;  %7272 = vmatprep.subr.bf16.mxu1 %v9267_v46  ;;  %v1401_v45 = vld [vmem:[%s11018_s22 + $0x1710] sm:$0xff]  ;;  %v1370_v46 = vld [vmem:[%s11018_s22 + $0x1618] sm:$0xff] }
 0x2b8   : > { %v9777_v50 = vcombine.high %v1369_v44, %v1401_v45  ;;  %v9776_v61 = vcombine.low %v1369_v44, %v1401_v45  ;;  %v9778_v63 = vcombine.low %v1370_v46, %v1402_v47  ;;  %v828_v44 = vld [vmem:[%s11018_s22 + $0x528] sm:$0xff] }
 0x2ba   : > { %7232 = vmatpush1.bf16.msra.mxu0 %v9264_v53  ;;  %7273 = vmatpush1.bf16.msra.mxu1 %v9266_v55  ;;  %v9779_v53 = vcombine.high %v1370_v46, %v1402_v47  ;;  %v1433_v55 = vld [vmem:[%s11018_s22 + $0x1810] sm:$0xff] }
 0x2bb   : > { %7233 = vmatprep.subr.bf16.mxu0 %v9329_v57  ;;  %7274 = vmatprep.subr.bf16.mxu1 %v9331_v58  ;;  %v1465_v57 = vld [vmem:[%s11018_s22 + $0x1910] sm:$0xff]  ;;  %v1434_v58 = vld [vmem:[%s11018_s22 + $0x1818] sm:$0xff] }
 0x2bc   : > { %v9841_v0 = vcombine.high %v1433_v55, %v1465_v57  ;;  %v9840_v6 = vcombine.low %v1433_v55, %v1465_v57  ;;  %v9842_v7 = vcombine.low %v1434_v58, %v1466_v60  ;;  %v892_v55 = vld [vmem:[%s11018_s22 + $0x728] sm:$0xff] }
 0x2be   : > { %7234 = vmatpush1.bf16.msra.mxu0 %v9328_v1  ;;  %7275 = vmatpush1.bf16.msra.mxu1 %v9330_v2  ;;  %v9843_v1 = vcombine.high %v1434_v58, %v1466_v60  ;;  %v1497_v2 = vld [vmem:[%s11018_s22 + $0x1a10] sm:$0xff] }
 0x2bf   : > { %7235 = vmatprep.subr.bf16.mxu0 %v9393_v3  ;;  %7276 = vmatprep.subr.bf16.mxu1 %v9395_v4  ;;  %v1529_v3 = vld [vmem:[%s11018_s22 + $0x1b10] sm:$0xff]  ;;  %v1498_v4 = vld [vmem:[%s11018_s22 + $0x1a18] sm:$0xff] }
 0x2c0   : > { %v9905_v8 = vcombine.high %v1497_v2, %v1529_v3  ;;  %v9904_v14 = vcombine.low %v1497_v2, %v1529_v3  ;;  %v9906_v15 = vcombine.low %v1498_v4, %v1530_v5  ;;  %v956_v2 = vld [vmem:[%s11018_s22 + $0x928] sm:$0xff] }
 0x2c2   : > { %7236 = vmatpush1.bf16.msra.mxu0 %v9392_v9  ;;  %7277 = vmatpush1.bf16.msra.mxu1 %v9394_v10  ;;  %v9907_v9 = vcombine.high %v1498_v4, %v1530_v5  ;;  %v1561_v10 = vld [vmem:[%s11018_s22 + $0x1c10] sm:$0xff] }
 0x2c3   : > { %7237 = vmatprep.subr.bf16.mxu0 %v9457_v11  ;;  %7278 = vmatprep.subr.bf16.mxu1 %v9459_v12  ;;  %v1593_v11 = vld [vmem:[%s11018_s22 + $0x1d10] sm:$0xff]  ;;  %v1562_v12 = vld [vmem:[%s11018_s22 + $0x1c18] sm:$0xff] }
 0x2c4   : > { %v9969_v56 = vcombine.high %v1561_v10, %v1593_v11  ;;  %v9968_v19 = vcombine.low %v1561_v10, %v1593_v11  ;;  %v9970_v20 = vcombine.low %v1562_v12, %v1594_v13  ;;  %v1020_v10 = vld [vmem:[%s11018_s22 + $0xb28] sm:$0xff] }
 0x2c6   : > { %7238 = vmatpush1.bf16.msra.mxu0 %v9456_v59  ;;  %7279 = vmatpush1.bf16.msra.mxu1 %v9458_v62  ;;  %v9971_v59 = vcombine.high %v1562_v12, %v1594_v13  ;;  %v1625_v62 = vld [vmem:[%s11018_s22 + $0x1e10] sm:$0xff] }
 0x2c7   : > { %7239 = vmatprep.subr.bf16.mxu0 %v9521_v16  ;;  %7280 = vmatprep.subr.bf16.mxu1 %v9523_v17  ;;  %v1657_v16 = vld [vmem:[%s11018_s22 + $0x1f10] sm:$0xff]  ;;  %v1626_v17 = vld [vmem:[%s11018_s22 + $0x1e18] sm:$0xff] }
 0x2c8   : > { %v10033_v21 = vcombine.high %v1625_v62, %v1657_v16  ;;  %v10032_v29 = vcombine.low %v1625_v62, %v1657_v16  ;;  %v10034_v30 = vcombine.low %v1626_v17, %v1658_v18  ;;  %v1084_v62 = vld [vmem:[%s11018_s22 + $0xd28] sm:$0xff] }
 0x2ca   : > { %7240 = vmatpush1.bf16.msra.mxu0 %v9520_v22  ;;  %7281 = vmatpush1.bf16.msra.mxu1 %v9522_v23  ;;  %v10035_v22 = vcombine.high %v1626_v17, %v1658_v18  ;;  %v667_v23 = vld [vmem:[%s11018_s22 + $0x20] sm:$0xff] }
 0x2cb   : > { %7241 = vmatprep.subr.bf16.mxu0 %v9585_v24  ;;  %7282 = vmatprep.subr.bf16.mxu1 %v9587_v25  ;;  %v699_v24 = vld [vmem:[%s11018_s22 + $0x120] sm:$0xff]  ;;  %v668_v25 = vld [vmem:[%s11018_s22 + $0x28] sm:$0xff] }
 0x2cc   : > { %v9077_v31 = vcombine.high %v667_v23, %v699_v24  ;;  %v9076_v37 = vcombine.low %v667_v23, %v699_v24  ;;  %v9078_v38 = vcombine.low %v668_v25, %v700_v26  ;;  %v1148_v23 = vld [vmem:[%s11018_s22 + $0xf28] sm:$0xff] }
 0x2ce   : > { %7242 = vmatpush1.bf16.msra.mxu0 %v9584_v32  ;;  %7283 = vmatpush1.bf16.msra.mxu1 %v9586_v33  ;;  %v9079_v32 = vcombine.high %v668_v25, %v700_v26  ;;  %v731_v33 = vld [vmem:[%s11018_s22 + $0x220] sm:$0xff] }
 0x2cf   : > { %7243 = vmatprep.subr.bf16.mxu0 %v9649_v34  ;;  %7284 = vmatprep.subr.bf16.mxu1 %v9651_v35  ;;  %v763_v34 = vld [vmem:[%s11018_s22 + $0x320] sm:$0xff]  ;;  %v732_v35 = vld [vmem:[%s11018_s22 + $0x228] sm:$0xff] }
 0x2d0   : > { %v9141_v39 = vcombine.high %v731_v33, %v763_v34  ;;  %v9140_v45 = vcombine.low %v731_v33, %v763_v34  ;;  %v9142_v46 = vcombine.low %v732_v35, %v764_v36  ;;  %v1212_v33 = vld [vmem:[%s11018_s22 + $0x1128] sm:$0xff] }
 0x2d2   : > { %7244 = vmatpush1.bf16.msra.mxu0 %v9648_v40  ;;  %7285 = vmatpush1.bf16.msra.mxu1 %v9650_v41  ;;  %v9143_v40 = vcombine.high %v732_v35, %v764_v36  ;;  %v795_v41 = vld [vmem:[%s11018_s22 + $0x420] sm:$0xff] }
 0x2d3   : > { %7245 = vmatprep.subr.bf16.mxu0 %v9713_v42  ;;  %7286 = vmatprep.subr.bf16.mxu1 %v9715_v43  ;;  %v827_v42 = vld [vmem:[%s11018_s22 + $0x520] sm:$0xff]  ;;  %v796_v43 = vld [vmem:[%s11018_s22 + $0x428] sm:$0xff] }
 0x2d4   : > { %v9205_v47 = vcombine.high %v795_v41, %v827_v42  ;;  %v9204_v57 = vcombine.low %v795_v41, %v827_v42  ;;  %v9206_v58 = vcombine.low %v796_v43, %v828_v44  ;;  %v1276_v41 = vld [vmem:[%s11018_s22 + $0x1328] sm:$0xff] }
 0x2d6   : > { %7246 = vmatpush1.bf16.msra.mxu0 %v9712_v48  ;;  %7287 = vmatpush1.bf16.msra.mxu1 %v9714_v49  ;;  %v9207_v48 = vcombine.high %v796_v43, %v828_v44  ;;  %v859_v49 = vld [vmem:[%s11018_s22 + $0x620] sm:$0xff] }
 0x2d7   : > { %7247 = vmatprep.subr.bf16.mxu0 %v9777_v50  ;;  %7288 = vmatprep.subr.bf16.mxu1 %v9779_v53  ;;  %v891_v50 = vld [vmem:[%s11018_s22 + $0x720] sm:$0xff]  ;;  %v860_v53 = vld [vmem:[%s11018_s22 + $0x628] sm:$0xff] }
 0x2d8   : > { %v9269_v60 = vcombine.high %v859_v49, %v891_v50  ;;  %v9268_v3 = vcombine.low %v859_v49, %v891_v50  ;;  %v9270_v4 = vcombine.low %v860_v53, %v892_v55  ;;  %v1340_v49 = vld [vmem:[%s11018_s22 + $0x1528] sm:$0xff] }
 0x2da   : > { %7248 = vmatpush1.bf16.msra.mxu0 %v9776_v61  ;;  %7289 = vmatpush1.bf16.msra.mxu1 %v9778_v63  ;;  %v9271_v61 = vcombine.high %v860_v53, %v892_v55  ;;  %v923_v63 = vld [vmem:[%s11018_s22 + $0x820] sm:$0xff] }
 0x2db   : > { %7249 = vmatprep.subr.bf16.mxu0 %v9841_v0  ;;  %7290 = vmatprep.subr.bf16.mxu1 %v9843_v1  ;;  %v955_v0 = vld [vmem:[%s11018_s22 + $0x920] sm:$0xff]  ;;  %v924_v1 = vld [vmem:[%s11018_s22 + $0x828] sm:$0xff] }
 0x2dc   : > { %v9333_v5 = vcombine.high %v923_v63, %v955_v0  ;;  %v9332_v11 = vcombine.low %v923_v63, %v955_v0  ;;  %v9334_v12 = vcombine.low %v924_v1, %v956_v2  ;;  %v1404_v63 = vld [vmem:[%s11018_s22 + $0x1728] sm:$0xff] }
 0x2de   : > { %7250 = vmatpush1.bf16.msra.mxu0 %v9840_v6  ;;  %7291 = vmatpush1.bf16.msra.mxu1 %v9842_v7  ;;  %v9335_v6 = vcombine.high %v924_v1, %v956_v2  ;;  %v987_v7 = vld [vmem:[%s11018_s22 + $0xa20] sm:$0xff] }
 0x2df   : > { %7251 = vmatprep.subr.bf16.mxu0 %v9905_v8  ;;  %7292 = vmatprep.subr.bf16.mxu1 %v9907_v9  ;;  %v1019_v8 = vld [vmem:[%s11018_s22 + $0xb20] sm:$0xff]  ;;  %v988_v9 = vld [vmem:[%s11018_s22 + $0xa28] sm:$0xff] }
 0x2e0   : > { %v9397_v13 = vcombine.high %v987_v7, %v1019_v8  ;;  %v9396_v16 = vcombine.low %v987_v7, %v1019_v8  ;;  %v9398_v17 = vcombine.low %v988_v9, %v1020_v10  ;;  %v1468_v7 = vld [vmem:[%s11018_s22 + $0x1928] sm:$0xff] }
 0x2e2   : > { %7252 = vmatpush1.bf16.msra.mxu0 %v9904_v14  ;;  %7293 = vmatpush1.bf16.msra.mxu1 %v9906_v15  ;;  %v9399_v14 = vcombine.high %v988_v9, %v1020_v10  ;;  %v1051_v15 = vld [vmem:[%s11018_s22 + $0xc20] sm:$0xff] }
 0x2e3   : > { %7253 = vmatprep.subr.bf16.mxu0 %v9969_v56  ;;  %7294 = vmatprep.subr.bf16.mxu1 %v9971_v59  ;;  %v1083_v56 = vld [vmem:[%s11018_s22 + $0xd20] sm:$0xff]  ;;  %v1052_v59 = vld [vmem:[%s11018_s22 + $0xc28] sm:$0xff] }
 0x2e4   : > { %v9461_v18 = vcombine.high %v1051_v15, %v1083_v56  ;;  %v9460_v24 = vcombine.low %v1051_v15, %v1083_v56  ;;  %v9462_v25 = vcombine.low %v1052_v59, %v1084_v62  ;;  %v1532_v15 = vld [vmem:[%s11018_s22 + $0x1b28] sm:$0xff] }
 0x2e6   : > { %7254 = vmatpush1.bf16.msra.mxu0 %v9968_v19  ;;  %7295 = vmatpush1.bf16.msra.mxu1 %v9970_v20  ;;  %v9463_v19 = vcombine.high %v1052_v59, %v1084_v62  ;;  %v1115_v20 = vld [vmem:[%s11018_s22 + $0xe20] sm:$0xff] }
 0x2e7   : > { %7255 = vmatprep.subr.bf16.mxu0 %v10033_v21  ;;  %7296 = vmatprep.subr.bf16.mxu1 %v10035_v22  ;;  %v1147_v21 = vld [vmem:[%s11018_s22 + $0xf20] sm:$0xff]  ;;  %v1116_v22 = vld [vmem:[%s11018_s22 + $0xe28] sm:$0xff] }
 0x2e8   : > { %v9525_v26 = vcombine.high %v1115_v20, %v1147_v21  ;;  %v9524_v34 = vcombine.low %v1115_v20, %v1147_v21  ;;  %v9526_v35 = vcombine.low %v1116_v22, %v1148_v23  ;;  %v1596_v20 = vld [vmem:[%s11018_s22 + $0x1d28] sm:$0xff] }
 0x2ea   : > { %7256 = vmatpush1.bf16.msra.mxu0 %v10032_v29  ;;  %7297 = vmatpush1.bf16.msra.mxu1 %v10034_v30  ;;  %v9527_v29 = vcombine.high %v1116_v22, %v1148_v23  ;;  %v1179_v30 = vld [vmem:[%s11018_s22 + $0x1020] sm:$0xff] }
 0x2eb   : > { %7307 = vmatprep.subr.bf16.mxu0 %v9077_v31  ;;  %7348 = vmatprep.subr.bf16.mxu1 %v9079_v32  ;;  %v1211_v31 = vld [vmem:[%s11018_s22 + $0x1120] sm:$0xff]  ;;  %v1180_v32 = vld [vmem:[%s11018_s22 + $0x1028] sm:$0xff] }
 0x2ec   : > { %v9589_v36 = vcombine.high %v1179_v30, %v1211_v31  ;;  %v9588_v42 = vcombine.low %v1179_v30, %v1211_v31  ;;  %v9590_v43 = vcombine.low %v1180_v32, %v1212_v33  ;;  %v1660_v30 = vld [vmem:[%s11018_s22 + $0x1f28] sm:$0xff] }
 0x2ed   : > { %7258 = vmatmul.mubr.bf16.vlgmr.msra.gmra.mrb[8].mxu0 %v11123_v28  ;;  %7299 = vmatmul.mubr.bf16.vlgmr.msra.gmra.mrb[8].mxu1 %v11123_v28 }
 0x2ee   : > { %7308 = vmatpush1.bf16.msra.mxu0 %v9076_v37  ;;  %7339 = vmatprep.mubr.bf16.mxu0 %v11121_v27  ;;  %v9591_v37 = vcombine.high %v1180_v32, %v1212_v33 }
 0x2ef   : > { %7349 = vmatpush1.bf16.msra.mxu1 %v9078_v38  ;;  %7380 = vmatprep.mubr.bf16.mxu1 %v11121_v27  ;;  %v1243_v38 = vld [vmem:[%s11018_s22 + $0x1220] sm:$0xff] }
 0x2f0   : > { %7309 = vmatprep.subr.bf16.mxu0 %v9141_v39  ;;  %7350 = vmatprep.subr.bf16.mxu1 %v9143_v40  ;;  %v1275_v39 = vld [vmem:[%s11018_s22 + $0x1320] sm:$0xff]  ;;  %v1244_v40 = vld [vmem:[%s11018_s22 + $0x1228] sm:$0xff] }
 0x2f1   : > { %v9653_v44 = vcombine.high %v1243_v38, %v1275_v39  ;;  %v9652_v50 = vcombine.low %v1243_v38, %v1275_v39  ;;  %v9654_v53 = vcombine.low %v1244_v40, %v1276_v41  ;;  %v702_v38 = vld [vmem:[%s11018_s22 + $0x138] sm:$0xff] }
 0x2f2   : > { %7310 = vmatpush1.bf16.msra.mxu0 %v9140_v45  ;;  %v9655_v45 = vcombine.high %v1244_v40, %v1276_v41 }
 0x2f3   : > { %7351 = vmatpush1.bf16.msra.mxu1 %v9142_v46  ;;  %7311 = vmatprep.subr.bf16.mxu0 %v9205_v47  ;;  %v1307_v46 = vld [vmem:[%s11018_s22 + $0x1420] sm:$0xff] }
 0x2f4   : > { %7352 = vmatprep.subr.bf16.mxu1 %v9207_v48  ;;  %v1339_v47 = vld [vmem:[%s11018_s22 + $0x1520] sm:$0xff]  ;;  %v1308_v48 = vld [vmem:[%s11018_s22 + $0x1428] sm:$0xff] }
 0x2f5   : > { %v9717_v55 = vcombine.high %v1307_v46, %v1339_v47  ;;  %v9716_v0 = vcombine.low %v1307_v46, %v1339_v47  ;;  %v9718_v1 = vcombine.low %v1308_v48, %v1340_v49  ;;  %v734_v46 = vld [vmem:[%s11018_s22 + $0x238] sm:$0xff] }
 0x2f6   : > { %7312 = vmatpush1.bf16.msra.mxu0 %v9204_v57  ;;  %v9719_v57 = vcombine.high %v1308_v48, %v1340_v49  ;;  %v766_v47 = vld [vmem:[%s11018_s22 + $0x338] sm:$0xff] }
 0x2f7   : > { %7353 = vmatpush1.bf16.msra.mxu1 %v9206_v58  ;;  %7313 = vmatprep.subr.bf16.mxu0 %v9269_v60  ;;  %v1371_v58 = vld [vmem:[%s11018_s22 + $0x1620] sm:$0xff] }
 0x2f8   : > { %7354 = vmatprep.subr.bf16.mxu1 %v9271_v61  ;;  %v1403_v60 = vld [vmem:[%s11018_s22 + $0x1720] sm:$0xff]  ;;  %v1372_v61 = vld [vmem:[%s11018_s22 + $0x1628] sm:$0xff] }
 0x2f9   : > { %v9781_v2 = vcombine.high %v1371_v58, %v1403_v60  ;;  %v9780_v8 = vcombine.low %v1371_v58, %v1403_v60  ;;  %v9782_v9 = vcombine.low %v1372_v61, %v1404_v63  ;;  %v830_v58 = vld [vmem:[%s11018_s22 + $0x538] sm:$0xff] }
 0x2fa   : > { %7314 = vmatpush1.bf16.msra.mxu0 %v9268_v3  ;;  %v9783_v3 = vcombine.high %v1372_v61, %v1404_v63  ;;  %v9146_v61 = vcombine.low %v734_v46, %v766_v47 }
 0x2fb   : > { %7355 = vmatpush1.bf16.msra.mxu1 %v9270_v4  ;;  %7315 = vmatprep.subr.bf16.mxu0 %v9333_v5  ;;  %v1435_v4 = vld [vmem:[%s11018_s22 + $0x1820] sm:$0xff] }
 0x2fc   : > { %7356 = vmatprep.subr.bf16.mxu1 %v9335_v6  ;;  %v1467_v5 = vld [vmem:[%s11018_s22 + $0x1920] sm:$0xff]  ;;  %v1436_v6 = vld [vmem:[%s11018_s22 + $0x1828] sm:$0xff] }
 0x2fd   : > { %v9845_v10 = vcombine.high %v1435_v4, %v1467_v5  ;;  %v9844_v56 = vcombine.low %v1435_v4, %v1467_v5  ;;  %v9846_v59 = vcombine.low %v1436_v6, %v1468_v7  ;;  %v894_v4 = vld [vmem:[%s11018_s22 + $0x738] sm:$0xff] }
 0x2fe   : > { %7316 = vmatpush1.bf16.msra.mxu0 %v9332_v11  ;;  %v9847_v11 = vcombine.high %v1436_v6, %v1468_v7 }
 0x2ff   : > { %7357 = vmatpush1.bf16.msra.mxu1 %v9334_v12  ;;  %7317 = vmatprep.subr.bf16.mxu0 %v9397_v13  ;;  %v1499_v12 = vld [vmem:[%s11018_s22 + $0x1a20] sm:$0xff] }
 0x300   : > { %7358 = vmatprep.subr.bf16.mxu1 %v9399_v14  ;;  %v1531_v13 = vld [vmem:[%s11018_s22 + $0x1b20] sm:$0xff]  ;;  %v1500_v14 = vld [vmem:[%s11018_s22 + $0x1a28] sm:$0xff] }
 0x301   : > { %v9909_v62 = vcombine.high %v1499_v12, %v1531_v13  ;;  %v9908_v21 = vcombine.low %v1499_v12, %v1531_v13  ;;  %v9910_v22 = vcombine.low %v1500_v14, %v1532_v15  ;;  %v958_v12 = vld [vmem:[%s11018_s22 + $0x938] sm:$0xff] }
 0x302   : > { %7318 = vmatpush1.bf16.msra.mxu0 %v9396_v16  ;;  %v9911_v16 = vcombine.high %v1500_v14, %v1532_v15 }
 0x303   : > { %7359 = vmatpush1.bf16.msra.mxu1 %v9398_v17  ;;  %7319 = vmatprep.subr.bf16.mxu0 %v9461_v18  ;;  %v1563_v17 = vld [vmem:[%s11018_s22 + $0x1c20] sm:$0xff] }
 0x304   : > { %7360 = vmatprep.subr.bf16.mxu1 %v9463_v19  ;;  %v1595_v18 = vld [vmem:[%s11018_s22 + $0x1d20] sm:$0xff]  ;;  %v1564_v19 = vld [vmem:[%s11018_s22 + $0x1c28] sm:$0xff] }
 0x305   : > { %v9973_v23 = vcombine.high %v1563_v17, %v1595_v18  ;;  %v9972_v31 = vcombine.low %v1563_v17, %v1595_v18  ;;  %v9974_v32 = vcombine.low %v1564_v19, %v1596_v20  ;;  %v1022_v17 = vld [vmem:[%s11018_s22 + $0xb38] sm:$0xff] }
 0x306   : > { %7320 = vmatpush1.bf16.msra.mxu0 %v9460_v24  ;;  %v9975_v24 = vcombine.high %v1564_v19, %v1596_v20 }
 0x307   : > { %7361 = vmatpush1.bf16.msra.mxu1 %v9462_v25  ;;  %7321 = vmatprep.subr.bf16.mxu0 %v9525_v26  ;;  %v1627_v25 = vld [vmem:[%s11018_s22 + $0x1e20] sm:$0xff] }
 0x308   : > { %7362 = vmatprep.subr.bf16.mxu1 %v9527_v29  ;;  %v1659_v26 = vld [vmem:[%s11018_s22 + $0x1f20] sm:$0xff]  ;;  %v1628_v29 = vld [vmem:[%s11018_s22 + $0x1e28] sm:$0xff] }
 0x309   : > { %v10037_v33 = vcombine.high %v1627_v25, %v1659_v26  ;;  %v10036_v39 = vcombine.low %v1627_v25, %v1659_v26  ;;  %v10038_v40 = vcombine.low %v1628_v29, %v1660_v30  ;;  %v1086_v25 = vld [vmem:[%s11018_s22 + $0xd38] sm:$0xff] }
 0x30a   : > { %7322 = vmatpush1.bf16.msra.mxu0 %v9524_v34  ;;  %v10039_v34 = vcombine.high %v1628_v29, %v1660_v30 }
 0x30b   : > { %7363 = vmatpush1.bf16.msra.mxu1 %v9526_v35  ;;  %7323 = vmatprep.subr.bf16.mxu0 %v9589_v36  ;;  %v669_v35 = vld [vmem:[%s11018_s22 + $0x30] sm:$0xff] }
 0x30c   : > { %7364 = vmatprep.subr.bf16.mxu1 %v9591_v37  ;;  %v701_v36 = vld [vmem:[%s11018_s22 + $0x130] sm:$0xff]  ;;  %v670_v37 = vld [vmem:[%s11018_s22 + $0x38] sm:$0xff] }
 0x30d   : > { %v9081_v41 = vcombine.high %v669_v35, %v701_v36  ;;  %v9082_v48 = vcombine.low %v670_v37, %v702_v38 }
 0x30e   : > { %7324 = vmatpush1.bf16.msra.mxu0 %v9588_v42  ;;  %v9083_v42 = vcombine.high %v670_v37, %v702_v38 }
 0x30f   : > { %7365 = vmatpush1.bf16.msra.mxu1 %v9590_v43  ;;  %7325 = vmatprep.subr.bf16.mxu0 %v9653_v44  ;;  %v733_v43 = vld [vmem:[%s11018_s22 + $0x230] sm:$0xff] }
 0x310   : > { %7366 = vmatprep.subr.bf16.mxu1 %v9655_v45  ;;  %v765_v44 = vld [vmem:[%s11018_s22 + $0x330] sm:$0xff]  ;;  %v9080_v45 = vcombine.low %v669_v35, %v701_v36  ;;  %v1150_v35 = vld [vmem:[%s11018_s22 + $0xf38] sm:$0xff] }
 0x311   : > { %v9145_v49 = vcombine.high %v733_v43, %v765_v44  ;;  %v9144_v60 = vcombine.low %v733_v43, %v765_v44  ;;  %v1214_v43 = vld [vmem:[%s11018_s22 + $0x1138] sm:$0xff] }
 0x312   : > { %7326 = vmatpush1.bf16.msra.mxu0 %v9652_v50  ;;  %v797_v50 = vld [vmem:[%s11018_s22 + $0x430] sm:$0xff] }
 0x313   : > { %7367 = vmatpush1.bf16.msra.mxu1 %v9654_v53  ;;  %7327 = vmatprep.subr.bf16.mxu0 %v9717_v55  ;;  %v829_v53 = vld [vmem:[%s11018_s22 + $0x530] sm:$0xff]  ;;  %v9147_v55 = vcombine.high %v734_v46, %v766_v47 }
 0x314   : > { %7368 = vmatprep.subr.bf16.mxu1 %v9719_v57  ;;  %v798_v57 = vld [vmem:[%s11018_s22 + $0x438] sm:$0xff]  ;;  %v9209_v63 = vcombine.high %v797_v50, %v829_v53  ;;  %v9208_v5 = vcombine.low %v797_v50, %v829_v53 }
 0x315   : > { %v9210_v6 = vcombine.low %v798_v57, %v830_v58  ;;  %v1246_v50 = vld [vmem:[%s11018_s22 + $0x1238] sm:$0xff] }
 0x316   : > { %7328 = vmatpush1.bf16.msra.mxu0 %v9716_v0  ;;  %v9211_v0 = vcombine.high %v798_v57, %v830_v58  ;;  %v1278_v53 = vld [vmem:[%s11018_s22 + $0x1338] sm:$0xff] }
 0x317   : > { %7369 = vmatpush1.bf16.msra.mxu1 %v9718_v1  ;;  %7329 = vmatprep.subr.bf16.mxu0 %v9781_v2  ;;  %v861_v1 = vld [vmem:[%s11018_s22 + $0x630] sm:$0xff] }
 0x318   : > { %7370 = vmatprep.subr.bf16.mxu1 %v9783_v3  ;;  %v893_v2 = vld [vmem:[%s11018_s22 + $0x730] sm:$0xff]  ;;  %v862_v3 = vld [vmem:[%s11018_s22 + $0x638] sm:$0xff] }
 0x319   : > { %v9273_v7 = vcombine.high %v861_v1, %v893_v2  ;;  %v9272_v13 = vcombine.low %v861_v1, %v893_v2  ;;  %v9274_v14 = vcombine.low %v862_v3, %v894_v4  ;;  %v1342_v1 = vld [vmem:[%s11018_s22 + $0x1538] sm:$0xff] }
 0x31a   : > { %7330 = vmatpush1.bf16.msra.mxu0 %v9780_v8  ;;  %v9275_v8 = vcombine.high %v862_v3, %v894_v4  ;;  %v9658_v3 = vcombine.low %v1246_v50, %v1278_v53 }
 0x31b   : > { %7371 = vmatpush1.bf16.msra.mxu1 %v9782_v9  ;;  %7331 = vmatprep.subr.bf16.mxu0 %v9845_v10  ;;  %v925_v9 = vld [vmem:[%s11018_s22 + $0x830] sm:$0xff] }
 0x31c   : > { %7372 = vmatprep.subr.bf16.mxu1 %v9847_v11  ;;  %v957_v10 = vld [vmem:[%s11018_s22 + $0x930] sm:$0xff]  ;;  %v926_v11 = vld [vmem:[%s11018_s22 + $0x838] sm:$0xff] }
 0x31d   : > { %v9337_v15 = vcombine.high %v925_v9, %v957_v10  ;;  %v9336_v18 = vcombine.low %v925_v9, %v957_v10  ;;  %v9338_v19 = vcombine.low %v926_v11, %v958_v12  ;;  %v1406_v9 = vld [vmem:[%s11018_s22 + $0x1738] sm:$0xff] }
 0x31e   : > { %7332 = vmatpush1.bf16.msra.mxu0 %v9844_v56  ;;  %v9339_v56 = vcombine.high %v926_v11, %v958_v12 }
 0x31f   : > { %7373 = vmatpush1.bf16.msra.mxu1 %v9846_v59  ;;  %7333 = vmatprep.subr.bf16.mxu0 %v9909_v62  ;;  %v989_v59 = vld [vmem:[%s11018_s22 + $0xa30] sm:$0xff] }
 0x320   : > { %7374 = vmatprep.subr.bf16.mxu1 %v9911_v16  ;;  %v1021_v62 = vld [vmem:[%s11018_s22 + $0xb30] sm:$0xff]  ;;  %v990_v16 = vld [vmem:[%s11018_s22 + $0xa38] sm:$0xff] }
 0x321   : > { %v9401_v20 = vcombine.high %v989_v59, %v1021_v62  ;;  %v9400_v26 = vcombine.low %v989_v59, %v1021_v62  ;;  %v9402_v29 = vcombine.low %v990_v16, %v1022_v17  ;;  %v1470_v59 = vld [vmem:[%s11018_s22 + $0x1938] sm:$0xff] }
 0x322   : > { %7334 = vmatpush1.bf16.msra.mxu0 %v9908_v21  ;;  %v9403_v21 = vcombine.high %v990_v16, %v1022_v17 }
 0x323   : > { %7375 = vmatpush1.bf16.msra.mxu1 %v9910_v22  ;;  %7335 = vmatprep.subr.bf16.mxu0 %v9973_v23  ;;  %v1053_v22 = vld [vmem:[%s11018_s22 + $0xc30] sm:$0xff] }
 0x324   : > { %7376 = vmatprep.subr.bf16.mxu1 %v9975_v24  ;;  %v1085_v23 = vld [vmem:[%s11018_s22 + $0xd30] sm:$0xff]  ;;  %v1054_v24 = vld [vmem:[%s11018_s22 + $0xc38] sm:$0xff] }
 0x325   : > { %v9465_v30 = vcombine.high %v1053_v22, %v1085_v23  ;;  %v9464_v36 = vcombine.low %v1053_v22, %v1085_v23  ;;  %v9466_v37 = vcombine.low %v1054_v24, %v1086_v25  ;;  %v1534_v22 = vld [vmem:[%s11018_s22 + $0x1b38] sm:$0xff] }
 0x326   : > { %7336 = vmatpush1.bf16.msra.mxu0 %v9972_v31  ;;  %v9467_v31 = vcombine.high %v1054_v24, %v1086_v25 }
 0x327   : > { %7377 = vmatpush1.bf16.msra.mxu1 %v9974_v32  ;;  %7337 = vmatprep.subr.bf16.mxu0 %v10037_v33  ;;  %v1117_v32 = vld [vmem:[%s11018_s22 + $0xe30] sm:$0xff] }
 0x328   : > { %7378 = vmatprep.subr.bf16.mxu1 %v10039_v34  ;;  %v1149_v33 = vld [vmem:[%s11018_s22 + $0xf30] sm:$0xff]  ;;  %v1118_v34 = vld [vmem:[%s11018_s22 + $0xe38] sm:$0xff] }
 0x329   : > { %v9529_v38 = vcombine.high %v1117_v32, %v1149_v33  ;;  %v9528_v44 = vcombine.low %v1117_v32, %v1149_v33  ;;  %v1598_v32 = vld [vmem:[%s11018_s22 + $0x1d38] sm:$0xff] }
 0x32a   : > { %7338 = vmatpush1.bf16.msra.mxu0 %v10036_v39  ;;  %v9531_v39 = vcombine.high %v1118_v34, %v1150_v35 }
 0x32b   : > { %7379 = vmatpush1.bf16.msra.mxu1 %v10038_v40  ;;  %7389 = vmatprep.subr.bf16.mxu0 %v9081_v41  ;;  %v1181_v40 = vld [vmem:[%s11018_s22 + $0x1030] sm:$0xff] }
 0x32c   : > { %7430 = vmatprep.subr.bf16.mxu1 %v9083_v42  ;;  %v1213_v41 = vld [vmem:[%s11018_s22 + $0x1130] sm:$0xff]  ;;  %v1182_v42 = vld [vmem:[%s11018_s22 + $0x1038] sm:$0xff] }
 0x32d   : > { %7340 = vmatmul.mubr.bf16.vlgmr.msra.gmra.mrb[12].mxu0 %v11123_v28  ;;  %v9593_v46 = vcombine.high %v1181_v40, %v1213_v41  ;;  %v9595_v47 = vcombine.high %v1182_v42, %v1214_v43  ;;  %v9594_v57 = vcombine.low %v1182_v42, %v1214_v43 }
 0x32e   : > { %7381 = vmatmul.mubr.bf16.vlgmr.msra.gmra.mrb[12].mxu1 %v11123_v28  ;;  %7390 = vmatpush1.bf16.msra.mxu0 %v9080_v45  ;;  %v9530_v45 = vcombine.low %v1118_v34, %v1150_v35 }
 0x32f   : > { %7421 = vmatprep.mubr.bf16.mxu0 %v11121_v27  ;;  %7431 = vmatpush1.bf16.msra.mxu1 %v9082_v48  ;;  %v1245_v48 = vld [vmem:[%s11018_s22 + $0x1230] sm:$0xff] }
 0x330   : > { %7462 = vmatprep.mubr.bf16.mxu1 %v11121_v27  ;;  %7391 = vmatprep.subr.bf16.mxu0 %v9145_v49  ;;  %v1277_v49 = vld [vmem:[%s11018_s22 + $0x1330] sm:$0xff] }
 0x331   : > { %7432 = vmatprep.subr.bf16.mxu1 %v9147_v55  ;;  %v9592_v55 = vcombine.low %v1181_v40, %v1213_v41  ;;  %v9657_v58 = vcombine.high %v1245_v48, %v1277_v49  ;;  %v9656_v2 = vcombine.low %v1245_v48, %v1277_v49  ;;  %v1662_v40 = vld [vmem:[%s11018_s22 + $0x1f38] sm:$0xff]  ;;  %v704_v48 = vld [vmem:[%s11018_s22 + $0x148] sm:$0xff] }
 0x332   : > { %7392 = vmatpush1.bf16.msra.mxu0 %v9144_v60  ;;  %v9659_v60 = vcombine.high %v1246_v50, %v1278_v53 }
 0x333   : > { %7433 = vmatpush1.bf16.msra.mxu1 %v9146_v61  ;;  %7393 = vmatprep.subr.bf16.mxu0 %v9209_v63  ;;  %v1309_v61 = vld [vmem:[%s11018_s22 + $0x1430] sm:$0xff] }
 0x334   : > { %7434 = vmatprep.subr.bf16.mxu1 %v9211_v0  ;;  %v1341_v63 = vld [vmem:[%s11018_s22 + $0x1530] sm:$0xff]  ;;  %v1310_v0 = vld [vmem:[%s11018_s22 + $0x1438] sm:$0xff] }
 0x335   : > { %v9721_v4 = vcombine.high %v1309_v61, %v1341_v63  ;;  %v9720_v10 = vcombine.low %v1309_v61, %v1341_v63  ;;  %v9722_v11 = vcombine.low %v1310_v0, %v1342_v1  ;;  %v736_v61 = vld [vmem:[%s11018_s22 + $0x248] sm:$0xff] }
 0x336   : > { %7394 = vmatpush1.bf16.msra.mxu0 %v9208_v5  ;;  %v9723_v5 = vcombine.high %v1310_v0, %v1342_v1  ;;  %v768_v63 = vld [vmem:[%s11018_s22 + $0x348] sm:$0xff] }
 0x337   : > { %7435 = vmatpush1.bf16.msra.mxu1 %v9210_v6  ;;  %7395 = vmatprep.subr.bf16.mxu0 %v9273_v7  ;;  %v1373_v6 = vld [vmem:[%s11018_s22 + $0x1630] sm:$0xff] }
 0x338   : > { %7436 = vmatprep.subr.bf16.mxu1 %v9275_v8  ;;  %v1405_v7 = vld [vmem:[%s11018_s22 + $0x1730] sm:$0xff]  ;;  %v1374_v8 = vld [vmem:[%s11018_s22 + $0x1638] sm:$0xff] }
 0x339   : > { %v9785_v12 = vcombine.high %v1373_v6, %v1405_v7  ;;  %v9784_v62 = vcombine.low %v1373_v6, %v1405_v7  ;;  %v9786_v16 = vcombine.low %v1374_v8, %v1406_v9  ;;  %v832_v6 = vld [vmem:[%s11018_s22 + $0x548] sm:$0xff] }
 0x33a   : > { %7396 = vmatpush1.bf16.msra.mxu0 %v9272_v13  ;;  %v9787_v13 = vcombine.high %v1374_v8, %v1406_v9  ;;  %v9150_v8 = vcombine.low %v736_v61, %v768_v63 }
 0x33b   : > { %7437 = vmatpush1.bf16.msra.mxu1 %v9274_v14  ;;  %7397 = vmatprep.subr.bf16.mxu0 %v9337_v15  ;;  %v1437_v14 = vld [vmem:[%s11018_s22 + $0x1830] sm:$0xff] }
 0x33c   : > { %7438 = vmatprep.subr.bf16.mxu1 %v9339_v56  ;;  %v1469_v15 = vld [vmem:[%s11018_s22 + $0x1930] sm:$0xff]  ;;  %v1438_v56 = vld [vmem:[%s11018_s22 + $0x1838] sm:$0xff] }
 0x33d   : > { %v9849_v17 = vcombine.high %v1437_v14, %v1469_v15  ;;  %v9848_v23 = vcombine.low %v1437_v14, %v1469_v15  ;;  %v9850_v24 = vcombine.low %v1438_v56, %v1470_v59  ;;  %v896_v14 = vld [vmem:[%s11018_s22 + $0x748] sm:$0xff] }
 0x33e   : > { %7398 = vmatpush1.bf16.msra.mxu0 %v9336_v18  ;;  %v9851_v18 = vcombine.high %v1438_v56, %v1470_v59 }
 0x33f   : > { %7439 = vmatpush1.bf16.msra.mxu1 %v9338_v19  ;;  %7399 = vmatprep.subr.bf16.mxu0 %v9401_v20  ;;  %v1501_v19 = vld [vmem:[%s11018_s22 + $0x1a30] sm:$0xff] }
 0x340   : > { %7440 = vmatprep.subr.bf16.mxu1 %v9403_v21  ;;  %v1533_v20 = vld [vmem:[%s11018_s22 + $0x1b30] sm:$0xff]  ;;  %v1502_v21 = vld [vmem:[%s11018_s22 + $0x1a38] sm:$0xff] }
 0x341   : > { %v9913_v25 = vcombine.high %v1501_v19, %v1533_v20  ;;  %v9912_v33 = vcombine.low %v1501_v19, %v1533_v20  ;;  %v9914_v34 = vcombine.low %v1502_v21, %v1534_v22  ;;  %v960_v19 = vld [vmem:[%s11018_s22 + $0x948] sm:$0xff] }
 0x342   : > { %7400 = vmatpush1.bf16.msra.mxu0 %v9400_v26  ;;  %v9915_v26 = vcombine.high %v1502_v21, %v1534_v22 }
 0x343   : > { %7441 = vmatpush1.bf16.msra.mxu1 %v9402_v29  ;;  %7401 = vmatprep.subr.bf16.mxu0 %v9465_v30  ;;  %v1565_v29 = vld [vmem:[%s11018_s22 + $0x1c30] sm:$0xff] }
 0x344   : > { %7442 = vmatprep.subr.bf16.mxu1 %v9467_v31  ;;  %v1597_v30 = vld [vmem:[%s11018_s22 + $0x1d30] sm:$0xff]  ;;  %v1566_v31 = vld [vmem:[%s11018_s22 + $0x1c38] sm:$0xff] }
 0x345   : > { %v9977_v35 = vcombine.high %v1565_v29, %v1597_v30  ;;  %v9976_v41 = vcombine.low %v1565_v29, %v1597_v30  ;;  %v9978_v42 = vcombine.low %v1566_v31, %v1598_v32  ;;  %v992_v29 = vld [vmem:[%s11018_s22 + $0xa48] sm:$0xff] }
 0x346   : > { %7402 = vmatpush1.bf16.msra.mxu0 %v9464_v36  ;;  %v9979_v36 = vcombine.high %v1566_v31, %v1598_v32  ;;  %v1024_v30 = vld [vmem:[%s11018_s22 + $0xb48] sm:$0xff]  ;;  %v11358_v32 = vld [vmem:[%s11355_s9] sm:$0xff] }
 0x347   : > { %7443 = vmatpush1.bf16.msra.mxu1 %v9466_v37  ;;  %7403 = vmatprep.subr.bf16.mxu0 %v9529_v38  ;;  %v1629_v37 = vld [vmem:[%s11018_s22 + $0x1e30] sm:$0xff] }
 0x348   : > { %7444 = vmatprep.subr.bf16.mxu1 %v9531_v39  ;;  %v1661_v38 = vld [vmem:[%s11018_s22 + $0x1f30] sm:$0xff]  ;;  %v1630_v39 = vld [vmem:[%s11018_s22 + $0x1e38] sm:$0xff] }
 0x349   : > { %v10041_v43 = vcombine.high %v1629_v37, %v1661_v38  ;;  %v10040_v49 = vcombine.low %v1629_v37, %v1661_v38  ;;  %v10042_v50 = vcombine.low %v1630_v39, %v1662_v40  ;;  %v1055_v37 = vld [vmem:[%s11018_s22 + $0xc40] sm:$0xff] }
 0x34a   : > { %7404 = vmatpush1.bf16.msra.mxu0 %v9528_v44  ;;  %v10043_v44 = vcombine.high %v1630_v39, %v1662_v40  ;;  %v1087_v38 = vld [vmem:[%s11018_s22 + $0xd40] sm:$0xff]  ;;  %v1706_v39 = vrot.slane %v11358_v32, %v11067_v52 }
 0x34b   : > { %7445 = vmatpush1.bf16.msra.mxu1 %v9530_v45  ;;  %7405 = vmatprep.subr.bf16.mxu0 %v9593_v46  ;;  %v671_v45 = vld [vmem:[%s11018_s22 + $0x40] sm:$0xff] }
 0x34c   : > { %7446 = vmatprep.subr.bf16.mxu1 %v9595_v47  ;;  %v703_v46 = vld [vmem:[%s11018_s22 + $0x140] sm:$0xff]  ;;  %v672_v47 = vld [vmem:[%s11018_s22 + $0x48] sm:$0xff] }
 0x34d   : > { %v9085_v53 = vcombine.high %v671_v45, %v703_v46  ;;  %v9086_v0 = vcombine.low %v672_v47, %v704_v48 }
 0x34e   : > { %7406 = vmatpush1.bf16.msra.mxu0 %v9592_v55  ;;  %v9087_v55 = vcombine.high %v672_v47, %v704_v48  ;;  %v9469_v47 = vcombine.high %v1055_v37, %v1087_v38 }
 0x34f   : > { %7447 = vmatpush1.bf16.msra.mxu1 %v9594_v57  ;;  %7407 = vmatprep.subr.bf16.mxu0 %v9657_v58  ;;  %v735_v57 = vld [vmem:[%s11018_s22 + $0x240] sm:$0xff] }
 0x350   : > { %7448 = vmatprep.subr.bf16.mxu1 %v9659_v60  ;;  %v767_v58 = vld [vmem:[%s11018_s22 + $0x340] sm:$0xff]  ;;  %v9084_v60 = vcombine.low %v671_v45, %v703_v46  ;;  %v9406_v46 = vcombine.low %v992_v29, %v1024_v30 }
 0x351   : > { %v9149_v1 = vcombine.high %v735_v57, %v767_v58  ;;  %v9148_v7 = vcombine.low %v735_v57, %v767_v58 }
 0x352   : > { %7408 = vmatpush1.bf16.msra.mxu0 %v9656_v2  ;;  %v799_v2 = vld [vmem:[%s11018_s22 + $0x440] sm:$0xff] }
 0x353   : > { %7449 = vmatpush1.bf16.msra.mxu1 %v9658_v3  ;;  %7409 = vmatprep.subr.bf16.mxu0 %v9721_v4  ;;  %v831_v3 = vld [vmem:[%s11018_s22 + $0x540] sm:$0xff]  ;;  %v9151_v4 = vcombine.high %v736_v61, %v768_v63  ;;  %v1120_v63 = vld [vmem:[%s11018_s22 + $0xe48] sm:$0xff] }
 0x354   : > { %7450 = vmatprep.subr.bf16.mxu1 %v9723_v5  ;;  %v800_v5 = vld [vmem:[%s11018_s22 + $0x448] sm:$0xff]  ;;  %v9213_v9 = vcombine.high %v799_v2, %v831_v3  ;;  %v9212_v15 = vcombine.low %v799_v2, %v831_v3 }
 0x355   : > { %v9214_v56 = vcombine.low %v800_v5, %v832_v6 }
 0x356   : > { %7410 = vmatpush1.bf16.msra.mxu0 %v9720_v10  ;;  %v9215_v10 = vcombine.high %v800_v5, %v832_v6  ;;  %v9468_v5 = vcombine.low %v1055_v37, %v1087_v38 }
 0x357   : > { %7451 = vmatpush1.bf16.msra.mxu1 %v9722_v11  ;;  %7411 = vmatprep.subr.bf16.mxu0 %v9785_v12  ;;  %v863_v11 = vld [vmem:[%s11018_s22 + $0x640] sm:$0xff] }
 0x358   : > { %7452 = vmatprep.subr.bf16.mxu1 %v9787_v13  ;;  %v895_v12 = vld [vmem:[%s11018_s22 + $0x740] sm:$0xff]  ;;  %v864_v13 = vld [vmem:[%s11018_s22 + $0x648] sm:$0xff] }
 0x359   : > { %v9277_v59 = vcombine.high %v863_v11, %v895_v12  ;;  %v9276_v20 = vcombine.low %v863_v11, %v895_v12  ;;  %v9278_v21 = vcombine.low %v864_v13, %v896_v14  ;;  %v1183_v11 = vld [vmem:[%s11018_s22 + $0x1040] sm:$0xff] }
 0x35a   : > { %7412 = vmatpush1.bf16.msra.mxu0 %v9784_v62  ;;  %v9279_v62 = vcombine.high %v864_v13, %v896_v14  ;;  %v1215_v12 = vld [vmem:[%s11018_s22 + $0x1140] sm:$0xff]  ;;  %v1184_v13 = vld [vmem:[%s11018_s22 + $0x1048] sm:$0xff] }
 0x35b   : > { %7453 = vmatpush1.bf16.msra.mxu1 %v9786_v16  ;;  %7413 = vmatprep.subr.bf16.mxu0 %v9849_v17  ;;  %v927_v16 = vld [vmem:[%s11018_s22 + $0x840] sm:$0xff]  ;;  %v1216_v14 = vld [vmem:[%s11018_s22 + $0x1148] sm:$0xff] }
 0x35c   : > { %7454 = vmatprep.subr.bf16.mxu1 %v9851_v18  ;;  %v959_v17 = vld [vmem:[%s11018_s22 + $0x940] sm:$0xff]  ;;  %v928_v18 = vld [vmem:[%s11018_s22 + $0x848] sm:$0xff] }
 0x35d   : > { %v9341_v22 = vcombine.high %v927_v16, %v959_v17  ;;  %v9340_v31 = vcombine.low %v927_v16, %v959_v17  ;;  %v9597_v16 = vcombine.high %v1183_v11, %v1215_v12  ;;  %v9599_v17 = vcombine.high %v1184_v13, %v1216_v14 }
 0x35e   : > { %7414 = vmatpush1.bf16.msra.mxu0 %v9848_v23  ;;  %v9343_v23 = vcombine.high %v928_v18, %v960_v19 }
 0x35f   : > { %7455 = vmatpush1.bf16.msra.mxu1 %v9850_v24  ;;  %7415 = vmatprep.subr.bf16.mxu0 %v9913_v25  ;;  %v991_v24 = vld [vmem:[%s11018_s22 + $0xa40] sm:$0xff] }
 0x360   : > { %7456 = vmatprep.subr.bf16.mxu1 %v9915_v26  ;;  %v1023_v25 = vld [vmem:[%s11018_s22 + $0xb40] sm:$0xff]  ;;  %v11351_v26 = vsub.s32 2, %v11064_v51 }
 0x362   : > { %7416 = vmatpush1.bf16.msra.mxu0 %v9912_v33  ;;  %v11361_v33 = vsub.s32 3, %v11064_v51  ;;  %v1714_v40 = vrot.slane %v11358_v32, %v11351_v26 }
 0x363   : > { %7457 = vmatpush1.bf16.msra.mxu1 %v9914_v34  ;;  %7417 = vmatprep.subr.bf16.mxu0 %v9977_v35  ;;  %v9342_v34 = vcombine.low %v928_v18, %v960_v19  ;;  %v9405_v35 = vcombine.high %v991_v24, %v1023_v25  ;;  %v1247_v18 = vld [vmem:[%s11018_s22 + $0x1240] sm:$0xff] }
 0x364   : > { %7458 = vmatprep.subr.bf16.mxu1 %v9979_v36  ;;  %v9407_v36 = vcombine.high %v992_v29, %v1024_v30  ;;  %v1718_v45 = vrot.slane %v11358_v32, %v11361_v33  ;;  %v1279_v19 = vld [vmem:[%s11018_s22 + $0x1340] sm:$0xff] }
 0x365   : > { %v1311_v30 = vld [vmem:[%s11018_s22 + $0x1440] sm:$0xff] }
 0x366   : > { %7418 = vmatpush1.bf16.msra.mxu0 %v9976_v41  ;;  %v1056_v41 = vld [vmem:[%s11018_s22 + $0xc48] sm:$0xff] }
 0x367   : > { %7459 = vmatpush1.bf16.msra.mxu1 %v9978_v42  ;;  %7419 = vmatprep.subr.bf16.mxu0 %v10041_v43  ;;  %v1088_v42 = vld [vmem:[%s11018_s22 + $0xd48] sm:$0xff]  ;;  %v9404_v43 = vcombine.low %v991_v24, %v1023_v25  ;;  %v9598_v24 = vcombine.low %v1184_v13, %v1216_v14  ;;  %v9661_v25 = vcombine.high %v1247_v18, %v1279_v19 }
 0x368   : > { %7460 = vmatprep.subr.bf16.mxu1 %v10043_v44  ;;  %v1710_v44 = vrot.slane %v11358_v32, %v11070_v54 }
 0x36a   : > { %7420 = vmatpush1.bf16.msra.mxu0 %v10040_v49 }
 0x36b   : > { %7461 = vmatpush1.bf16.msra.mxu1 %v10042_v50  ;;  %7471 = vmatprep.subr.bf16.mxu0 %v9085_v53  ;;  %v9471_v50 = vcombine.high %v1056_v41, %v1088_v42  ;;  %v1119_v53 = vld [vmem:[%s11018_s22 + $0xe40] sm:$0xff] }
 0x36c   : > { %7512 = vmatprep.subr.bf16.mxu1 %v9087_v55  ;;  %v1151_v55 = vld [vmem:[%s11018_s22 + $0xf40] sm:$0xff] }
 0x36d   : > { %7422 = vmatmul.mubr.bf16.vlgmr.msra.gmra.mrb[16].mxu0 %v11123_v28 }
 0x36e   : > { %7463 = vmatmul.mubr.bf16.vlgmr.msra.gmra.mrb[16].mxu1 %v11123_v28  ;;  %7472 = vmatpush1.bf16.msra.mxu0 %v9084_v60 }
 0x36f   : > { %7503 = vmatprep.mubr.bf16.mxu0 %v11121_v27  ;;  %7513 = vmatpush1.bf16.msra.mxu1 %v9086_v0  ;;  %v1152_v0 = vld [vmem:[%s11018_s22 + $0xf48] sm:$0xff] }
 0x370   : > { %7544 = vmatprep.mubr.bf16.mxu1 %v11121_v27  ;;  %7473 = vmatprep.subr.bf16.mxu0 %v9149_v1 }
 0x371   : > { %7514 = vmatprep.subr.bf16.mxu1 %v9151_v4 }
 0x372   : > { %7474 = vmatpush1.bf16.msra.mxu0 %v9148_v7 }
 0x373   : > { %7515 = vmatpush1.bf16.msra.mxu1 %v9150_v8  ;;  %7475 = vmatprep.subr.bf16.mxu0 %v9213_v9  ;;  %v9470_v8 = vcombine.low %v1056_v41, %v1088_v42  ;;  %v9533_v9 = vcombine.high %v1119_v53, %v1151_v55 }
 0x374   : > { %7516 = vmatprep.subr.bf16.mxu1 %v9215_v10  ;;  %v9535_v10 = vcombine.high %v1120_v63, %v1152_v0 }
 0x376   : > { %7476 = vmatpush1.bf16.msra.mxu0 %v9212_v15  ;;  %v10702_v15 = vmov 1983009808  }
 0x377   : > { %7517 = vmatpush1.bf16.msra.mxu1 %v9214_v56  ;;  %7477 = vmatprep.subr.bf16.mxu0 %v9277_v59  ;;  %v8586_v56 = vunpack.c.l.s4 %v10702_v15  ;;  %v9532_v59 = vcombine.low %v1119_v53, %v1151_v55 }
 0x378   : > { %7518 = vmatprep.subr.bf16.mxu1 %v9279_v62  ;;  %v9534_v62 = vcombine.low %v1120_v63, %v1152_v0  ;;  %v1439_v63 = vld [vmem:[%s11018_s22 + $0x1840] sm:$0xff] }
 0x379   : > { %v1471_v0 = vld [vmem:[%s11018_s22 + $0x1940] sm:$0xff] }
 0x37a   : > { %7478 = vmatpush1.bf16.msra.mxu0 %v9276_v20  ;;  %v1248_v20 = vld [vmem:[%s11018_s22 + $0x1248] sm:$0xff] }
 0x37b   : > { %7519 = vmatpush1.bf16.msra.mxu1 %v9278_v21  ;;  %7479 = vmatprep.subr.bf16.mxu0 %v9341_v22  ;;  %v1280_v21 = vld [vmem:[%s11018_s22 + $0x1348] sm:$0xff]  ;;  %v8587_v22 = vunpack.c.0.s8 %v8586_v56  ;;  %v1567_v56 = vld [vmem:[%s11018_s22 + $0x1c40] sm:$0xff] }
 0x37c   : > { %7520 = vmatprep.subr.bf16.mxu1 %v9343_v23  ;;  %v9596_v23 = vcombine.low %v1183_v11, %v1215_v12  ;;  %v9663_v29 = vcombine.high %v1248_v20, %v1280_v21  ;;  %v9662_v41 = vcombine.low %v1248_v20, %v1280_v21  ;;  %v1536_v11 = vld [vmem:[%s11018_s22 + $0x1b48] sm:$0xff]  ;;  %v9852_v12 = vcombine.low %v1439_v63, %v1471_v0  ;;  %v1631_v21 = vld [vmem:[%s11018_s22 + $0x1e40] sm:$0xff] }
 0x37d   : > { %v11392_v38 = vsub.s32 %v8587_v22, %v11064_v51  ;;  %v1663_v22 = vld [vmem:[%s11018_s22 + $0x1f40] sm:$0xff] }
 0x37e   : > { %7480 = vmatpush1.bf16.msra.mxu0 %v9340_v31  ;;  %v1343_v31 = vld [vmem:[%s11018_s22 + $0x1540] sm:$0xff] }
 0x37f   : > { %7521 = vmatpush1.bf16.msra.mxu1 %v9342_v34  ;;  %7481 = vmatprep.subr.bf16.mxu0 %v9405_v35  ;;  %v1312_v35 = vld [vmem:[%s11018_s22 + $0x1448] sm:$0xff]  ;;  %v9725_v42 = vcombine.high %v1311_v30, %v1343_v31  ;;  %v9724_v55 = vcombine.low %v1311_v30, %v1343_v31  ;;  %v10045_v30 = vcombine.high %v1631_v21, %v1663_v22 }
 0x380   : > { %v7177_v48 = vpop.f32.mrb[4].mxu0  ;;  %v7218_v49 = vpop.f32.mrb[4].mxu1  ;;  %7522 = vmatprep.subr.bf16.mxu1 %v9407_v36  ;;  %v1344_v36 = vld [vmem:[%s11018_s22 + $0x1548] sm:$0xff] }
 0x381   : > { %v7178_v57 = vadd.f32 %v7177_v48, %v1706_v39  ;;  %v7219_v58 = vadd.f32 %v7218_v49, %v1714_v40  ;;  %v7179_v60 = vpop.f32.mrb[5].mxu0  ;;  %v7220_v61 = vpop.f32.mrb[5].mxu1  ;;  %v9660_v39 = vcombine.low %v1247_v18, %v1279_v19  ;;  %v1376_v49 = vld [vmem:[%s11018_s22 + $0x1648] sm:$0xff] }
 0x382   : > { %v7180_v1 = vadd.f32 %v7179_v60, %v1710_v44  ;;  %v7221_v2 = vadd.f32 %v7220_v61, %v1718_v45  ;;  %7482 = vmatpush1.bf16.msra.mxu0 %v9404_v43  ;;  %v7181_v3 = vpop.f32.mrb[6].mxu0  ;;  %v7222_v4 = vpop.f32.mrb[6].mxu1  ;;  %v9727_v45 = vcombine.high %v1312_v35, %v1344_v36 }
 0x383   : > { %10283 = vtanh.f32 %v7178_v57  ;;  %7523 = vmatpush1.bf16.msra.mxu1 %v9406_v46  ;;  %v7182_v6 = vpop.f32.mrb[7].mxu0  ;;  %v7223_v7 = vpop.f32.mrb[7].mxu1  ;;  %7483 = vmatprep.subr.bf16.mxu0 %v9469_v47  ;;  %v1375_v46 = vld [vmem:[%s11018_s22 + $0x1640] sm:$0xff]  ;;  %v1472_v3 = vld [vmem:[%s11018_s22 + $0x1948] sm:$0xff] }
 0x384   : > { %10285 = vtanh.f32 %v7219_v58  ;;  %7524 = vmatprep.subr.bf16.mxu1 %v9471_v50  ;;  %v1407_v47 = vld [vmem:[%s11018_s22 + $0x1740] sm:$0xff]  ;;  %v1408_v50 = vld [vmem:[%s11018_s22 + $0x1748] sm:$0xff]  ;;  %v9726_v58 = vcombine.low %v1312_v35, %v1344_v36  ;;  %v9853_v6 = vcombine.high %v1439_v63, %v1471_v0  ;;  %v705_v35 = vld [vmem:[%s11018_s22 + $0x150] sm:$0xff] }
 0x385   : > { %10287 = vtanh.f32 %v7180_v1  ;;  %v9789_v60 = vcombine.high %v1375_v46, %v1407_v47  ;;  %v9791_v61 = vcombine.high %v1376_v49, %v1408_v50  ;;  %v9788_v4 = vcombine.low %v1375_v46, %v1407_v47  ;;  %v674_v36 = vld [vmem:[%s11018_s22 + $0x58] sm:$0xff] }
 0x386   : > { %10289 = vtanh.f32 %v7221_v2  ;;  %7484 = vmatpush1.bf16.msra.mxu0 %v9468_v5  ;;  %v1440_v2 = vld [vmem:[%s11018_s22 + $0x1848] sm:$0xff]  ;;  %v9790_v5 = vcombine.low %v1376_v49, %v1408_v50  ;;  %v738_v46 = vld [vmem:[%s11018_s22 + $0x258] sm:$0xff]  ;;  %v801_v50 = vld [vmem:[%s11018_s22 + $0x450] sm:$0xff] }
 0x387   : > { %7525 = vmatpush1.bf16.msra.mxu1 %v9470_v8  ;;  %7485 = vmatprep.subr.bf16.mxu0 %v9533_v9  ;;  %v9855_v7 = vcombine.high %v1440_v2, %v1472_v3  ;;  %v1503_v8 = vld [vmem:[%s11018_s22 + $0x1a40] sm:$0xff]  ;;  %v9854_v13 = vcombine.low %v1440_v2, %v1472_v3  ;;  %v770_v47 = vld [vmem:[%s11018_s22 + $0x358] sm:$0xff]  ;;  %v897_v2 = vld [vmem:[%s11018_s22 + $0x750] sm:$0xff] }
 0x388   : > { %7526 = vmatprep.subr.bf16.mxu1 %v9535_v10  ;;  %v1535_v9 = vld [vmem:[%s11018_s22 + $0x1b40] sm:$0xff]  ;;  %v1504_v10 = vld [vmem:[%s11018_s22 + $0x1a48] sm:$0xff]  ;;  %v866_v3 = vld [vmem:[%s11018_s22 + $0x658] sm:$0xff] }
 0x389   : > { %v9917_v14 = vcombine.high %v1503_v8, %v1535_v9  ;;  %v9919_v15 = vcombine.high %v1504_v10, %v1536_v11  ;;  %v9918_v18 = vcombine.low %v1504_v10, %v1536_v11  ;;  %v961_v10 = vld [vmem:[%s11018_s22 + $0x950] sm:$0xff]  ;;  %v930_v11 = vld [vmem:[%s11018_s22 + $0x858] sm:$0xff] }
 0x38a   : > { %7486 = vmatpush1.bf16.msra.mxu0 %v9532_v59  ;;  %v1599_v59 = vld [vmem:[%s11018_s22 + $0x1d40] sm:$0xff] }
 0x38b   : > { %7527 = vmatpush1.bf16.msra.mxu1 %v9534_v62  ;;  %7487 = vmatprep.subr.bf16.mxu0 %v9597_v16  ;;  %v1568_v62 = vld [vmem:[%s11018_s22 + $0x1c48] sm:$0xff]  ;;  %v9981_v19 = vcombine.high %v1567_v56, %v1599_v59 }
 0x38c   : > { %7528 = vmatprep.subr.bf16.mxu1 %v9599_v17  ;;  %v1600_v16 = vld [vmem:[%s11018_s22 + $0x1d48] sm:$0xff]  ;;  %v9916_v17 = vcombine.low %v1503_v8, %v1535_v9  ;;  %v929_v9 = vld [vmem:[%s11018_s22 + $0x850] sm:$0xff] }
 0x38d   : > { %v10284_v34 = vpop.eup %10283  ;;  %v9983_v20 = vcombine.high %v1568_v62, %v1600_v16 }
 0x38e   : > { %v10286_v37 = vpop.eup %10285  ;;  %7488 = vmatpush1.bf16.msra.mxu0 %v9596_v23  ;;  %v1632_v23 = vld [vmem:[%s11018_s22 + $0x1e48] sm:$0xff] }
 0x38f   : > { %v10288_v40 = vpop.eup %10287  ;;  %7529 = vmatpush1.bf16.msra.mxu1 %v9598_v24  ;;  %7489 = vmatprep.subr.bf16.mxu0 %v9661_v25  ;;  %v1664_v24 = vld [vmem:[%s11018_s22 + $0x1f48] sm:$0xff]  ;;  %v9980_v25 = vcombine.low %v1567_v56, %v1599_v59  ;;  %v993_v59 = vld [vmem:[%s11018_s22 + $0xa50] sm:$0xff] }
 0x390   : > { %v10290_v43 = vpop.eup %10289  ;;  %v8583_v44 = vcombine.low %v10284_v34, %v10288_v40  ;;  %7530 = vmatprep.subr.bf16.mxu1 %v9663_v29  ;;  %v9982_v29 = vcombine.low %v1568_v62, %v1600_v16  ;;  %v10047_v31 = vcombine.high %v1632_v23, %v1664_v24  ;;  %v673_v34 = vld [vmem:[%s11018_s22 + $0x50] sm:$0xff]  ;;  %v10046_v40 = vcombine.low %v1632_v23, %v1664_v24 }
 0x391   : > { %v8584_v48 = vcombine.low %v10286_v37, %v10290_v43  ;;  %v706_v37 = vld [vmem:[%s11018_s22 + $0x158] sm:$0xff]  ;;  %v737_v43 = vld [vmem:[%s11018_s22 + $0x250] sm:$0xff]  ;;  %v11447_v16 = vsub.s32 4, %v11064_v51 }
 0x392   : > { %v8591_v53 = vrot.slane %v8583_v44, %v11392_v38  ;;  %7490 = vmatpush1.bf16.msra.mxu0 %v9660_v39  ;;  %v10044_v39 = vcombine.low %v1631_v21, %v1663_v22  ;;  %v769_v44 = vld [vmem:[%s11018_s22 + $0x350] sm:$0xff]  ;;  %v11455_v21 = vsub.s32 5, %v11064_v51  ;;  %v11458_v22 = vsub.s32 7, %v11064_v51 }
 0x393   : > { %v8598_v57 = vrot.slane %v8584_v48, %v11392_v38  ;;  %7531 = vmatpush1.bf16.msra.mxu1 %v9662_v41  ;;  %7491 = vmatprep.subr.bf16.mxu0 %v9725_v42  ;;  %v9089_v41 = vcombine.high %v673_v34, %v705_v35  ;;  %v9091_v42 = vcombine.high %v674_v36, %v706_v37  ;;  %v1025_v62 = vld [vmem:[%s11018_s22 + $0xb50] sm:$0xff] }
 0x394   : > { %7532 = vmatprep.subr.bf16.mxu1 %v9727_v45  ;;  %v9088_v45 = vcombine.low %v673_v34, %v705_v35  ;;  %v9090_v48 = vcombine.low %v674_v36, %v706_v37  ;;  %v9153_v49 = vcombine.high %v737_v43, %v769_v44  ;;  %v9409_v24 = vcombine.high %v993_v59, %v1025_v62  ;;  %v1058_v35 = vld [vmem:[%s11018_s22 + $0xc58] sm:$0xff] }
 0x395   : > { %v8599_v1 = vcombine.low %v8591_v53, %v8598_v57  ;;  %v833_v53 = vld [vmem:[%s11018_s22 + $0x550] sm:$0xff]  ;;  %v802_v57 = vld [vmem:[%s11018_s22 + $0x458] sm:$0xff]  ;;  %v1734_v37 = vrot.slane %v11358_v32, %v11458_v22 }
 0x396   : > { %7492 = vmatpush1.bf16.msra.mxu0 %v9724_v55  ;;  %v9155_v55 = vcombine.high %v738_v46, %v770_v47  ;;  %v9217_v63 = vcombine.high %v801_v50, %v833_v53  ;;  %v1090_v36 = vld [vmem:[%s11018_s22 + $0xd58] sm:$0xff] }
 0x397   : > { %8871 = vst [vmem:[%s11405_s24] sm:$0xff] %v8599_v1  ;;  %7533 = vmatpush1.bf16.msra.mxu1 %v9726_v58  ;;  %7493 = vmatprep.subr.bf16.mxu0 %v9789_v60  ;;  %v834_v58 = vld [vmem:[%s11018_s22 + $0x558] sm:$0xff]  ;;  %v9152_v60 = vcombine.low %v737_v43, %v769_v44  ;;  %v865_v1 = vld [vmem:[%s11018_s22 + $0x650] sm:$0xff]  ;;  %v9475_v44 = vcombine.high %v1058_v35, %v1090_v36 }
 0x398   : > { %7534 = vmatprep.subr.bf16.mxu1 %v9791_v61  ;;  %v9154_v61 = vcombine.low %v738_v46, %v770_v47  ;;  %v9219_v0 = vcombine.high %v802_v57, %v834_v58  ;;  %v1153_v46 = vld [vmem:[%s11018_s22 + $0xf50] sm:$0xff] }
 0x39a   : > { %7494 = vmatpush1.bf16.msra.mxu0 %v9788_v4  ;;  %v898_v4 = vld [vmem:[%s11018_s22 + $0x758] sm:$0xff] }
 0x39b   : > { %7535 = vmatpush1.bf16.msra.mxu1 %v9790_v5  ;;  %7495 = vmatprep.subr.bf16.mxu0 %v9853_v6  ;;  %v9216_v5 = vcombine.low %v801_v50, %v833_v53  ;;  %v9218_v6 = vcombine.low %v802_v57, %v834_v58  ;;  %v9283_v8 = vcombine.high %v866_v3, %v898_v4  ;;  %v1122_v53 = vld [vmem:[%s11018_s22 + $0xe58] sm:$0xff] }
 0x39c   : > { %7536 = vmatprep.subr.bf16.mxu1 %v9855_v7  ;;  %v9281_v7 = vcombine.high %v865_v1, %v897_v2 }
 0x39e   : > { %7496 = vmatpush1.bf16.msra.mxu0 %v9852_v12  ;;  %v962_v12 = vld [vmem:[%s11018_s22 + $0x958] sm:$0xff] }
 0x39f   : > { %7537 = vmatpush1.bf16.msra.mxu1 %v9854_v13  ;;  %7497 = vmatprep.subr.bf16.mxu0 %v9917_v14  ;;  %v9280_v13 = vcombine.low %v865_v1, %v897_v2  ;;  %v9282_v14 = vcombine.low %v866_v3, %v898_v4  ;;  %v9347_v56 = vcombine.high %v930_v11, %v962_v12  ;;  %v1185_v4 = vld [vmem:[%s11018_s22 + $0x1050] sm:$0xff] }
 0x3a0   : > { %7538 = vmatprep.subr.bf16.mxu1 %v9919_v15  ;;  %v9345_v15 = vcombine.high %v929_v9, %v961_v10  ;;  %v9346_v23 = vcombine.low %v930_v11, %v962_v12  ;;  %v9474_v1 = vcombine.low %v1058_v35, %v1090_v36  ;;  %v1249_v12 = vld [vmem:[%s11018_s22 + $0x1250] sm:$0xff] }
 0x3a2   : > { %7498 = vmatpush1.bf16.msra.mxu0 %v9916_v17  ;;  %v11450_v17 = vsub.s32 6, %v11064_v51  ;;  %v1726_v51 = vrot.slane %v11358_v32, %v11455_v21 }
 0x3a3   : > { %7539 = vmatpush1.bf16.msra.mxu1 %v9918_v18  ;;  %7499 = vmatprep.subr.bf16.mxu0 %v9981_v19  ;;  %v994_v18 = vld [vmem:[%s11018_s22 + $0xa58] sm:$0xff] }
 0x3a4   : > { %7540 = vmatprep.subr.bf16.mxu1 %v9983_v20  ;;  %v1026_v19 = vld [vmem:[%s11018_s22 + $0xb58] sm:$0xff]  ;;  %v9344_v20 = vcombine.low %v929_v9, %v961_v10  ;;  %v1730_v34 = vrot.slane %v11358_v32, %v11450_v17 }
 0x3a6   : > { %7500 = vmatpush1.bf16.msra.mxu0 %v9980_v25  ;;  %v9411_v25 = vcombine.high %v994_v18, %v1026_v19 }
 0x3a7   : > { %7541 = vmatpush1.bf16.msra.mxu1 %v9982_v29  ;;  %7501 = vmatprep.subr.bf16.mxu0 %v10045_v30  ;;  %v1057_v29 = vld [vmem:[%s11018_s22 + $0xc50] sm:$0xff] }
 0x3a8   : > { %7542 = vmatprep.subr.bf16.mxu1 %v10047_v31  ;;  %v1089_v30 = vld [vmem:[%s11018_s22 + $0xd50] sm:$0xff]  ;;  %v1722_v31 = vrot.slane %v11358_v32, %v11447_v16 }
 0x3aa   : > { %7502 = vmatpush1.bf16.msra.mxu0 %v10044_v39  ;;  %v9408_v39 = vcombine.low %v993_v59, %v1025_v62 }
 0x3ab   : > { %7543 = vmatpush1.bf16.msra.mxu1 %v10046_v40  ;;  %7553 = vmatprep.subr.bf16.mxu0 %v9089_v41  ;;  %v9410_v40 = vcombine.low %v994_v18, %v1026_v19  ;;  %v9473_v41 = vcombine.high %v1057_v29, %v1089_v30  ;;  %v1313_v19 = vld [vmem:[%s11018_s22 + $0x1450] sm:$0xff] }
 0x3ac   : > { %7594 = vmatprep.subr.bf16.mxu1 %v9091_v42 }
 0x3ad   : > { %7504 = vmatmul.mubr.bf16.vlgmr.msra.gmra.mrb[20].mxu0 %v11123_v28 }
 0x3ae   : > { %7545 = vmatmul.mubr.bf16.vlgmr.msra.gmra.mrb[20].mxu1 %v11123_v28  ;;  %7554 = vmatpush1.bf16.msra.mxu0 %v9088_v45  ;;  %v1121_v45 = vld [vmem:[%s11018_s22 + $0xe50] sm:$0xff] }
 0x3af   : > { %7585 = vmatprep.mubr.bf16.mxu0 %v11121_v27  ;;  %7595 = vmatpush1.bf16.msra.mxu1 %v9090_v48  ;;  %v9537_v2 = vcombine.high %v1121_v45, %v1153_v46 }
 0x3b0   : > { %7626 = vmatprep.mubr.bf16.mxu1 %v11121_v27  ;;  %7555 = vmatprep.subr.bf16.mxu0 %v9153_v49 }
 0x3b1   : > { %7596 = vmatprep.subr.bf16.mxu1 %v9155_v55  ;;  %v1154_v55 = vld [vmem:[%s11018_s22 + $0xf58] sm:$0xff] }
 0x3b2   : > { %7556 = vmatpush1.bf16.msra.mxu0 %v9152_v60  ;;  %v9539_v3 = vcombine.high %v1122_v53, %v1154_v55  ;;  %v9538_v9 = vcombine.low %v1122_v53, %v1154_v55  ;;  %v1473_v53 = vld [vmem:[%s11018_s22 + $0x1950] sm:$0xff] }
 0x3b3   : > { %7597 = vmatpush1.bf16.msra.mxu1 %v9154_v61  ;;  %7557 = vmatprep.subr.bf16.mxu0 %v9217_v63  ;;  %v9472_v61 = vcombine.low %v1057_v29, %v1089_v30 }
 0x3b4   : > { %7598 = vmatprep.subr.bf16.mxu1 %v9219_v0 }
 0x3b6   : > { %7558 = vmatpush1.bf16.msra.mxu0 %v9216_v5  ;;  %v1217_v5 = vld [vmem:[%s11018_s22 + $0x1150] sm:$0xff] }
 0x3b7   : > { %7599 = vmatpush1.bf16.msra.mxu1 %v9218_v6  ;;  %7559 = vmatprep.subr.bf16.mxu0 %v9281_v7  ;;  %v1186_v6 = vld [vmem:[%s11018_s22 + $0x1058] sm:$0xff]  ;;  %v9601_v10 = vcombine.high %v1185_v4, %v1217_v5 }
 0x3b8   : > { %7600 = vmatprep.subr.bf16.mxu1 %v9283_v8  ;;  %v1218_v7 = vld [vmem:[%s11018_s22 + $0x1158] sm:$0xff]  ;;  %v9536_v8 = vcombine.low %v1121_v45, %v1153_v46 }
 0x3b9   : > { %v9603_v11 = vcombine.high %v1186_v6, %v1218_v7  ;;  %v9602_v59 = vcombine.low %v1186_v6, %v1218_v7 }
 0x3ba   : > { %7560 = vmatpush1.bf16.msra.mxu0 %v9280_v13  ;;  %v1281_v13 = vld [vmem:[%s11018_s22 + $0x1350] sm:$0xff] }
 0x3bb   : > { %7601 = vmatpush1.bf16.msra.mxu1 %v9282_v14  ;;  %7561 = vmatprep.subr.bf16.mxu0 %v9345_v15  ;;  %v1250_v14 = vld [vmem:[%s11018_s22 + $0x1258] sm:$0xff]  ;;  %v9665_v62 = vcombine.high %v1249_v12, %v1281_v13  ;;  %v9664_v30 = vcombine.low %v1249_v12, %v1281_v13 }
 0x3bc   : > { %7602 = vmatprep.subr.bf16.mxu1 %v9347_v56  ;;  %v1282_v15 = vld [vmem:[%s11018_s22 + $0x1358] sm:$0xff]  ;;  %v9600_v56 = vcombine.low %v1185_v4, %v1217_v5 }
 0x3bd   : > { %v9667_v18 = vcombine.high %v1250_v14, %v1282_v15 }
 0x3be   : > { %7562 = vmatpush1.bf16.msra.mxu0 %v9344_v20  ;;  %v1345_v20 = vld [vmem:[%s11018_s22 + $0x1550] sm:$0xff] }
 0x3bf   : > { %7603 = vmatpush1.bf16.msra.mxu1 %v9346_v23  ;;  %7563 = vmatprep.subr.bf16.mxu0 %v9409_v24  ;;  %v1314_v24 = vld [vmem:[%s11018_s22 + $0x1458] sm:$0xff]  ;;  %v9729_v35 = vcombine.high %v1313_v19, %v1345_v20  ;;  %v9728_v45 = vcombine.low %v1313_v19, %v1345_v20 }
 0x3c0   : > { %v7259_v42 = vpop.f32.mrb[8].mxu0  ;;  %v7300_v43 = vpop.f32.mrb[8].mxu1  ;;  %7604 = vmatprep.subr.bf16.mxu1 %v9411_v25  ;;  %v1346_v25 = vld [vmem:[%s11018_s22 + $0x1558] sm:$0xff] }
 0x3c1   : > { %v7260_v47 = vadd.f32 %v7259_v42, %v1722_v31  ;;  %v7301_v48 = vadd.f32 %v7300_v43, %v1730_v34  ;;  %v7261_v49 = vpop.f32.mrb[9].mxu0  ;;  %v7302_v50 = vpop.f32.mrb[9].mxu1  ;;  %v9666_v34 = vcombine.low %v1250_v14, %v1282_v15  ;;  %v1378_v42 = vld [vmem:[%s11018_s22 + $0x1658] sm:$0xff] }
 0x3c2   : > { %v7262_v32 = vadd.f32 %v7261_v49, %v1726_v51  ;;  %v7303_v57 = vadd.f32 %v7302_v50, %v1734_v37  ;;  %v7263_v58 = vpop.f32.mrb[10].mxu0  ;;  %v7304_v60 = vpop.f32.mrb[10].mxu1  ;;  %7564 = vmatpush1.bf16.msra.mxu0 %v9408_v39  ;;  %v9731_v37 = vcombine.high %v1314_v24, %v1346_v25  ;;  %v1377_v39 = vld [vmem:[%s11018_s22 + $0x1650] sm:$0xff]  ;;  %v1410_v43 = vld [vmem:[%s11018_s22 + $0x1758] sm:$0xff] }
 0x3c3   : > { %10291 = vtanh.f32 %v7260_v47  ;;  %7605 = vmatpush1.bf16.msra.mxu1 %v9410_v40  ;;  %v7264_v63 = vpop.f32.mrb[11].mxu0  ;;  %v7305_v0 = vpop.f32.mrb[11].mxu1  ;;  %7565 = vmatprep.subr.bf16.mxu0 %v9473_v41  ;;  %v1409_v40 = vld [vmem:[%s11018_s22 + $0x1750] sm:$0xff]  ;;  %v9730_v47 = vcombine.low %v1314_v24, %v1346_v25  ;;  %v9795_v49 = vcombine.high %v1378_v42, %v1410_v43  ;;  %v9794_v60 = vcombine.low %v1378_v42, %v1410_v43  ;;  %v675_v25 = vld [vmem:[%s11018_s22 + $0x60] sm:$0xff]  ;;  %v772_v42 = vld [vmem:[%s11018_s22 + $0x368] sm:$0xff] }
 0x3c4   : > { %10293 = vtanh.f32 %v7301_v48  ;;  %7606 = vmatprep.subr.bf16.mxu1 %v9475_v44  ;;  %v9793_v48 = vcombine.high %v1377_v39, %v1409_v40  ;;  %v1441_v50 = vld [vmem:[%s11018_s22 + $0x1850] sm:$0xff]  ;;  %v9792_v58 = vcombine.low %v1377_v39, %v1409_v40  ;;  %v771_v39 = vld [vmem:[%s11018_s22 + $0x360] sm:$0xff] }
 0x3c5   : > { %10295 = vtanh.f32 %v7262_v32  ;;  %v1442_v32 = vld [vmem:[%s11018_s22 + $0x1858] sm:$0xff]  ;;  %v1505_v0 = vld [vmem:[%s11018_s22 + $0x1a50] sm:$0xff]  ;;  %v9856_v4 = vcombine.low %v1441_v50, %v1473_v53 }
 0x3c6   : > { %10297 = vtanh.f32 %v7303_v57  ;;  %7566 = vmatpush1.bf16.msra.mxu0 %v9472_v61  ;;  %v1474_v57 = vld [vmem:[%s11018_s22 + $0x1958] sm:$0xff]  ;;  %v9857_v61 = vcombine.high %v1441_v50, %v1473_v53 }
 0x3c7   : > { %7607 = vmatpush1.bf16.msra.mxu1 %v9474_v1  ;;  %7567 = vmatprep.subr.bf16.mxu0 %v9537_v2  ;;  %v9859_v63 = vcombine.high %v1442_v32, %v1474_v57  ;;  %v1537_v1 = vld [vmem:[%s11018_s22 + $0x1b50] sm:$0xff]  ;;  %v1506_v2 = vld [vmem:[%s11018_s22 + $0x1a58] sm:$0xff]  ;;  %v9858_v5 = vcombine.low %v1442_v32, %v1474_v57  ;;  %v867_v57 = vld [vmem:[%s11018_s22 + $0x660] sm:$0xff] }
 0x3c8   : > { %7608 = vmatprep.subr.bf16.mxu1 %v9539_v3  ;;  %v1538_v3 = vld [vmem:[%s11018_s22 + $0x1b58] sm:$0xff]  ;;  %v9921_v6 = vcombine.high %v1505_v0, %v1537_v1  ;;  %v9920_v12 = vcombine.low %v1505_v0, %v1537_v1 }
 0x3c9   : > { %v9923_v7 = vcombine.high %v1506_v2, %v1538_v3  ;;  %v9922_v13 = vcombine.low %v1506_v2, %v1538_v3  ;;  %v931_v3 = vld [vmem:[%s11018_s22 + $0x860] sm:$0xff] }
 0x3ca   : > { %7568 = vmatpush1.bf16.msra.mxu0 %v9536_v8  ;;  %v1569_v8 = vld [vmem:[%s11018_s22 + $0x1c50] sm:$0xff] }
 0x3cb   : > { %7609 = vmatpush1.bf16.msra.mxu1 %v9538_v9  ;;  %7569 = vmatprep.subr.bf16.mxu0 %v9601_v10  ;;  %v1601_v9 = vld [vmem:[%s11018_s22 + $0x1d50] sm:$0xff]  ;;  %v1570_v10 = vld [vmem:[%s11018_s22 + $0x1c58] sm:$0xff] }
 0x3cc   : > { %7610 = vmatprep.subr.bf16.mxu1 %v9603_v11  ;;  %v1602_v11 = vld [vmem:[%s11018_s22 + $0x1d58] sm:$0xff]  ;;  %v9985_v14 = vcombine.high %v1569_v8, %v1601_v9  ;;  %v9984_v19 = vcombine.low %v1569_v8, %v1601_v9 }
 0x3cd   : > { %v10292_v23 = vpop.eup %10291  ;;  %v9987_v15 = vcombine.high %v1570_v10, %v1602_v11  ;;  %v9986_v20 = vcombine.low %v1570_v10, %v1602_v11  ;;  %v995_v11 = vld [vmem:[%s11018_s22 + $0xa60] sm:$0xff] }
 0x3ce   : > { %v10294_v29 = vpop.eup %10293  ;;  %7570 = vmatpush1.bf16.msra.mxu0 %v9600_v56  ;;  %v1633_v56 = vld [vmem:[%s11018_s22 + $0x1e50] sm:$0xff] }
 0x3cf   : > { %v10296_v31 = vpop.eup %10295  ;;  %7611 = vmatpush1.bf16.msra.mxu1 %v9602_v59  ;;  %7571 = vmatprep.subr.bf16.mxu0 %v9665_v62  ;;  %v1665_v59 = vld [vmem:[%s11018_s22 + $0x1f50] sm:$0xff]  ;;  %v1634_v62 = vld [vmem:[%s11018_s22 + $0x1e58] sm:$0xff] }
 0x3d0   : > { %v10298_v36 = vpop.eup %10297  ;;  %v8600_v51 = vcombine.low %v10292_v23, %v10296_v31  ;;  %7612 = vmatprep.subr.bf16.mxu1 %v9667_v18  ;;  %v1666_v18 = vld [vmem:[%s11018_s22 + $0x1f58] sm:$0xff]  ;;  %v10049_v23 = vcombine.high %v1633_v56, %v1665_v59  ;;  %v708_v31 = vld [vmem:[%s11018_s22 + $0x168] sm:$0xff] }
 0x3d1   : > { %v8601_v41 = vcombine.low %v10294_v29, %v10298_v36  ;;  %v10051_v24 = vcombine.high %v1634_v62, %v1666_v18  ;;  %v707_v29 = vld [vmem:[%s11018_s22 + $0x160] sm:$0xff] }
 0x3d2   : > { %v8608_v44 = vrot.slane %v8600_v51, %v11392_v38  ;;  %7572 = vmatpush1.bf16.msra.mxu0 %v9664_v30  ;;  %v676_v30 = vld [vmem:[%s11018_s22 + $0x68] sm:$0xff]  ;;  %v9093_v36 = vcombine.high %v675_v25, %v707_v29  ;;  %v9092_v40 = vcombine.low %v675_v25, %v707_v29 }
 0x3d3   : > { %v8615_v46 = vrot.slane %v8601_v41, %v11392_v38  ;;  %7613 = vmatpush1.bf16.msra.mxu1 %v9666_v34  ;;  %7573 = vmatprep.subr.bf16.mxu0 %v9729_v35  ;;  %v10048_v34 = vcombine.low %v1633_v56, %v1665_v59  ;;  %v10050_v35 = vcombine.low %v1634_v62, %v1666_v18  ;;  %v740_v41 = vld [vmem:[%s11018_s22 + $0x268] sm:$0xff] }
 0x3d4   : > { %7614 = vmatprep.subr.bf16.mxu1 %v9731_v37  ;;  %v9095_v51 = vcombine.high %v676_v30, %v708_v31  ;;  %v739_v37 = vld [vmem:[%s11018_s22 + $0x260] sm:$0xff]  ;;  %v9094_v43 = vcombine.low %v676_v30, %v708_v31  ;;  %v9158_v53 = vcombine.low %v740_v41, %v772_v42  ;;  %v11540_v56 = vld [vmem:[%s11355_s9 + $0x8] sm:$0xff] }
 0x3d5   : > { %v8616_v55 = vcombine.low %v8608_v44, %v8615_v46  ;;  %v9157_v44 = vcombine.high %v739_v37, %v771_v39  ;;  %v835_v46 = vld [vmem:[%s11018_s22 + $0x560] sm:$0xff]  ;;  %v9156_v50 = vcombine.low %v739_v37, %v771_v39  ;;  %v1092_v25 = vld [vmem:[%s11018_s22 + $0xd68] sm:$0xff]  ;;  %v1746_v29 = vrot.slane %v11540_v56, %v11351_v26 }
 0x3d6   : > { %7574 = vmatpush1.bf16.msra.mxu0 %v9728_v45  ;;  %v803_v45 = vld [vmem:[%s11018_s22 + $0x460] sm:$0xff]  ;;  %v1742_v30 = vrot.slane %v11540_v56, %v11070_v54 }
 0x3d7   : > { %8872 = vst [vmem:[%s11405_s24 + $0x8] sm:$0xff] %v8616_v55  ;;  %7615 = vmatpush1.bf16.msra.mxu1 %v9730_v47  ;;  %7575 = vmatprep.subr.bf16.mxu0 %v9793_v48  ;;  %v9159_v47 = vcombine.high %v740_v41, %v772_v42  ;;  %v804_v48 = vld [vmem:[%s11018_s22 + $0x468] sm:$0xff]  ;;  %v9221_v55 = vcombine.high %v803_v45, %v835_v46  ;;  %v1123_v39 = vld [vmem:[%s11018_s22 + $0xe60] sm:$0xff] }
 0x3d8   : > { %7616 = vmatprep.subr.bf16.mxu1 %v9795_v49  ;;  %v836_v49 = vld [vmem:[%s11018_s22 + $0x568] sm:$0xff] }
 0x3d9   : > { %v9223_v32 = vcombine.high %v804_v48, %v836_v49  ;;  %v9222_v0 = vcombine.low %v804_v48, %v836_v49 }
 0x3da   : > { %7576 = vmatpush1.bf16.msra.mxu0 %v9792_v58  ;;  %v899_v58 = vld [vmem:[%s11018_s22 + $0x760] sm:$0xff] }
 0x3db   : > { %7617 = vmatpush1.bf16.msra.mxu1 %v9794_v60  ;;  %7577 = vmatprep.subr.bf16.mxu0 %v9857_v61  ;;  %v868_v60 = vld [vmem:[%s11018_s22 + $0x668] sm:$0xff]  ;;  %v9285_v1 = vcombine.high %v867_v57, %v899_v58 }
 0x3dc   : > { %7618 = vmatprep.subr.bf16.mxu1 %v9859_v63  ;;  %v900_v61 = vld [vmem:[%s11018_s22 + $0x768] sm:$0xff]  ;;  %v9220_v63 = vcombine.low %v803_v45, %v835_v46 }
 0x3dd   : > { %v9287_v2 = vcombine.high %v868_v60, %v900_v61  ;;  %v9286_v8 = vcombine.low %v868_v60, %v900_v61  ;;  %v1156_v45 = vld [vmem:[%s11018_s22 + $0xf68] sm:$0xff] }
 0x3de   : > { %7578 = vmatpush1.bf16.msra.mxu0 %v9856_v4  ;;  %v963_v4 = vld [vmem:[%s11018_s22 + $0x960] sm:$0xff] }
 0x3df   : > { %7619 = vmatpush1.bf16.msra.mxu1 %v9858_v5  ;;  %7579 = vmatprep.subr.bf16.mxu0 %v9921_v6  ;;  %v932_v5 = vld [vmem:[%s11018_s22 + $0x868] sm:$0xff]  ;;  %v9349_v9 = vcombine.high %v931_v3, %v963_v4 }
 0x3e0   : > { %7620 = vmatprep.subr.bf16.mxu1 %v9923_v7  ;;  %v964_v6 = vld [vmem:[%s11018_s22 + $0x968] sm:$0xff]  ;;  %v9284_v7 = vcombine.low %v867_v57, %v899_v58 }
 0x3e1   : > { %v9351_v10 = vcombine.high %v932_v5, %v964_v6  ;;  %v9350_v59 = vcombine.low %v932_v5, %v964_v6 }
 0x3e2   : > { %7580 = vmatpush1.bf16.msra.mxu0 %v9920_v12  ;;  %v1027_v12 = vld [vmem:[%s11018_s22 + $0xb60] sm:$0xff] }
 0x3e3   : > { %7621 = vmatpush1.bf16.msra.mxu1 %v9922_v13  ;;  %7581 = vmatprep.subr.bf16.mxu0 %v9985_v14  ;;  %v996_v13 = vld [vmem:[%s11018_s22 + $0xa68] sm:$0xff]  ;;  %v9413_v62 = vcombine.high %v995_v11, %v1027_v12  ;;  %v9412_v31 = vcombine.low %v995_v11, %v1027_v12 }
 0x3e4   : > { %7622 = vmatprep.subr.bf16.mxu1 %v9987_v15  ;;  %v1028_v14 = vld [vmem:[%s11018_s22 + $0xb68] sm:$0xff]  ;;  %v9348_v15 = vcombine.low %v931_v3, %v963_v4 }
 0x3e5   : > { %v9415_v18 = vcombine.high %v996_v13, %v1028_v14 }
 0x3e6   : > { %7582 = vmatpush1.bf16.msra.mxu0 %v9984_v19  ;;  %v1059_v19 = vld [vmem:[%s11018_s22 + $0xc60] sm:$0xff] }
 0x3e7   : > { %7623 = vmatpush1.bf16.msra.mxu1 %v9986_v20  ;;  %7583 = vmatprep.subr.bf16.mxu0 %v10049_v23  ;;  %v1091_v20 = vld [vmem:[%s11018_s22 + $0xd60] sm:$0xff]  ;;  %v1738_v23 = vrot.slane %v11540_v56, %v11067_v52 }
 0x3e8   : > { %7624 = vmatprep.subr.bf16.mxu1 %v10051_v24  ;;  %v1060_v24 = vld [vmem:[%s11018_s22 + $0xc68] sm:$0xff] }
 0x3e9   : > { %v9479_v37 = vcombine.high %v1060_v24, %v1092_v25  ;;  %v9478_v57 = vcombine.low %v1060_v24, %v1092_v25 }
 0x3ea   : > { %7584 = vmatpush1.bf16.msra.mxu0 %v10048_v34  ;;  %v1750_v34 = vrot.slane %v11540_v56, %v11361_v33 }
 0x3eb   : > { %7625 = vmatpush1.bf16.msra.mxu1 %v10050_v35  ;;  %7635 = vmatprep.subr.bf16.mxu0 %v9093_v36  ;;  %v9414_v35 = vcombine.low %v996_v13, %v1028_v14  ;;  %v9477_v36 = vcombine.high %v1059_v19, %v1091_v20 }
 0x3ec   : > { %7676 = vmatprep.subr.bf16.mxu1 %v9095_v51 }
 0x3ed   : > { %7586 = vmatmul.mubr.bf16.vlgmr.msra.gmra.mrb[24].mxu0 %v11123_v28 }
 0x3ee   : > { %7627 = vmatmul.mubr.bf16.vlgmr.msra.gmra.mrb[24].mxu1 %v11123_v28  ;;  %7636 = vmatpush1.bf16.msra.mxu0 %v9092_v40  ;;  %v1155_v40 = vld [vmem:[%s11018_s22 + $0xf60] sm:$0xff] }
 0x3ef   : > { %7667 = vmatprep.mubr.bf16.mxu0 %v11121_v27  ;;  %7677 = vmatpush1.bf16.msra.mxu1 %v9094_v43  ;;  %v9541_v58 = vcombine.high %v1123_v39, %v1155_v40  ;;  %v9540_v3 = vcombine.low %v1123_v39, %v1155_v40  ;;  %v1412_v39 = vld [vmem:[%s11018_s22 + $0x1768] sm:$0xff] }
 0x3f0   : > { %7708 = vmatprep.mubr.bf16.mxu1 %v11121_v27  ;;  %7637 = vmatprep.subr.bf16.mxu0 %v9157_v44  ;;  %v1124_v44 = vld [vmem:[%s11018_s22 + $0xe68] sm:$0xff] }
 0x3f1   : > { %7678 = vmatprep.subr.bf16.mxu1 %v9159_v47  ;;  %v9543_v61 = vcombine.high %v1124_v44, %v1156_v45  ;;  %v9542_v4 = vcombine.low %v1124_v44, %v1156_v45 }
 0x3f2   : > { %7638 = vmatpush1.bf16.msra.mxu0 %v9156_v50  ;;  %v9476_v50 = vcombine.low %v1059_v19, %v1091_v20  ;;  %v1348_v19 = vld [vmem:[%s11018_s22 + $0x1568] sm:$0xff] }
 0x3f3   : > { %7679 = vmatpush1.bf16.msra.mxu1 %v9158_v53  ;;  %7639 = vmatprep.subr.bf16.mxu0 %v9221_v55 }
 0x3f4   : > { %7680 = vmatprep.subr.bf16.mxu1 %v9223_v32 }
 0x3f6   : > { %7640 = vmatpush1.bf16.msra.mxu0 %v9220_v63  ;;  %v1187_v63 = vld [vmem:[%s11018_s22 + $0x1060] sm:$0xff] }
 0x3f7   : > { %7681 = vmatpush1.bf16.msra.mxu1 %v9222_v0  ;;  %7641 = vmatprep.subr.bf16.mxu0 %v9285_v1  ;;  %v1219_v0 = vld [vmem:[%s11018_s22 + $0x1160] sm:$0xff]  ;;  %v1188_v1 = vld [vmem:[%s11018_s22 + $0x1068] sm:$0xff] }
 0x3f8   : > { %7682 = vmatprep.subr.bf16.mxu1 %v9287_v2  ;;  %v1220_v2 = vld [vmem:[%s11018_s22 + $0x1168] sm:$0xff]  ;;  %v9605_v5 = vcombine.high %v1187_v63, %v1219_v0  ;;  %v9604_v11 = vcombine.low %v1187_v63, %v1219_v0 }
 0x3f9   : > { %v9607_v6 = vcombine.high %v1188_v1, %v1220_v2  ;;  %v9606_v12 = vcombine.low %v1188_v1, %v1220_v2  ;;  %v1540_v63 = vld [vmem:[%s11018_s22 + $0x1b68] sm:$0xff] }
 0x3fa   : > { %7642 = vmatpush1.bf16.msra.mxu0 %v9284_v7  ;;  %v1251_v7 = vld [vmem:[%s11018_s22 + $0x1260] sm:$0xff] }
 0x3fb   : > { %7683 = vmatpush1.bf16.msra.mxu1 %v9286_v8  ;;  %7643 = vmatprep.subr.bf16.mxu0 %v9349_v9  ;;  %v1283_v8 = vld [vmem:[%s11018_s22 + $0x1360] sm:$0xff]  ;;  %v1252_v9 = vld [vmem:[%s11018_s22 + $0x1268] sm:$0xff] }
 0x3fc   : > { %7684 = vmatprep.subr.bf16.mxu1 %v9351_v10  ;;  %v1284_v10 = vld [vmem:[%s11018_s22 + $0x1368] sm:$0xff]  ;;  %v9669_v13 = vcombine.high %v1251_v7, %v1283_v8 }
 0x3fd   : > { %v9671_v14 = vcombine.high %v1252_v9, %v1284_v10  ;;  %v9670_v25 = vcombine.low %v1252_v9, %v1284_v10 }
 0x3fe   : > { %7644 = vmatpush1.bf16.msra.mxu0 %v9348_v15  ;;  %v1315_v15 = vld [vmem:[%s11018_s22 + $0x1460] sm:$0xff] }
 0x3ff   : > { %7685 = vmatpush1.bf16.msra.mxu1 %v9350_v59  ;;  %7645 = vmatprep.subr.bf16.mxu0 %v9413_v62  ;;  %v1347_v59 = vld [vmem:[%s11018_s22 + $0x1560] sm:$0xff] }
 0x400   : > { %v7341_v51 = vpop.f32.mrb[12].mxu0  ;;  %7686 = vmatprep.subr.bf16.mxu1 %v9415_v18  ;;  %v1316_v18 = vld [vmem:[%s11018_s22 + $0x1468] sm:$0xff] }
 0x401   : > { %v7342_v41 = vadd.f32 %v7341_v51, %v1738_v23  ;;  %v7382_v42 = vpop.f32.mrb[12].mxu1  ;;  %v7343_v43 = vpop.f32.mrb[13].mxu0  ;;  %v9668_v23 = vcombine.low %v1251_v7, %v1283_v8  ;;  %v1604_v7 = vld [vmem:[%s11018_s22 + $0x1d68] sm:$0xff] }
 0x402   : > { %v7383_v46 = vadd.f32 %v7382_v42, %v1746_v29  ;;  %v7344_v47 = vadd.f32 %v7343_v43, %v1742_v30  ;;  %v7384_v48 = vpop.f32.mrb[13].mxu1  ;;  %v7345_v49 = vpop.f32.mrb[14].mxu0  ;;  %7646 = vmatpush1.bf16.msra.mxu0 %v9412_v31  ;;  %v9733_v29 = vcombine.high %v1315_v15, %v1347_v59  ;;  %v9734_v43 = vcombine.low %v1316_v18, %v1348_v19 }
 0x403   : > { %10299 = vtanh.f32 %v7342_v41  ;;  %v7385_v53 = vadd.f32 %v7384_v48, %v1750_v34  ;;  %v7386_v55 = vpop.f32.mrb[14].mxu1  ;;  %7687 = vmatpush1.bf16.msra.mxu1 %v9414_v35  ;;  %v7346_v32 = vpop.f32.mrb[15].mxu0  ;;  %7647 = vmatprep.subr.bf16.mxu0 %v9477_v36  ;;  %v9735_v34 = vcombine.high %v1316_v18, %v1348_v19  ;;  %v1379_v35 = vld [vmem:[%s11018_s22 + $0x1660] sm:$0xff]  ;;  %v9732_v41 = vcombine.low %v1315_v15, %v1347_v59  ;;  %v1444_v49 = vld [vmem:[%s11018_s22 + $0x1868] sm:$0xff] }
 0x404   : > { %10301 = vtanh.f32 %v7383_v46  ;;  %v7387_v60 = vpop.f32.mrb[15].mxu1  ;;  %7688 = vmatprep.subr.bf16.mxu1 %v9479_v37  ;;  %v1411_v36 = vld [vmem:[%s11018_s22 + $0x1760] sm:$0xff]  ;;  %v1380_v37 = vld [vmem:[%s11018_s22 + $0x1668] sm:$0xff] }
 0x405   : > { %10303 = vtanh.f32 %v7344_v47  ;;  %v9797_v44 = vcombine.high %v1379_v35, %v1411_v36  ;;  %v9799_v45 = vcombine.high %v1380_v37, %v1412_v39  ;;  %v1443_v46 = vld [vmem:[%s11018_s22 + $0x1860] sm:$0xff]  ;;  %v9798_v55 = vcombine.low %v1380_v37, %v1412_v39  ;;  %v1668_v15 = vld [vmem:[%s11018_s22 + $0x1f68] sm:$0xff]  ;;  %v742_v37 = vld [vmem:[%s11018_s22 + $0x278] sm:$0xff] }
 0x406   : > { %10305 = vtanh.f32 %v7385_v53  ;;  %7648 = vmatpush1.bf16.msra.mxu0 %v9476_v50  ;;  %v1475_v47 = vld [vmem:[%s11018_s22 + $0x1960] sm:$0xff]  ;;  %v1476_v50 = vld [vmem:[%s11018_s22 + $0x1968] sm:$0xff]  ;;  %v9796_v53 = vcombine.low %v1379_v35, %v1411_v36  ;;  %v741_v35 = vld [vmem:[%s11018_s22 + $0x270] sm:$0xff] }
 0x407   : > { %7689 = vmatpush1.bf16.msra.mxu1 %v9478_v57  ;;  %7649 = vmatprep.subr.bf16.mxu0 %v9541_v58  ;;  %v9861_v32 = vcombine.high %v1443_v46, %v1475_v47  ;;  %v9863_v57 = vcombine.high %v1444_v49, %v1476_v50  ;;  %v1507_v58 = vld [vmem:[%s11018_s22 + $0x1a60] sm:$0xff]  ;;  %v9860_v0 = vcombine.low %v1443_v46, %v1475_v47  ;;  %v773_v36 = vld [vmem:[%s11018_s22 + $0x370] sm:$0xff]  ;;  %v774_v39 = vld [vmem:[%s11018_s22 + $0x378] sm:$0xff] }
 0x408   : > { %7690 = vmatprep.subr.bf16.mxu1 %v9543_v61  ;;  %v1539_v60 = vld [vmem:[%s11018_s22 + $0x1b60] sm:$0xff]  ;;  %v1508_v61 = vld [vmem:[%s11018_s22 + $0x1a68] sm:$0xff]  ;;  %v9862_v1 = vcombine.low %v1444_v49, %v1476_v50  ;;  %v838_v46 = vld [vmem:[%s11018_s22 + $0x578] sm:$0xff]  ;;  %v9160_v47 = vcombine.low %v741_v35, %v773_v36 }
 0x409   : > { %v9925_v2 = vcombine.high %v1507_v58, %v1539_v60  ;;  %v9924_v8 = vcombine.low %v1507_v58, %v1539_v60  ;;  %v9926_v9 = vcombine.low %v1508_v61, %v1540_v63 }
 0x40a   : > { %7650 = vmatpush1.bf16.msra.mxu0 %v9540_v3  ;;  %v9927_v3 = vcombine.high %v1508_v61, %v1540_v63 }
 0x40b   : > { %7691 = vmatpush1.bf16.msra.mxu1 %v9542_v4  ;;  %7651 = vmatprep.subr.bf16.mxu0 %v9605_v5  ;;  %v1571_v4 = vld [vmem:[%s11018_s22 + $0x1c60] sm:$0xff] }
 0x40c   : > { %7692 = vmatprep.subr.bf16.mxu1 %v9607_v6  ;;  %v1603_v5 = vld [vmem:[%s11018_s22 + $0x1d60] sm:$0xff]  ;;  %v1572_v6 = vld [vmem:[%s11018_s22 + $0x1c68] sm:$0xff] }
 0x40d   : > { %v10300_v62 = vpop.eup %10299  ;;  %v9989_v10 = vcombine.high %v1571_v4, %v1603_v5  ;;  %v9988_v59 = vcombine.low %v1571_v4, %v1603_v5 }
 0x40e   : > { %v10302_v20 = vpop.eup %10301  ;;  %7652 = vmatpush1.bf16.msra.mxu0 %v9604_v11  ;;  %v9991_v11 = vcombine.high %v1572_v6, %v1604_v7 }
 0x40f   : > { %v10304_v24 = vpop.eup %10303  ;;  %7693 = vmatpush1.bf16.msra.mxu1 %v9606_v12  ;;  %7653 = vmatprep.subr.bf16.mxu0 %v9669_v13  ;;  %v1635_v12 = vld [vmem:[%s11018_s22 + $0x1e60] sm:$0xff] }
 0x410   : > { %v10306_v30 = vpop.eup %10305  ;;  %v8617_v31 = vcombine.low %v10300_v62, %v10304_v24  ;;  %7694 = vmatprep.subr.bf16.mxu1 %v9671_v14  ;;  %v1667_v13 = vld [vmem:[%s11018_s22 + $0x1f60] sm:$0xff]  ;;  %v1636_v14 = vld [vmem:[%s11018_s22 + $0x1e68] sm:$0xff]  ;;  %v9990_v62 = vcombine.low %v1572_v6, %v1604_v7  ;;  %v678_v24 = vld [vmem:[%s11018_s22 + $0x78] sm:$0xff] }
 0x411   : > { %v8618_v51 = vcombine.low %v10302_v20, %v10306_v30  ;;  %v10053_v18 = vcombine.high %v1635_v12, %v1667_v13  ;;  %v10055_v19 = vcombine.high %v1636_v14, %v1668_v15  ;;  %v677_v20 = vld [vmem:[%s11018_s22 + $0x70] sm:$0xff]  ;;  %v10054_v30 = vcombine.low %v1636_v14, %v1668_v15 }
 0x412   : > { %v8625_v40 = vrot.slane %v8617_v31, %v11392_v38  ;;  %7654 = vmatpush1.bf16.msra.mxu0 %v9668_v23  ;;  %v709_v23 = vld [vmem:[%s11018_s22 + $0x170] sm:$0xff] }
 0x413   : > { %v8632_v42 = vrot.slane %v8618_v51, %v11392_v38  ;;  %7695 = vmatpush1.bf16.msra.mxu1 %v9670_v25  ;;  %7655 = vmatprep.subr.bf16.mxu0 %v9733_v29  ;;  %v710_v25 = vld [vmem:[%s11018_s22 + $0x178] sm:$0xff]  ;;  %v10052_v29 = vcombine.low %v1635_v12, %v1667_v13  ;;  %v9097_v31 = vcombine.high %v677_v20, %v709_v23 }
 0x414   : > { %7696 = vmatprep.subr.bf16.mxu1 %v9735_v34  ;;  %v9099_v34 = vcombine.high %v678_v24, %v710_v25  ;;  %v9096_v51 = vcombine.low %v677_v20, %v709_v23  ;;  %v1094_v20 = vld [vmem:[%s11018_s22 + $0xd78] sm:$0xff]  ;;  %v1762_v23 = vrot.slane %v11540_v56, %v11450_v17 }
 0x415   : > { %v8633_v48 = vcombine.low %v8625_v40, %v8632_v42  ;;  %v9098_v40 = vcombine.low %v678_v24, %v710_v25  ;;  %v805_v42 = vld [vmem:[%s11018_s22 + $0x470] sm:$0xff]  ;;  %v1758_v24 = vrot.slane %v11540_v56, %v11455_v21 }
 0x416   : > { %7656 = vmatpush1.bf16.msra.mxu0 %v9732_v41  ;;  %v9161_v41 = vcombine.high %v741_v35, %v773_v36  ;;  %v1125_v36 = vld [vmem:[%s11018_s22 + $0xe70] sm:$0xff] }
 0x417   : > { %8873 = vst [vmem:[%s11405_s24 + $0x10] sm:$0xff] %v8633_v48  ;;  %7697 = vmatpush1.bf16.msra.mxu1 %v9734_v43  ;;  %7657 = vmatprep.subr.bf16.mxu0 %v9797_v44  ;;  %v837_v43 = vld [vmem:[%s11018_s22 + $0x570] sm:$0xff]  ;;  %v9163_v44 = vcombine.high %v742_v37, %v774_v39  ;;  %v9162_v48 = vcombine.low %v742_v37, %v774_v39 }
 0x418   : > { %7698 = vmatprep.subr.bf16.mxu1 %v9799_v45  ;;  %v806_v45 = vld [vmem:[%s11018_s22 + $0x478] sm:$0xff]  ;;  %v9225_v49 = vcombine.high %v805_v42, %v837_v43  ;;  %v9224_v58 = vcombine.low %v805_v42, %v837_v43 }
 0x419   : > { %v9227_v50 = vcombine.high %v806_v45, %v838_v46  ;;  %v9226_v60 = vcombine.low %v806_v45, %v838_v46  ;;  %v1158_v42 = vld [vmem:[%s11018_s22 + $0xf78] sm:$0xff] }
 0x41a   : > { %7658 = vmatpush1.bf16.msra.mxu0 %v9796_v53  ;;  %v869_v53 = vld [vmem:[%s11018_s22 + $0x670] sm:$0xff] }
 0x41b   : > { %7699 = vmatpush1.bf16.msra.mxu1 %v9798_v55  ;;  %7659 = vmatprep.subr.bf16.mxu0 %v9861_v32  ;;  %v901_v55 = vld [vmem:[%s11018_s22 + $0x770] sm:$0xff]  ;;  %v870_v32 = vld [vmem:[%s11018_s22 + $0x678] sm:$0xff] }
 0x41c   : > { %7700 = vmatprep.subr.bf16.mxu1 %v9863_v57  ;;  %v902_v57 = vld [vmem:[%s11018_s22 + $0x778] sm:$0xff]  ;;  %v9289_v61 = vcombine.high %v869_v53, %v901_v55  ;;  %v9288_v4 = vcombine.low %v869_v53, %v901_v55 }
 0x41d   : > { %v9291_v63 = vcombine.high %v870_v32, %v902_v57  ;;  %v9290_v5 = vcombine.low %v870_v32, %v902_v57  ;;  %v1189_v57 = vld [vmem:[%s11018_s22 + $0x1070] sm:$0xff] }
 0x41e   : > { %7660 = vmatpush1.bf16.msra.mxu0 %v9860_v0  ;;  %v933_v0 = vld [vmem:[%s11018_s22 + $0x870] sm:$0xff] }
 0x41f   : > { %7701 = vmatpush1.bf16.msra.mxu1 %v9862_v1  ;;  %7661 = vmatprep.subr.bf16.mxu0 %v9925_v2  ;;  %v965_v1 = vld [vmem:[%s11018_s22 + $0x970] sm:$0xff]  ;;  %v934_v2 = vld [vmem:[%s11018_s22 + $0x878] sm:$0xff] }
 0x420   : > { %7702 = vmatprep.subr.bf16.mxu1 %v9927_v3  ;;  %v966_v3 = vld [vmem:[%s11018_s22 + $0x978] sm:$0xff]  ;;  %v9353_v6 = vcombine.high %v933_v0, %v965_v1  ;;  %v9352_v12 = vcombine.low %v933_v0, %v965_v1 }
 0x421   : > { %v9355_v7 = vcombine.high %v934_v2, %v966_v3  ;;  %v9354_v13 = vcombine.low %v934_v2, %v966_v3  ;;  %v1253_v3 = vld [vmem:[%s11018_s22 + $0x1270] sm:$0xff] }
 0x422   : > { %7662 = vmatpush1.bf16.msra.mxu0 %v9924_v8  ;;  %v997_v8 = vld [vmem:[%s11018_s22 + $0xa70] sm:$0xff] }
 0x423   : > { %7703 = vmatpush1.bf16.msra.mxu1 %v9926_v9  ;;  %7663 = vmatprep.subr.bf16.mxu0 %v9989_v10  ;;  %v1029_v9 = vld [vmem:[%s11018_s22 + $0xb70] sm:$0xff]  ;;  %v998_v10 = vld [vmem:[%s11018_s22 + $0xa78] sm:$0xff] }
 0x424   : > { %7704 = vmatprep.subr.bf16.mxu1 %v9991_v11  ;;  %v1030_v11 = vld [vmem:[%s11018_s22 + $0xb78] sm:$0xff]  ;;  %v9417_v14 = vcombine.high %v997_v8, %v1029_v9  ;;  %v9416_v25 = vcombine.low %v997_v8, %v1029_v9 }
 0x425   : > { %v9419_v15 = vcombine.high %v998_v10, %v1030_v11 }
 0x426   : > { %7664 = vmatpush1.bf16.msra.mxu0 %v9988_v59  ;;  %v1061_v59 = vld [vmem:[%s11018_s22 + $0xc70] sm:$0xff] }
 0x427   : > { %7705 = vmatpush1.bf16.msra.mxu1 %v9990_v62  ;;  %7665 = vmatprep.subr.bf16.mxu0 %v10053_v18  ;;  %v1093_v62 = vld [vmem:[%s11018_s22 + $0xd70] sm:$0xff]  ;;  %v1754_v18 = vrot.slane %v11540_v56, %v11447_v16 }
 0x428   : > { %7706 = vmatprep.subr.bf16.mxu1 %v10055_v19  ;;  %v1062_v19 = vld [vmem:[%s11018_s22 + $0xc78] sm:$0xff] }
 0x429   : > { %v9483_v35 = vcombine.high %v1062_v19, %v1094_v20 }
 0x42a   : > { %7666 = vmatpush1.bf16.msra.mxu0 %v10052_v29  ;;  %v1766_v29 = vrot.slane %v11540_v56, %v11458_v22  ;;  %v9480_v56 = vcombine.low %v1061_v59, %v1093_v62 }
 0x42b   : > { %7707 = vmatpush1.bf16.msra.mxu1 %v10054_v30  ;;  %7717 = vmatprep.subr.bf16.mxu0 %v9097_v31  ;;  %v9418_v30 = vcombine.low %v998_v10, %v1030_v11  ;;  %v9481_v31 = vcombine.high %v1061_v59, %v1093_v62  ;;  %v1317_v11 = vld [vmem:[%s11018_s22 + $0x1470] sm:$0xff] }
 0x42c   : > { %7758 = vmatprep.subr.bf16.mxu1 %v9099_v34 }
 0x42d   : > { %7668 = vmatmul.mubr.bf16.vlgmr.msra.gmra.mrb[28].mxu0 %v11123_v28 }
 0x42e   : > { %7709 = vmatmul.mubr.bf16.vlgmr.msra.gmra.mrb[28].mxu1 %v11123_v28  ;;  %7718 = vmatpush1.bf16.msra.mxu0 %v9096_v51  ;;  %v1157_v51 = vld [vmem:[%s11018_s22 + $0xf70] sm:$0xff] }
 0x42f   : > { %7749 = vmatprep.mubr.bf16.mxu0 %v11121_v27  ;;  %7759 = vmatpush1.bf16.msra.mxu1 %v9098_v40  ;;  %v9545_v53 = vcombine.high %v1125_v36, %v1157_v51 }
 0x430   : > { %7790 = vmatprep.mubr.bf16.mxu1 %v11121_v27  ;;  %7719 = vmatprep.subr.bf16.mxu0 %v9161_v41  ;;  %v1126_v41 = vld [vmem:[%s11018_s22 + $0xe78] sm:$0xff] }
 0x431   : > { %7760 = vmatprep.subr.bf16.mxu1 %v9163_v44  ;;  %v9547_v32 = vcombine.high %v1126_v41, %v1158_v42  ;;  %v9546_v0 = vcombine.low %v1126_v41, %v1158_v42  ;;  %v1445_v42 = vld [vmem:[%s11018_s22 + $0x1870] sm:$0xff] }
 0x432   : > { %7720 = vmatpush1.bf16.msra.mxu0 %v9160_v47 }
 0x433   : > { %7761 = vmatpush1.bf16.msra.mxu1 %v9162_v48  ;;  %7721 = vmatprep.subr.bf16.mxu0 %v9225_v49 }
 0x434   : > { %7762 = vmatprep.subr.bf16.mxu1 %v9227_v50  ;;  %v9482_v50 = vcombine.low %v1062_v19, %v1094_v20 }
 0x436   : > { %7722 = vmatpush1.bf16.msra.mxu0 %v9224_v58  ;;  %v1221_v58 = vld [vmem:[%s11018_s22 + $0x1170] sm:$0xff] }
 0x437   : > { %7763 = vmatpush1.bf16.msra.mxu1 %v9226_v60  ;;  %7723 = vmatprep.subr.bf16.mxu0 %v9289_v61  ;;  %v1190_v60 = vld [vmem:[%s11018_s22 + $0x1078] sm:$0xff]  ;;  %v9609_v1 = vcombine.high %v1189_v57, %v1221_v58 }
 0x438   : > { %7764 = vmatprep.subr.bf16.mxu1 %v9291_v63  ;;  %v1222_v61 = vld [vmem:[%s11018_s22 + $0x1178] sm:$0xff]  ;;  %v9544_v63 = vcombine.low %v1125_v36, %v1157_v51 }
 0x439   : > { %v9611_v2 = vcombine.high %v1190_v60, %v1222_v61  ;;  %v9610_v8 = vcombine.low %v1190_v60, %v1222_v61 }
 0x43a   : > { %7724 = vmatpush1.bf16.msra.mxu0 %v9288_v4  ;;  %v1285_v4 = vld [vmem:[%s11018_s22 + $0x1370] sm:$0xff] }
 0x43b   : > { %7765 = vmatpush1.bf16.msra.mxu1 %v9290_v5  ;;  %7725 = vmatprep.subr.bf16.mxu0 %v9353_v6  ;;  %v1254_v5 = vld [vmem:[%s11018_s22 + $0x1278] sm:$0xff]  ;;  %v9673_v9 = vcombine.high %v1253_v3, %v1285_v4  ;;  %v9672_v62 = vcombine.low %v1253_v3, %v1285_v4 }
 0x43c   : > { %7766 = vmatprep.subr.bf16.mxu1 %v9355_v7  ;;  %v1286_v6 = vld [vmem:[%s11018_s22 + $0x1378] sm:$0xff]  ;;  %v9608_v7 = vcombine.low %v1189_v57, %v1221_v58 }
 0x43d   : > { %v9675_v10 = vcombine.high %v1254_v5, %v1286_v6  ;;  %v9674_v19 = vcombine.low %v1254_v5, %v1286_v6 }
 0x43e   : > { %7726 = vmatpush1.bf16.msra.mxu0 %v9352_v12  ;;  %v1349_v12 = vld [vmem:[%s11018_s22 + $0x1570] sm:$0xff] }
 0x43f   : > { %7767 = vmatpush1.bf16.msra.mxu1 %v9354_v13  ;;  %7727 = vmatprep.subr.bf16.mxu0 %v9417_v14  ;;  %v1318_v14 = vld [vmem:[%s11018_s22 + $0x1478] sm:$0xff]  ;;  %v9737_v20 = vcombine.high %v1317_v11, %v1349_v12  ;;  %v9736_v51 = vcombine.low %v1317_v11, %v1349_v12 }
 0x440   : > { %v7423_v34 = vpop.f32.mrb[16].mxu0  ;;  %7768 = vmatprep.subr.bf16.mxu1 %v9419_v15  ;;  %v1350_v15 = vld [vmem:[%s11018_s22 + $0x1578] sm:$0xff] }
 0x441   : > { %v7424_v37 = vadd.f32 %v7423_v34, %v1754_v18  ;;  %v7464_v39 = vpop.f32.mrb[16].mxu1  ;;  %v7425_v40 = vpop.f32.mrb[17].mxu0  ;;  %v1382_v34 = vld [vmem:[%s11018_s22 + $0x1678] sm:$0xff] }
 0x442   : > { %v7465_v43 = vadd.f32 %v7464_v39, %v1762_v23  ;;  %v7426_v44 = vadd.f32 %v7425_v40, %v1758_v24  ;;  %v7466_v45 = vpop.f32.mrb[17].mxu1  ;;  %v7427_v46 = vpop.f32.mrb[18].mxu0  ;;  %7728 = vmatpush1.bf16.msra.mxu0 %v9416_v25  ;;  %v9739_v25 = vcombine.high %v1318_v14, %v1350_v15  ;;  %v9738_v39 = vcombine.low %v1318_v14, %v1350_v15  ;;  %v679_v15 = vld [vmem:[%s11018_s22 + $0x80] sm:$0xff] }
 0x443   : > { %10307 = vtanh.f32 %v7424_v37  ;;  %v7467_v47 = vadd.f32 %v7466_v45, %v1766_v29  ;;  %v7468_v48 = vpop.f32.mrb[18].mxu1  ;;  %7769 = vmatpush1.bf16.msra.mxu1 %v9418_v30  ;;  %v7428_v49 = vpop.f32.mrb[19].mxu0  ;;  %7729 = vmatprep.subr.bf16.mxu0 %v9481_v31  ;;  %v1381_v29 = vld [vmem:[%s11018_s22 + $0x1670] sm:$0xff]  ;;  %v1446_v45 = vld [vmem:[%s11018_s22 + $0x1878] sm:$0xff] }
 0x444   : > { %10309 = vtanh.f32 %v7465_v43  ;;  %v7469_v55 = vpop.f32.mrb[19].mxu1  ;;  %7770 = vmatprep.subr.bf16.mxu1 %v9483_v35  ;;  %v1413_v30 = vld [vmem:[%s11018_s22 + $0x1770] sm:$0xff]  ;;  %v1414_v35 = vld [vmem:[%s11018_s22 + $0x1778] sm:$0xff] }
 0x445   : > { %10311 = vtanh.f32 %v7426_v44  ;;  %v9801_v40 = vcombine.high %v1381_v29, %v1413_v30  ;;  %v9803_v41 = vcombine.high %v1382_v34, %v1414_v35  ;;  %v1477_v43 = vld [vmem:[%s11018_s22 + $0x1970] sm:$0xff]  ;;  %v1478_v46 = vld [vmem:[%s11018_s22 + $0x1978] sm:$0xff] }
 0x446   : > { %10313 = vtanh.f32 %v7467_v47  ;;  %7730 = vmatpush1.bf16.msra.mxu0 %v9480_v56  ;;  %v9800_v56 = vcombine.low %v1381_v29, %v1413_v30  ;;  %v9802_v47 = vcombine.low %v1382_v34, %v1414_v35  ;;  %v9865_v48 = vcombine.high %v1445_v42, %v1477_v43  ;;  %v1510_v55 = vld [vmem:[%s11018_s22 + $0x1a78] sm:$0xff]  ;;  %v775_v29 = vld [vmem:[%s11018_s22 + $0x380] sm:$0xff]  ;;  %v776_v34 = vld [vmem:[%s11018_s22 + $0x388] sm:$0xff] }
 0x447   : > { %7771 = vmatpush1.bf16.msra.mxu1 %v9482_v50  ;;  %7731 = vmatprep.subr.bf16.mxu0 %v9545_v53  ;;  %v9867_v49 = vcombine.high %v1446_v45, %v1478_v46  ;;  %v1509_v50 = vld [vmem:[%s11018_s22 + $0x1a70] sm:$0xff]  ;;  %v9864_v57 = vcombine.low %v1445_v42, %v1477_v43  ;;  %v9866_v58 = vcombine.low %v1446_v45, %v1478_v46  ;;  %v871_v46 = vld [vmem:[%s11018_s22 + $0x680] sm:$0xff] }
 0x448   : > { %7772 = vmatprep.subr.bf16.mxu1 %v9547_v32  ;;  %v1541_v53 = vld [vmem:[%s11018_s22 + $0x1b70] sm:$0xff]  ;;  %v1542_v32 = vld [vmem:[%s11018_s22 + $0x1b78] sm:$0xff] }
 0x449   : > { %v9929_v60 = vcombine.high %v1509_v50, %v1541_v53  ;;  %v9931_v61 = vcombine.high %v1510_v55, %v1542_v32  ;;  %v9928_v3 = vcombine.low %v1509_v50, %v1541_v53  ;;  %v9930_v4 = vcombine.low %v1510_v55, %v1542_v32  ;;  %v935_v32 = vld [vmem:[%s11018_s22 + $0x880] sm:$0xff] }
 0x44a   : > { %7732 = vmatpush1.bf16.msra.mxu0 %v9544_v63  ;;  %v1573_v63 = vld [vmem:[%s11018_s22 + $0x1c70] sm:$0xff] }
 0x44b   : > { %7773 = vmatpush1.bf16.msra.mxu1 %v9546_v0  ;;  %7733 = vmatprep.subr.bf16.mxu0 %v9609_v1  ;;  %v1605_v0 = vld [vmem:[%s11018_s22 + $0x1d70] sm:$0xff]  ;;  %v1574_v1 = vld [vmem:[%s11018_s22 + $0x1c78] sm:$0xff] }
 0x44c   : > { %7774 = vmatprep.subr.bf16.mxu1 %v9611_v2  ;;  %v1606_v2 = vld [vmem:[%s11018_s22 + $0x1d78] sm:$0xff]  ;;  %v9993_v5 = vcombine.high %v1573_v63, %v1605_v0  ;;  %v9992_v11 = vcombine.low %v1573_v63, %v1605_v0 }
 0x44d   : > { %v10308_v13 = vpop.eup %10307  ;;  %v9995_v6 = vcombine.high %v1574_v1, %v1606_v2  ;;  %v9994_v12 = vcombine.low %v1574_v1, %v1606_v2  ;;  %v999_v2 = vld [vmem:[%s11018_s22 + $0xa80] sm:$0xff] }
 0x44e   : > { %v10310_v59 = vpop.eup %10309  ;;  %7734 = vmatpush1.bf16.msra.mxu0 %v9608_v7  ;;  %v1637_v7 = vld [vmem:[%s11018_s22 + $0x1e70] sm:$0xff] }
 0x44f   : > { %v10312_v18 = vpop.eup %10311  ;;  %7775 = vmatpush1.bf16.msra.mxu1 %v9610_v8  ;;  %7735 = vmatprep.subr.bf16.mxu0 %v9673_v9  ;;  %v1669_v8 = vld [vmem:[%s11018_s22 + $0x1f70] sm:$0xff]  ;;  %v1638_v9 = vld [vmem:[%s11018_s22 + $0x1e78] sm:$0xff] }
 0x450   : > { %v10314_v23 = vpop.eup %10313  ;;  %v8634_v24 = vcombine.low %v10308_v13, %v10312_v18  ;;  %7776 = vmatprep.subr.bf16.mxu1 %v9675_v10  ;;  %v1670_v10 = vld [vmem:[%s11018_s22 + $0x1f78] sm:$0xff]  ;;  %v10057_v13 = vcombine.high %v1637_v7, %v1669_v8  ;;  %v712_v18 = vld [vmem:[%s11018_s22 + $0x188] sm:$0xff] }
 0x451   : > { %v8635_v31 = vcombine.low %v10310_v59, %v10314_v23  ;;  %v10059_v14 = vcombine.high %v1638_v9, %v1670_v10  ;;  %v711_v59 = vld [vmem:[%s11018_s22 + $0x180] sm:$0xff] }
 0x452   : > { %v8642_v36 = vrot.slane %v8634_v24, %v11392_v38  ;;  %7736 = vmatpush1.bf16.msra.mxu0 %v9672_v62  ;;  %v680_v62 = vld [vmem:[%s11018_s22 + $0x88] sm:$0xff]  ;;  %v9101_v23 = vcombine.high %v679_v15, %v711_v59  ;;  %v9100_v30 = vcombine.low %v679_v15, %v711_v59 }
 0x453   : > { %v8649_v37 = vrot.slane %v8635_v31, %v11392_v38  ;;  %7777 = vmatpush1.bf16.msra.mxu1 %v9674_v19  ;;  %7737 = vmatprep.subr.bf16.mxu0 %v9737_v20  ;;  %v10056_v19 = vcombine.low %v1637_v7, %v1669_v8  ;;  %v10058_v20 = vcombine.low %v1638_v9, %v1670_v10  ;;  %v744_v31 = vld [vmem:[%s11018_s22 + $0x288] sm:$0xff]  ;;  %v11701_v7 = vld [vmem:[%s11355_s9 + $0x10] sm:$0xff] }
 0x454   : > { %7778 = vmatprep.subr.bf16.mxu1 %v9739_v25  ;;  %v9103_v24 = vcombine.high %v680_v62, %v712_v18  ;;  %v743_v25 = vld [vmem:[%s11018_s22 + $0x280] sm:$0xff]  ;;  %v9102_v35 = vcombine.low %v680_v62, %v712_v18  ;;  %v9166_v43 = vcombine.low %v744_v31, %v776_v34  ;;  %v1096_v15 = vld [vmem:[%s11018_s22 + $0xd88] sm:$0xff]  ;;  %v1778_v59 = vrot.slane %v11701_v7, %v11351_v26 }
 0x455   : > { %v8650_v44 = vcombine.low %v8642_v36, %v8649_v37  ;;  %v9165_v36 = vcombine.high %v743_v25, %v775_v29  ;;  %v839_v37 = vld [vmem:[%s11018_s22 + $0x580] sm:$0xff]  ;;  %v9164_v42 = vcombine.low %v743_v25, %v775_v29  ;;  %v1774_v62 = vrot.slane %v11701_v7, %v11070_v54 }
 0x456   : > { %7738 = vmatpush1.bf16.msra.mxu0 %v9736_v51  ;;  %v807_v51 = vld [vmem:[%s11018_s22 + $0x480] sm:$0xff] }
 0x457   : > { %8874 = vst [vmem:[%s11405_s24 + $0x18] sm:$0xff] %v8650_v44  ;;  %7779 = vmatpush1.bf16.msra.mxu1 %v9738_v39  ;;  %7739 = vmatprep.subr.bf16.mxu0 %v9801_v40  ;;  %v9167_v39 = vcombine.high %v744_v31, %v776_v34  ;;  %v808_v40 = vld [vmem:[%s11018_s22 + $0x488] sm:$0xff]  ;;  %v9229_v44 = vcombine.high %v807_v51, %v839_v37  ;;  %v1127_v29 = vld [vmem:[%s11018_s22 + $0xe80] sm:$0xff] }
 0x458   : > { %7780 = vmatprep.subr.bf16.mxu1 %v9803_v41  ;;  %v840_v41 = vld [vmem:[%s11018_s22 + $0x588] sm:$0xff] }
 0x459   : > { %v9231_v45 = vcombine.high %v808_v40, %v840_v41  ;;  %v9230_v50 = vcombine.low %v808_v40, %v840_v41 }
 0x45a   : > { %7740 = vmatpush1.bf16.msra.mxu0 %v9800_v56  ;;  %v903_v56 = vld [vmem:[%s11018_s22 + $0x780] sm:$0xff] }
 0x45b   : > { %7781 = vmatpush1.bf16.msra.mxu1 %v9802_v47  ;;  %7741 = vmatprep.subr.bf16.mxu0 %v9865_v48  ;;  %v872_v47 = vld [vmem:[%s11018_s22 + $0x688] sm:$0xff]  ;;  %v9293_v53 = vcombine.high %v871_v46, %v903_v56 }
 0x45c   : > { %7782 = vmatprep.subr.bf16.mxu1 %v9867_v49  ;;  %v904_v48 = vld [vmem:[%s11018_s22 + $0x788] sm:$0xff]  ;;  %v9228_v49 = vcombine.low %v807_v51, %v839_v37 }
 0x45d   : > { %v9295_v55 = vcombine.high %v872_v47, %v904_v48  ;;  %v9294_v63 = vcombine.low %v872_v47, %v904_v48  ;;  %v1160_v51 = vld [vmem:[%s11018_s22 + $0xf88] sm:$0xff] }
 0x45e   : > { %7742 = vmatpush1.bf16.msra.mxu0 %v9864_v57  ;;  %v967_v57 = vld [vmem:[%s11018_s22 + $0x980] sm:$0xff] }
 0x45f   : > { %7783 = vmatpush1.bf16.msra.mxu1 %v9866_v58  ;;  %7743 = vmatprep.subr.bf16.mxu0 %v9929_v60  ;;  %v936_v58 = vld [vmem:[%s11018_s22 + $0x888] sm:$0xff]  ;;  %v9357_v0 = vcombine.high %v935_v32, %v967_v57 }
 0x460   : > { %7784 = vmatprep.subr.bf16.mxu1 %v9931_v61  ;;  %v968_v60 = vld [vmem:[%s11018_s22 + $0x988] sm:$0xff]  ;;  %v9292_v61 = vcombine.low %v871_v46, %v903_v56 }
 0x461   : > { %v9359_v1 = vcombine.high %v936_v58, %v968_v60  ;;  %v9358_v8 = vcombine.low %v936_v58, %v968_v60 }
 0x462   : > { %7744 = vmatpush1.bf16.msra.mxu0 %v9928_v3  ;;  %v1031_v3 = vld [vmem:[%s11018_s22 + $0xb80] sm:$0xff] }
 0x463   : > { %7785 = vmatpush1.bf16.msra.mxu1 %v9930_v4  ;;  %7745 = vmatprep.subr.bf16.mxu0 %v9993_v5  ;;  %v1000_v4 = vld [vmem:[%s11018_s22 + $0xa88] sm:$0xff]  ;;  %v9421_v9 = vcombine.high %v999_v2, %v1031_v3  ;;  %v9420_v18 = vcombine.low %v999_v2, %v1031_v3 }
 0x464   : > { %7786 = vmatprep.subr.bf16.mxu1 %v9995_v6  ;;  %v1032_v5 = vld [vmem:[%s11018_s22 + $0xb88] sm:$0xff]  ;;  %v9356_v6 = vcombine.low %v935_v32, %v967_v57 }
 0x465   : > { %v9423_v10 = vcombine.high %v1000_v4, %v1032_v5 }
 0x466   : > { %7746 = vmatpush1.bf16.msra.mxu0 %v9992_v11  ;;  %v1063_v11 = vld [vmem:[%s11018_s22 + $0xc80] sm:$0xff] }
 0x467   : > { %7787 = vmatpush1.bf16.msra.mxu1 %v9994_v12  ;;  %7747 = vmatprep.subr.bf16.mxu0 %v10057_v13  ;;  %v1095_v12 = vld [vmem:[%s11018_s22 + $0xd80] sm:$0xff]  ;;  %v1770_v13 = vrot.slane %v11701_v7, %v11067_v52 }
 0x468   : > { %7788 = vmatprep.subr.bf16.mxu1 %v10059_v14  ;;  %v1064_v14 = vld [vmem:[%s11018_s22 + $0xc88] sm:$0xff] }
 0x469   : > { %v9487_v25 = vcombine.high %v1064_v14, %v1096_v15  ;;  %v9486_v46 = vcombine.low %v1064_v14, %v1096_v15 }
 0x46a   : > { %7748 = vmatpush1.bf16.msra.mxu0 %v10056_v19  ;;  %v1782_v19 = vrot.slane %v11701_v7, %v11361_v33 }
 0x46b   : > { %7789 = vmatpush1.bf16.msra.mxu1 %v10058_v20  ;;  %7799 = vmatprep.subr.bf16.mxu0 %v9101_v23  ;;  %v9422_v20 = vcombine.low %v1000_v4, %v1032_v5  ;;  %v9485_v23 = vcombine.high %v1063_v11, %v1095_v12 }
 0x46c   : > { %7840 = vmatprep.subr.bf16.mxu1 %v9103_v24 }
 0x46d   : > { %7750 = vmatmul.mubr.bf16.vlgmr.msra.gmra.mrb[32].mxu0 %v11123_v28 }
 0x46e   : > { %7791 = vmatmul.mubr.bf16.vlgmr.msra.gmra.mrb[32].mxu1 %v11123_v28  ;;  %7800 = vmatpush1.bf16.msra.mxu0 %v9100_v30  ;;  %v1159_v30 = vld [vmem:[%s11018_s22 + $0xf80] sm:$0xff] }
 0x46f   : > { %7831 = vmatprep.mubr.bf16.mxu0 %v11121_v27  ;;  %7841 = vmatpush1.bf16.msra.mxu1 %v9102_v35  ;;  %v9549_v56 = vcombine.high %v1127_v29, %v1159_v30  ;;  %v9548_v32 = vcombine.low %v1127_v29, %v1159_v30  ;;  %v1416_v29 = vld [vmem:[%s11018_s22 + $0x1788] sm:$0xff] }
 0x470   : > { %7872 = vmatprep.mubr.bf16.mxu1 %v11121_v27  ;;  %7801 = vmatprep.subr.bf16.mxu0 %v9165_v36  ;;  %v1128_v36 = vld [vmem:[%s11018_s22 + $0xe88] sm:$0xff] }
 0x471   : > { %7842 = vmatprep.subr.bf16.mxu1 %v9167_v39  ;;  %v9551_v48 = vcombine.high %v1128_v36, %v1160_v51  ;;  %v9550_v57 = vcombine.low %v1128_v36, %v1160_v51 }
 0x472   : > { %7802 = vmatpush1.bf16.msra.mxu0 %v9164_v42  ;;  %v9484_v42 = vcombine.low %v1063_v11, %v1095_v12  ;;  %v1352_v11 = vld [vmem:[%s11018_s22 + $0x1588] sm:$0xff] }
 0x473   : > { %7843 = vmatpush1.bf16.msra.mxu1 %v9166_v43  ;;  %7803 = vmatprep.subr.bf16.mxu0 %v9229_v44 }
 0x474   : > { %7844 = vmatprep.subr.bf16.mxu1 %v9231_v45 }
 0x476   : > { %7804 = vmatpush1.bf16.msra.mxu0 %v9228_v49  ;;  %v1191_v49 = vld [vmem:[%s11018_s22 + $0x1080] sm:$0xff] }
 0x477   : > { %7845 = vmatpush1.bf16.msra.mxu1 %v9230_v50  ;;  %7805 = vmatprep.subr.bf16.mxu0 %v9293_v53  ;;  %v1223_v50 = vld [vmem:[%s11018_s22 + $0x1180] sm:$0xff]  ;;  %v1192_v53 = vld [vmem:[%s11018_s22 + $0x1088] sm:$0xff] }
 0x478   : > { %7846 = vmatprep.subr.bf16.mxu1 %v9295_v55  ;;  %v1224_v55 = vld [vmem:[%s11018_s22 + $0x1188] sm:$0xff]  ;;  %v9613_v58 = vcombine.high %v1191_v49, %v1223_v50  ;;  %v9612_v2 = vcombine.low %v1191_v49, %v1223_v50 }
 0x479   : > { %v9615_v60 = vcombine.high %v1192_v53, %v1224_v55  ;;  %v9614_v3 = vcombine.low %v1192_v53, %v1224_v55  ;;  %v1544_v49 = vld [vmem:[%s11018_s22 + $0x1b88] sm:$0xff] }
 0x47a   : > { %7806 = vmatpush1.bf16.msra.mxu0 %v9292_v61  ;;  %v1255_v61 = vld [vmem:[%s11018_s22 + $0x1280] sm:$0xff] }
 0x47b   : > { %7847 = vmatpush1.bf16.msra.mxu1 %v9294_v63  ;;  %7807 = vmatprep.subr.bf16.mxu0 %v9357_v0  ;;  %v1287_v63 = vld [vmem:[%s11018_s22 + $0x1380] sm:$0xff]  ;;  %v1256_v0 = vld [vmem:[%s11018_s22 + $0x1288] sm:$0xff] }
 0x47c   : > { %7848 = vmatprep.subr.bf16.mxu1 %v9359_v1  ;;  %v1288_v1 = vld [vmem:[%s11018_s22 + $0x1388] sm:$0xff]  ;;  %v9677_v4 = vcombine.high %v1255_v61, %v1287_v63 }
 0x47d   : > { %v9679_v5 = vcombine.high %v1256_v0, %v1288_v1  ;;  %v9678_v15 = vcombine.low %v1256_v0, %v1288_v1 }
 0x47e   : > { %7808 = vmatpush1.bf16.msra.mxu0 %v9356_v6  ;;  %v1319_v6 = vld [vmem:[%s11018_s22 + $0x1480] sm:$0xff] }
 0x47f   : > { %7849 = vmatpush1.bf16.msra.mxu1 %v9358_v8  ;;  %7809 = vmatprep.subr.bf16.mxu0 %v9421_v9  ;;  %v1351_v8 = vld [vmem:[%s11018_s22 + $0x1580] sm:$0xff] }
 0x480   : > { %v7505_v24 = vpop.f32.mrb[20].mxu0  ;;  %7850 = vmatprep.subr.bf16.mxu1 %v9423_v10  ;;  %v1320_v10 = vld [vmem:[%s11018_s22 + $0x1488] sm:$0xff] }
 0x481   : > { %v7506_v31 = vadd.f32 %v7505_v24, %v1770_v13  ;;  %v7546_v34 = vpop.f32.mrb[20].mxu1  ;;  %v7507_v35 = vpop.f32.mrb[21].mxu0  ;;  %v9676_v13 = vcombine.low %v1255_v61, %v1287_v63  ;;  %v1608_v61 = vld [vmem:[%s11018_s22 + $0x1d88] sm:$0xff] }
 0x482   : > { %v7547_v37 = vadd.f32 %v7546_v34, %v1778_v59  ;;  %v7508_v39 = vadd.f32 %v7507_v35, %v1774_v62  ;;  %v7548_v40 = vpop.f32.mrb[21].mxu1  ;;  %v7509_v41 = vpop.f32.mrb[22].mxu0  ;;  %7810 = vmatpush1.bf16.msra.mxu0 %v9420_v18  ;;  %v9741_v59 = vcombine.high %v1319_v6, %v1351_v8  ;;  %v9742_v35 = vcombine.low %v1320_v10, %v1352_v11 }
 0x483   : > { %10315 = vtanh.f32 %v7506_v31  ;;  %v7549_v43 = vadd.f32 %v7548_v40, %v1782_v19  ;;  %v7550_v44 = vpop.f32.mrb[22].mxu1  ;;  %7851 = vmatpush1.bf16.msra.mxu1 %v9422_v20  ;;  %v7510_v45 = vpop.f32.mrb[23].mxu0  ;;  %7811 = vmatprep.subr.bf16.mxu0 %v9485_v23  ;;  %v9743_v19 = vcombine.high %v1320_v10, %v1352_v11  ;;  %v1383_v20 = vld [vmem:[%s11018_s22 + $0x1680] sm:$0xff]  ;;  %v9740_v31 = vcombine.low %v1319_v6, %v1351_v8  ;;  %v1448_v41 = vld [vmem:[%s11018_s22 + $0x1888] sm:$0xff] }
 0x484   : > { %10317 = vtanh.f32 %v7547_v37  ;;  %v7551_v47 = vpop.f32.mrb[23].mxu1  ;;  %7852 = vmatprep.subr.bf16.mxu1 %v9487_v25  ;;  %v1415_v23 = vld [vmem:[%s11018_s22 + $0x1780] sm:$0xff]  ;;  %v1384_v25 = vld [vmem:[%s11018_s22 + $0x1688] sm:$0xff] }
 0x485   : > { %10319 = vtanh.f32 %v7508_v39  ;;  %v9805_v36 = vcombine.high %v1383_v20, %v1415_v23  ;;  %v9807_v51 = vcombine.high %v1384_v25, %v1416_v29  ;;  %v1447_v37 = vld [vmem:[%s11018_s22 + $0x1880] sm:$0xff]  ;;  %v9806_v44 = vcombine.low %v1384_v25, %v1416_v29  ;;  %v1672_v6 = vld [vmem:[%s11018_s22 + $0x1f88] sm:$0xff]  ;;  %v746_v25 = vld [vmem:[%s11018_s22 + $0x298] sm:$0xff] }
 0x486   : > { %10321 = vtanh.f32 %v7549_v43  ;;  %7812 = vmatpush1.bf16.msra.mxu0 %v9484_v42  ;;  %v1479_v39 = vld [vmem:[%s11018_s22 + $0x1980] sm:$0xff]  ;;  %v1480_v42 = vld [vmem:[%s11018_s22 + $0x1988] sm:$0xff]  ;;  %v9804_v43 = vcombine.low %v1383_v20, %v1415_v23  ;;  %v745_v20 = vld [vmem:[%s11018_s22 + $0x290] sm:$0xff] }
 0x487   : > { %7853 = vmatpush1.bf16.msra.mxu1 %v9486_v46  ;;  %7813 = vmatprep.subr.bf16.mxu0 %v9549_v56  ;;  %v9869_v45 = vcombine.high %v1447_v37, %v1479_v39  ;;  %v9871_v46 = vcombine.high %v1448_v41, %v1480_v42  ;;  %v1511_v56 = vld [vmem:[%s11018_s22 + $0x1a80] sm:$0xff]  ;;  %v9868_v50 = vcombine.low %v1447_v37, %v1479_v39  ;;  %v777_v23 = vld [vmem:[%s11018_s22 + $0x390] sm:$0xff]  ;;  %v778_v29 = vld [vmem:[%s11018_s22 + $0x398] sm:$0xff] }
 0x488   : > { %7854 = vmatprep.subr.bf16.mxu1 %v9551_v48  ;;  %v1543_v47 = vld [vmem:[%s11018_s22 + $0x1b80] sm:$0xff]  ;;  %v1512_v48 = vld [vmem:[%s11018_s22 + $0x1a88] sm:$0xff]  ;;  %v9870_v53 = vcombine.low %v1448_v41, %v1480_v42  ;;  %v842_v37 = vld [vmem:[%s11018_s22 + $0x598] sm:$0xff]  ;;  %v9168_v39 = vcombine.low %v745_v20, %v777_v23 }
 0x489   : > { %v9933_v55 = vcombine.high %v1511_v56, %v1543_v47  ;;  %v9932_v63 = vcombine.low %v1511_v56, %v1543_v47  ;;  %v9934_v0 = vcombine.low %v1512_v48, %v1544_v49 }
 0x48a   : > { %7814 = vmatpush1.bf16.msra.mxu0 %v9548_v32  ;;  %v9935_v32 = vcombine.high %v1512_v48, %v1544_v49 }
 0x48b   : > { %7855 = vmatpush1.bf16.msra.mxu1 %v9550_v57  ;;  %7815 = vmatprep.subr.bf16.mxu0 %v9613_v58  ;;  %v1575_v57 = vld [vmem:[%s11018_s22 + $0x1c80] sm:$0xff] }
 0x48c   : > { %7856 = vmatprep.subr.bf16.mxu1 %v9615_v60  ;;  %v1607_v58 = vld [vmem:[%s11018_s22 + $0x1d80] sm:$0xff]  ;;  %v1576_v60 = vld [vmem:[%s11018_s22 + $0x1c88] sm:$0xff] }
 0x48d   : > { %v10316_v9 = vpop.eup %10315  ;;  %v9997_v1 = vcombine.high %v1575_v57, %v1607_v58  ;;  %v9996_v8 = vcombine.low %v1575_v57, %v1607_v58 }
 0x48e   : > { %v10318_v12 = vpop.eup %10317  ;;  %7816 = vmatpush1.bf16.msra.mxu0 %v9612_v2  ;;  %v9999_v2 = vcombine.high %v1576_v60, %v1608_v61 }
 0x48f   : > { %v10320_v14 = vpop.eup %10319  ;;  %7857 = vmatpush1.bf16.msra.mxu1 %v9614_v3  ;;  %7817 = vmatprep.subr.bf16.mxu0 %v9677_v4  ;;  %v1639_v3 = vld [vmem:[%s11018_s22 + $0x1e80] sm:$0xff] }
 0x490   : > { %v10322_v62 = vpop.eup %10321  ;;  %v8651_v18 = vcombine.low %v10316_v9, %v10320_v14  ;;  %7858 = vmatprep.subr.bf16.mxu1 %v9679_v5  ;;  %v1671_v4 = vld [vmem:[%s11018_s22 + $0x1f80] sm:$0xff]  ;;  %v1640_v5 = vld [vmem:[%s11018_s22 + $0x1e88] sm:$0xff]  ;;  %v9998_v9 = vcombine.low %v1576_v60, %v1608_v61  ;;  %v682_v14 = vld [vmem:[%s11018_s22 + $0x98] sm:$0xff] }
 0x491   : > { %v8652_v24 = vcombine.low %v10318_v12, %v10322_v62  ;;  %v10061_v10 = vcombine.high %v1639_v3, %v1671_v4  ;;  %v10063_v11 = vcombine.high %v1640_v5, %v1672_v6  ;;  %v681_v12 = vld [vmem:[%s11018_s22 + $0x90] sm:$0xff]  ;;  %v10062_v62 = vcombine.low %v1640_v5, %v1672_v6 }
 0x492   : > { %v8659_v30 = vrot.slane %v8651_v18, %v11392_v38  ;;  %7818 = vmatpush1.bf16.msra.mxu0 %v9676_v13  ;;  %v713_v13 = vld [vmem:[%s11018_s22 + $0x190] sm:$0xff] }
 0x493   : > { %v8666_v34 = vrot.slane %v8652_v24, %v11392_v38  ;;  %7859 = vmatpush1.bf16.msra.mxu1 %v9678_v15  ;;  %7819 = vmatprep.subr.bf16.mxu0 %v9741_v59  ;;  %v714_v15 = vld [vmem:[%s11018_s22 + $0x198] sm:$0xff]  ;;  %v10060_v59 = vcombine.low %v1639_v3, %v1671_v4  ;;  %v9105_v18 = vcombine.high %v681_v12, %v713_v13 }
 0x494   : > { %7860 = vmatprep.subr.bf16.mxu1 %v9743_v19  ;;  %v9107_v19 = vcombine.high %v682_v14, %v714_v15  ;;  %v9104_v24 = vcombine.low %v681_v12, %v713_v13  ;;  %v1098_v12 = vld [vmem:[%s11018_s22 + $0xd98] sm:$0xff]  ;;  %v1794_v13 = vrot.slane %v11701_v7, %v11450_v17 }
 0x495   : > { %v8667_v40 = vcombine.low %v8659_v30, %v8666_v34  ;;  %v9106_v30 = vcombine.low %v682_v14, %v714_v15  ;;  %v809_v34 = vld [vmem:[%s11018_s22 + $0x490] sm:$0xff]  ;;  %v1790_v14 = vrot.slane %v11701_v7, %v11455_v21 }
 0x496   : > { %7820 = vmatpush1.bf16.msra.mxu0 %v9740_v31  ;;  %v9169_v31 = vcombine.high %v745_v20, %v777_v23  ;;  %v1129_v23 = vld [vmem:[%s11018_s22 + $0xe90] sm:$0xff] }
 0x497   : > { %8875 = vst [vmem:[%s11405_s24 + $0x20] sm:$0xff] %v8667_v40  ;;  %7861 = vmatpush1.bf16.msra.mxu1 %v9742_v35  ;;  %7821 = vmatprep.subr.bf16.mxu0 %v9805_v36  ;;  %v841_v35 = vld [vmem:[%s11018_s22 + $0x590] sm:$0xff]  ;;  %v9171_v36 = vcombine.high %v746_v25, %v778_v29  ;;  %v9170_v40 = vcombine.low %v746_v25, %v778_v29 }
 0x498   : > { %7862 = vmatprep.subr.bf16.mxu1 %v9807_v51  ;;  %v810_v51 = vld [vmem:[%s11018_s22 + $0x498] sm:$0xff]  ;;  %v9233_v41 = vcombine.high %v809_v34, %v841_v35  ;;  %v9232_v56 = vcombine.low %v809_v34, %v841_v35 }
 0x499   : > { %v9235_v42 = vcombine.high %v810_v51, %v842_v37  ;;  %v9234_v47 = vcombine.low %v810_v51, %v842_v37  ;;  %v1162_v34 = vld [vmem:[%s11018_s22 + $0xf98] sm:$0xff] }
 0x49a   : > { %7822 = vmatpush1.bf16.msra.mxu0 %v9804_v43  ;;  %v873_v43 = vld [vmem:[%s11018_s22 + $0x690] sm:$0xff] }
 0x49b   : > { %7863 = vmatpush1.bf16.msra.mxu1 %v9806_v44  ;;  %7823 = vmatprep.subr.bf16.mxu0 %v9869_v45  ;;  %v905_v44 = vld [vmem:[%s11018_s22 + $0x790] sm:$0xff]  ;;  %v874_v45 = vld [vmem:[%s11018_s22 + $0x698] sm:$0xff] }
 0x49c   : > { %7864 = vmatprep.subr.bf16.mxu1 %v9871_v46  ;;  %v906_v46 = vld [vmem:[%s11018_s22 + $0x798] sm:$0xff]  ;;  %v9297_v48 = vcombine.high %v873_v43, %v905_v44  ;;  %v9296_v57 = vcombine.low %v873_v43, %v905_v44 }
 0x49d   : > { %v9299_v49 = vcombine.high %v874_v45, %v906_v46  ;;  %v9298_v58 = vcombine.low %v874_v45, %v906_v46  ;;  %v1193_v46 = vld [vmem:[%s11018_s22 + $0x1090] sm:$0xff] }
 0x49e   : > { %7824 = vmatpush1.bf16.msra.mxu0 %v9868_v50  ;;  %v937_v50 = vld [vmem:[%s11018_s22 + $0x890] sm:$0xff] }
 0x49f   : > { %7865 = vmatpush1.bf16.msra.mxu1 %v9870_v53  ;;  %7825 = vmatprep.subr.bf16.mxu0 %v9933_v55  ;;  %v969_v53 = vld [vmem:[%s11018_s22 + $0x990] sm:$0xff]  ;;  %v938_v55 = vld [vmem:[%s11018_s22 + $0x898] sm:$0xff] }
 0x4a0   : > { %7866 = vmatprep.subr.bf16.mxu1 %v9935_v32  ;;  %v970_v32 = vld [vmem:[%s11018_s22 + $0x998] sm:$0xff]  ;;  %v9361_v60 = vcombine.high %v937_v50, %v969_v53  ;;  %v9360_v3 = vcombine.low %v937_v50, %v969_v53 }
 0x4a1   : > { %v9363_v61 = vcombine.high %v938_v55, %v970_v32  ;;  %v9362_v4 = vcombine.low %v938_v55, %v970_v32  ;;  %v1257_v32 = vld [vmem:[%s11018_s22 + $0x1290] sm:$0xff] }
 0x4a2   : > { %7826 = vmatpush1.bf16.msra.mxu0 %v9932_v63  ;;  %v1001_v63 = vld [vmem:[%s11018_s22 + $0xa90] sm:$0xff] }
 0x4a3   : > { %7867 = vmatpush1.bf16.msra.mxu1 %v9934_v0  ;;  %7827 = vmatprep.subr.bf16.mxu0 %v9997_v1  ;;  %v1033_v0 = vld [vmem:[%s11018_s22 + $0xb90] sm:$0xff]  ;;  %v1002_v1 = vld [vmem:[%s11018_s22 + $0xa98] sm:$0xff] }
 0x4a4   : > { %7868 = vmatprep.subr.bf16.mxu1 %v9999_v2  ;;  %v1034_v2 = vld [vmem:[%s11018_s22 + $0xb98] sm:$0xff]  ;;  %v9425_v5 = vcombine.high %v1001_v63, %v1033_v0  ;;  %v9424_v15 = vcombine.low %v1001_v63, %v1033_v0 }
 0x4a5   : > { %v9427_v6 = vcombine.high %v1002_v1, %v1034_v2 }
 0x4a6   : > { %7828 = vmatpush1.bf16.msra.mxu0 %v9996_v8  ;;  %v1065_v8 = vld [vmem:[%s11018_s22 + $0xc90] sm:$0xff] }
 0x4a7   : > { %7869 = vmatpush1.bf16.msra.mxu1 %v9998_v9  ;;  %7829 = vmatprep.subr.bf16.mxu0 %v10061_v10  ;;  %v1097_v9 = vld [vmem:[%s11018_s22 + $0xd90] sm:$0xff]  ;;  %v1786_v10 = vrot.slane %v11701_v7, %v11447_v16 }
 0x4a8   : > { %7870 = vmatprep.subr.bf16.mxu1 %v10063_v11  ;;  %v1066_v11 = vld [vmem:[%s11018_s22 + $0xc98] sm:$0xff] }
 0x4a9   : > { %v9491_v20 = vcombine.high %v1066_v11, %v1098_v12 }
 0x4aa   : > { %7830 = vmatpush1.bf16.msra.mxu0 %v10060_v59  ;;  %v1798_v59 = vrot.slane %v11701_v7, %v11458_v22  ;;  %v9488_v7 = vcombine.low %v1065_v8, %v1097_v9 }
 0x4ab   : > { %7871 = vmatpush1.bf16.msra.mxu1 %v10062_v62  ;;  %7881 = vmatprep.subr.bf16.mxu0 %v9105_v18  ;;  %v9426_v62 = vcombine.low %v1002_v1, %v1034_v2  ;;  %v9489_v18 = vcombine.high %v1065_v8, %v1097_v9  ;;  %v1321_v2 = vld [vmem:[%s11018_s22 + $0x1490] sm:$0xff] }
 0x4ac   : > { %7922 = vmatprep.subr.bf16.mxu1 %v9107_v19 }
 0x4ad   : > { %7832 = vmatmul.mubr.bf16.vlgmr.msra.gmra.mrb[36].mxu0 %v11123_v28 }
 0x4ae   : > { %7873 = vmatmul.mubr.bf16.vlgmr.msra.gmra.mrb[36].mxu1 %v11123_v28  ;;  %7882 = vmatpush1.bf16.msra.mxu0 %v9104_v24  ;;  %v1161_v24 = vld [vmem:[%s11018_s22 + $0xf90] sm:$0xff] }
 0x4af   : > { %7913 = vmatprep.mubr.bf16.mxu0 %v11121_v27  ;;  %7923 = vmatpush1.bf16.msra.mxu1 %v9106_v30  ;;  %v9553_v43 = vcombine.high %v1129_v23, %v1161_v24 }
 0x4b0   : > { %7954 = vmatprep.mubr.bf16.mxu1 %v11121_v27  ;;  %7883 = vmatprep.subr.bf16.mxu0 %v9169_v31  ;;  %v1130_v31 = vld [vmem:[%s11018_s22 + $0xe98] sm:$0xff] }
 0x4b1   : > { %7924 = vmatprep.subr.bf16.mxu1 %v9171_v36  ;;  %v9555_v45 = vcombine.high %v1130_v31, %v1162_v34  ;;  %v9554_v50 = vcombine.low %v1130_v31, %v1162_v34  ;;  %v1449_v34 = vld [vmem:[%s11018_s22 + $0x1890] sm:$0xff] }
 0x4b2   : > { %7884 = vmatpush1.bf16.msra.mxu0 %v9168_v39 }
 0x4b3   : > { %7925 = vmatpush1.bf16.msra.mxu1 %v9170_v40  ;;  %7885 = vmatprep.subr.bf16.mxu0 %v9233_v41 }
 0x4b4   : > { %7926 = vmatprep.subr.bf16.mxu1 %v9235_v42  ;;  %v9490_v42 = vcombine.low %v1066_v11, %v1098_v12 }
 0x4b6   : > { %7886 = vmatpush1.bf16.msra.mxu0 %v9232_v56  ;;  %v1225_v56 = vld [vmem:[%s11018_s22 + $0x1190] sm:$0xff] }
 0x4b7   : > { %7927 = vmatpush1.bf16.msra.mxu1 %v9234_v47  ;;  %7887 = vmatprep.subr.bf16.mxu0 %v9297_v48  ;;  %v1194_v47 = vld [vmem:[%s11018_s22 + $0x1098] sm:$0xff]  ;;  %v9617_v53 = vcombine.high %v1193_v46, %v1225_v56 }
 0x4b8   : > { %7928 = vmatprep.subr.bf16.mxu1 %v9299_v49  ;;  %v1226_v48 = vld [vmem:[%s11018_s22 + $0x1198] sm:$0xff]  ;;  %v9552_v49 = vcombine.low %v1129_v23, %v1161_v24 }
 0x4b9   : > { %v9619_v55 = vcombine.high %v1194_v47, %v1226_v48  ;;  %v9618_v63 = vcombine.low %v1194_v47, %v1226_v48 }
 0x4ba   : > { %7888 = vmatpush1.bf16.msra.mxu0 %v9296_v57  ;;  %v1289_v57 = vld [vmem:[%s11018_s22 + $0x1390] sm:$0xff] }
 0x4bb   : > { %7929 = vmatpush1.bf16.msra.mxu1 %v9298_v58  ;;  %7889 = vmatprep.subr.bf16.mxu0 %v9361_v60  ;;  %v1258_v58 = vld [vmem:[%s11018_s22 + $0x1298] sm:$0xff]  ;;  %v9681_v0 = vcombine.high %v1257_v32, %v1289_v57  ;;  %v9680_v9 = vcombine.low %v1257_v32, %v1289_v57 }
 0x4bc   : > { %7930 = vmatprep.subr.bf16.mxu1 %v9363_v61  ;;  %v1290_v60 = vld [vmem:[%s11018_s22 + $0x1398] sm:$0xff]  ;;  %v9616_v61 = vcombine.low %v1193_v46, %v1225_v56 }
 0x4bd   : > { %v9683_v1 = vcombine.high %v1258_v58, %v1290_v60  ;;  %v9682_v11 = vcombine.low %v1258_v58, %v1290_v60 }
 0x4be   : > { %7890 = vmatpush1.bf16.msra.mxu0 %v9360_v3  ;;  %v1353_v3 = vld [vmem:[%s11018_s22 + $0x1590] sm:$0xff] }
 0x4bf   : > { %7931 = vmatpush1.bf16.msra.mxu1 %v9362_v4  ;;  %7891 = vmatprep.subr.bf16.mxu0 %v9425_v5  ;;  %v1322_v5 = vld [vmem:[%s11018_s22 + $0x1498] sm:$0xff]  ;;  %v9745_v12 = vcombine.high %v1321_v2, %v1353_v3  ;;  %v9744_v24 = vcombine.low %v1321_v2, %v1353_v3 }
 0x4c0   : > { %v7587_v19 = vpop.f32.mrb[24].mxu0  ;;  %7932 = vmatprep.subr.bf16.mxu1 %v9427_v6  ;;  %v1354_v6 = vld [vmem:[%s11018_s22 + $0x1598] sm:$0xff] }
 0x4c1   : > { %v7588_v25 = vadd.f32 %v7587_v19, %v1786_v10  ;;  %v7628_v29 = vpop.f32.mrb[24].mxu1  ;;  %v7589_v30 = vpop.f32.mrb[25].mxu0  ;;  %v1386_v19 = vld [vmem:[%s11018_s22 + $0x1698] sm:$0xff] }
 0x4c2   : > { %v7629_v35 = vadd.f32 %v7628_v29, %v1794_v13  ;;  %v7590_v36 = vadd.f32 %v7589_v30, %v1790_v14  ;;  %v7630_v51 = vpop.f32.mrb[25].mxu1  ;;  %v7591_v37 = vpop.f32.mrb[26].mxu0  ;;  %7892 = vmatpush1.bf16.msra.mxu0 %v9424_v15  ;;  %v9747_v15 = vcombine.high %v1322_v5, %v1354_v6  ;;  %v9746_v29 = vcombine.low %v1322_v5, %v1354_v6  ;;  %v683_v6 = vld [vmem:[%s11018_s22 + $0xa0] sm:$0xff] }
 0x4c3   : > { %10323 = vtanh.f32 %v7588_v25  ;;  %v7631_v39 = vadd.f32 %v7630_v51, %v1798_v59  ;;  %v7632_v40 = vpop.f32.mrb[26].mxu1  ;;  %7933 = vmatpush1.bf16.msra.mxu1 %v9426_v62  ;;  %v7592_v41 = vpop.f32.mrb[27].mxu0  ;;  %7893 = vmatprep.subr.bf16.mxu0 %v9489_v18  ;;  %v1385_v59 = vld [vmem:[%s11018_s22 + $0x1690] sm:$0xff]  ;;  %v1450_v51 = vld [vmem:[%s11018_s22 + $0x1898] sm:$0xff] }
 0x4c4   : > { %10325 = vtanh.f32 %v7629_v35  ;;  %v7633_v44 = vpop.f32.mrb[27].mxu1  ;;  %7934 = vmatprep.subr.bf16.mxu1 %v9491_v20  ;;  %v1417_v62 = vld [vmem:[%s11018_s22 + $0x1790] sm:$0xff]  ;;  %v1418_v20 = vld [vmem:[%s11018_s22 + $0x1798] sm:$0xff] }
 0x4c5   : > { %10327 = vtanh.f32 %v7590_v36  ;;  %v9809_v30 = vcombine.high %v1385_v59, %v1417_v62  ;;  %v9811_v31 = vcombine.high %v1386_v19, %v1418_v20  ;;  %v1481_v35 = vld [vmem:[%s11018_s22 + $0x1990] sm:$0xff]  ;;  %v1482_v37 = vld [vmem:[%s11018_s22 + $0x1998] sm:$0xff] }
 0x4c6   : > { %10329 = vtanh.f32 %v7631_v39  ;;  %7894 = vmatpush1.bf16.msra.mxu0 %v9488_v7  ;;  %v9808_v7 = vcombine.low %v1385_v59, %v1417_v62  ;;  %v9810_v39 = vcombine.low %v1386_v19, %v1418_v20  ;;  %v9873_v40 = vcombine.high %v1449_v34, %v1481_v35  ;;  %v1514_v44 = vld [vmem:[%s11018_s22 + $0x1a98] sm:$0xff]  ;;  %v779_v59 = vld [vmem:[%s11018_s22 + $0x3a0] sm:$0xff]  ;;  %v780_v19 = vld [vmem:[%s11018_s22 + $0x3a8] sm:$0xff] }
 0x4c7   : > { %7935 = vmatpush1.bf16.msra.mxu1 %v9490_v42  ;;  %7895 = vmatprep.subr.bf16.mxu0 %v9553_v43  ;;  %v9875_v41 = vcombine.high %v1450_v51, %v1482_v37  ;;  %v1513_v42 = vld [vmem:[%s11018_s22 + $0x1a90] sm:$0xff]  ;;  %v9872_v46 = vcombine.low %v1449_v34, %v1481_v35  ;;  %v9874_v56 = vcombine.low %v1450_v51, %v1482_v37  ;;  %v875_v37 = vld [vmem:[%s11018_s22 + $0x6a0] sm:$0xff] }
 0x4c8   : > { %7936 = vmatprep.subr.bf16.mxu1 %v9555_v45  ;;  %v1545_v43 = vld [vmem:[%s11018_s22 + $0x1b90] sm:$0xff]  ;;  %v1546_v45 = vld [vmem:[%s11018_s22 + $0x1b98] sm:$0xff] }
 0x4c9   : > { %v9937_v47 = vcombine.high %v1513_v42, %v1545_v43  ;;  %v9939_v48 = vcombine.high %v1514_v44, %v1546_v45  ;;  %v9936_v32 = vcombine.low %v1513_v42, %v1545_v43  ;;  %v9938_v57 = vcombine.low %v1514_v44, %v1546_v45  ;;  %v939_v45 = vld [vmem:[%s11018_s22 + $0x8a0] sm:$0xff] }
 0x4ca   : > { %7896 = vmatpush1.bf16.msra.mxu0 %v9552_v49  ;;  %v1577_v49 = vld [vmem:[%s11018_s22 + $0x1c90] sm:$0xff] }
 0x4cb   : > { %7937 = vmatpush1.bf16.msra.mxu1 %v9554_v50  ;;  %7897 = vmatprep.subr.bf16.mxu0 %v9617_v53  ;;  %v1609_v50 = vld [vmem:[%s11018_s22 + $0x1d90] sm:$0xff]  ;;  %v1578_v53 = vld [vmem:[%s11018_s22 + $0x1c98] sm:$0xff] }
 0x4cc   : > { %7938 = vmatprep.subr.bf16.mxu1 %v9619_v55  ;;  %v1610_v55 = vld [vmem:[%s11018_s22 + $0x1d98] sm:$0xff]  ;;  %v10001_v58 = vcombine.high %v1577_v49, %v1609_v50  ;;  %v10000_v2 = vcombine.low %v1577_v49, %v1609_v50 }
 0x4cd   : > { %v10324_v4 = vpop.eup %10323  ;;  %v10003_v60 = vcombine.high %v1578_v53, %v1610_v55  ;;  %v10002_v3 = vcombine.low %v1578_v53, %v1610_v55  ;;  %v1003_v55 = vld [vmem:[%s11018_s22 + $0xaa0] sm:$0xff] }
 0x4ce   : > { %v10326_v8 = vpop.eup %10325  ;;  %7898 = vmatpush1.bf16.msra.mxu0 %v9616_v61  ;;  %v1641_v61 = vld [vmem:[%s11018_s22 + $0x1e90] sm:$0xff] }
 0x4cf   : > { %v10328_v10 = vpop.eup %10327  ;;  %7939 = vmatpush1.bf16.msra.mxu1 %v9618_v63  ;;  %7899 = vmatprep.subr.bf16.mxu0 %v9681_v0  ;;  %v1673_v63 = vld [vmem:[%s11018_s22 + $0x1f90] sm:$0xff]  ;;  %v1642_v0 = vld [vmem:[%s11018_s22 + $0x1e98] sm:$0xff] }
 0x4d0   : > { %v10330_v13 = vpop.eup %10329  ;;  %v8668_v14 = vcombine.low %v10324_v4, %v10328_v10  ;;  %7940 = vmatprep.subr.bf16.mxu1 %v9683_v1  ;;  %v1674_v1 = vld [vmem:[%s11018_s22 + $0x1f98] sm:$0xff]  ;;  %v10065_v4 = vcombine.high %v1641_v61, %v1673_v63  ;;  %v716_v10 = vld [vmem:[%s11018_s22 + $0x1a8] sm:$0xff] }
 0x4d1   : > { %v8669_v18 = vcombine.low %v10326_v8, %v10330_v13  ;;  %v10067_v5 = vcombine.high %v1642_v0, %v1674_v1  ;;  %v715_v8 = vld [vmem:[%s11018_s22 + $0x1a0] sm:$0xff] }
 0x4d2   : > { %v8676_v23 = vrot.slane %v8668_v14, %v11392_v38  ;;  %7900 = vmatpush1.bf16.msra.mxu0 %v9680_v9  ;;  %v684_v9 = vld [vmem:[%s11018_s22 + $0xa8] sm:$0xff]  ;;  %v9109_v13 = vcombine.high %v683_v6, %v715_v8  ;;  %v9108_v62 = vcombine.low %v683_v6, %v715_v8 }
 0x4d3   : > { %v8683_v25 = vrot.slane %v8669_v18, %v11392_v38  ;;  %7941 = vmatpush1.bf16.msra.mxu1 %v9682_v11  ;;  %7901 = vmatprep.subr.bf16.mxu0 %v9745_v12  ;;  %v10064_v11 = vcombine.low %v1641_v61, %v1673_v63  ;;  %v10066_v12 = vcombine.low %v1642_v0, %v1674_v1  ;;  %v748_v18 = vld [vmem:[%s11018_s22 + $0x2a8] sm:$0xff]  ;;  %v11862_v61 = vld [vmem:[%s11355_s9 + $0x18] sm:$0xff] }
 0x4d4   : > { %7942 = vmatprep.subr.bf16.mxu1 %v9747_v15  ;;  %v9111_v14 = vcombine.high %v684_v9, %v716_v10  ;;  %v747_v15 = vld [vmem:[%s11018_s22 + $0x2a0] sm:$0xff]  ;;  %v9110_v20 = vcombine.low %v684_v9, %v716_v10  ;;  %v9174_v35 = vcombine.low %v748_v18, %v780_v19  ;;  %v1100_v6 = vld [vmem:[%s11018_s22 + $0xda8] sm:$0xff]  ;;  %v1810_v8 = vrot.slane %v11862_v61, %v11351_v26 }
 0x4d5   : > { %v8684_v36 = vcombine.low %v8676_v23, %v8683_v25  ;;  %v9173_v23 = vcombine.high %v747_v15, %v779_v59  ;;  %v843_v25 = vld [vmem:[%s11018_s22 + $0x5a0] sm:$0xff]  ;;  %v9172_v34 = vcombine.low %v747_v15, %v779_v59  ;;  %v1806_v9 = vrot.slane %v11862_v61, %v11070_v54 }
 0x4d6   : > { %7902 = vmatpush1.bf16.msra.mxu0 %v9744_v24  ;;  %v811_v24 = vld [vmem:[%s11018_s22 + $0x4a0] sm:$0xff] }
 0x4d7   : > { %8876 = vst [vmem:[%s11405_s24 + $0x28] sm:$0xff] %v8684_v36  ;;  %7943 = vmatpush1.bf16.msra.mxu1 %v9746_v29  ;;  %7903 = vmatprep.subr.bf16.mxu0 %v9809_v30  ;;  %v9175_v29 = vcombine.high %v748_v18, %v780_v19  ;;  %v812_v30 = vld [vmem:[%s11018_s22 + $0x4a8] sm:$0xff]  ;;  %v9237_v36 = vcombine.high %v811_v24, %v843_v25  ;;  %v1131_v59 = vld [vmem:[%s11018_s22 + $0xea0] sm:$0xff] }
 0x4d8   : > { %7944 = vmatprep.subr.bf16.mxu1 %v9811_v31  ;;  %v844_v31 = vld [vmem:[%s11018_s22 + $0x5a8] sm:$0xff] }
 0x4d9   : > { %v9239_v51 = vcombine.high %v812_v30, %v844_v31  ;;  %v9238_v42 = vcombine.low %v812_v30, %v844_v31 }
 0x4da   : > { %7904 = vmatpush1.bf16.msra.mxu0 %v9808_v7  ;;  %v907_v7 = vld [vmem:[%s11018_s22 + $0x7a0] sm:$0xff] }
 0x4db   : > { %7945 = vmatpush1.bf16.msra.mxu1 %v9810_v39  ;;  %7905 = vmatprep.subr.bf16.mxu0 %v9873_v40  ;;  %v876_v39 = vld [vmem:[%s11018_s22 + $0x6a8] sm:$0xff]  ;;  %v9301_v43 = vcombine.high %v875_v37, %v907_v7 }
 0x4dc   : > { %7946 = vmatprep.subr.bf16.mxu1 %v9875_v41  ;;  %v908_v40 = vld [vmem:[%s11018_s22 + $0x7a8] sm:$0xff]  ;;  %v9236_v41 = vcombine.low %v811_v24, %v843_v25 }
 0x4dd   : > { %v9303_v44 = vcombine.high %v876_v39, %v908_v40  ;;  %v9302_v49 = vcombine.low %v876_v39, %v908_v40  ;;  %v1164_v24 = vld [vmem:[%s11018_s22 + $0xfa8] sm:$0xff] }
 0x4de   : > { %7906 = vmatpush1.bf16.msra.mxu0 %v9872_v46  ;;  %v971_v46 = vld [vmem:[%s11018_s22 + $0x9a0] sm:$0xff] }
 0x4df   : > { %7947 = vmatpush1.bf16.msra.mxu1 %v9874_v56  ;;  %7907 = vmatprep.subr.bf16.mxu0 %v9937_v47  ;;  %v940_v56 = vld [vmem:[%s11018_s22 + $0x8a8] sm:$0xff]  ;;  %v9365_v50 = vcombine.high %v939_v45, %v971_v46 }
 0x4e0   : > { %7948 = vmatprep.subr.bf16.mxu1 %v9939_v48  ;;  %v972_v47 = vld [vmem:[%s11018_s22 + $0x9a8] sm:$0xff]  ;;  %v9300_v48 = vcombine.low %v875_v37, %v907_v7 }
 0x4e1   : > { %v9367_v53 = vcombine.high %v940_v56, %v972_v47  ;;  %v9366_v63 = vcombine.low %v940_v56, %v972_v47 }
 0x4e2   : > { %7908 = vmatpush1.bf16.msra.mxu0 %v9936_v32  ;;  %v1035_v32 = vld [vmem:[%s11018_s22 + $0xba0] sm:$0xff] }
 0x4e3   : > { %7949 = vmatpush1.bf16.msra.mxu1 %v9938_v57  ;;  %7909 = vmatprep.subr.bf16.mxu0 %v10001_v58  ;;  %v1004_v57 = vld [vmem:[%s11018_s22 + $0xaa8] sm:$0xff]  ;;  %v9429_v0 = vcombine.high %v1003_v55, %v1035_v32  ;;  %v9428_v10 = vcombine.low %v1003_v55, %v1035_v32 }
 0x4e4   : > { %7950 = vmatprep.subr.bf16.mxu1 %v10003_v60  ;;  %v1036_v58 = vld [vmem:[%s11018_s22 + $0xba8] sm:$0xff]  ;;  %v9364_v60 = vcombine.low %v939_v45, %v971_v46 }
 0x4e5   : > { %v9431_v1 = vcombine.high %v1004_v57, %v1036_v58 }
 0x4e6   : > { %7910 = vmatpush1.bf16.msra.mxu0 %v10000_v2  ;;  %v1067_v2 = vld [vmem:[%s11018_s22 + $0xca0] sm:$0xff] }
 0x4e7   : > { %7951 = vmatpush1.bf16.msra.mxu1 %v10002_v3  ;;  %7911 = vmatprep.subr.bf16.mxu0 %v10065_v4  ;;  %v1099_v3 = vld [vmem:[%s11018_s22 + $0xda0] sm:$0xff]  ;;  %v1802_v4 = vrot.slane %v11862_v61, %v11067_v52 }
 0x4e8   : > { %7952 = vmatprep.subr.bf16.mxu1 %v10067_v5  ;;  %v1068_v5 = vld [vmem:[%s11018_s22 + $0xca8] sm:$0xff] }
 0x4e9   : > { %v9495_v15 = vcombine.high %v1068_v5, %v1100_v6  ;;  %v9494_v37 = vcombine.low %v1068_v5, %v1100_v6 }
 0x4ea   : > { %7912 = vmatpush1.bf16.msra.mxu0 %v10064_v11  ;;  %v1814_v11 = vrot.slane %v11862_v61, %v11361_v33 }
 0x4eb   : > { %7953 = vmatpush1.bf16.msra.mxu1 %v10066_v12  ;;  %7963 = vmatprep.subr.bf16.mxu0 %v9109_v13  ;;  %v9430_v12 = vcombine.low %v1004_v57, %v1036_v58  ;;  %v9493_v13 = vcombine.high %v1067_v2, %v1099_v3 }
 0x4ec   : > { %8004 = vmatprep.subr.bf16.mxu1 %v9111_v14 }
 0x4ed   : > { %7914 = vmatmul.mubr.bf16.vlgmr.msra.gmra.mrb[40].mxu0 %v11123_v28 }
 0x4ee   : > { %7955 = vmatmul.mubr.bf16.vlgmr.msra.gmra.mrb[40].mxu1 %v11123_v28  ;;  %7964 = vmatpush1.bf16.msra.mxu0 %v9108_v62  ;;  %v1163_v62 = vld [vmem:[%s11018_s22 + $0xfa0] sm:$0xff] }
 0x4ef   : > { %7995 = vmatprep.mubr.bf16.mxu0 %v11121_v27  ;;  %8005 = vmatpush1.bf16.msra.mxu1 %v9110_v20  ;;  %v9557_v7 = vcombine.high %v1131_v59, %v1163_v62  ;;  %v9556_v45 = vcombine.low %v1131_v59, %v1163_v62  ;;  %v1420_v59 = vld [vmem:[%s11018_s22 + $0x17a8] sm:$0xff] }
 0x4f0   : > { %8036 = vmatprep.mubr.bf16.mxu1 %v11121_v27  ;;  %7965 = vmatprep.subr.bf16.mxu0 %v9173_v23  ;;  %v1132_v23 = vld [vmem:[%s11018_s22 + $0xea8] sm:$0xff] }
 0x4f1   : > { %8006 = vmatprep.subr.bf16.mxu1 %v9175_v29  ;;  %v9559_v40 = vcombine.high %v1132_v23, %v1164_v24  ;;  %v9558_v46 = vcombine.low %v1132_v23, %v1164_v24 }
 0x4f2   : > { %7966 = vmatpush1.bf16.msra.mxu0 %v9172_v34  ;;  %v9492_v34 = vcombine.low %v1067_v2, %v1099_v3  ;;  %v1356_v2 = vld [vmem:[%s11018_s22 + $0x15a8] sm:$0xff] }
 0x4f3   : > { %8007 = vmatpush1.bf16.msra.mxu1 %v9174_v35  ;;  %7967 = vmatprep.subr.bf16.mxu0 %v9237_v36 }
 0x4f4   : > { %8008 = vmatprep.subr.bf16.mxu1 %v9239_v51 }
 0x4f6   : > { %7968 = vmatpush1.bf16.msra.mxu0 %v9236_v41  ;;  %v1195_v41 = vld [vmem:[%s11018_s22 + $0x10a0] sm:$0xff] }
 0x4f7   : > { %8009 = vmatpush1.bf16.msra.mxu1 %v9238_v42  ;;  %7969 = vmatprep.subr.bf16.mxu0 %v9301_v43  ;;  %v1227_v42 = vld [vmem:[%s11018_s22 + $0x11a0] sm:$0xff]  ;;  %v1196_v43 = vld [vmem:[%s11018_s22 + $0x10a8] sm:$0xff] }
 0x4f8   : > { %8010 = vmatprep.subr.bf16.mxu1 %v9303_v44  ;;  %v1228_v44 = vld [vmem:[%s11018_s22 + $0x11a8] sm:$0xff]  ;;  %v9621_v56 = vcombine.high %v1195_v41, %v1227_v42  ;;  %v9620_v55 = vcombine.low %v1195_v41, %v1227_v42 }
 0x4f9   : > { %v9623_v47 = vcombine.high %v1196_v43, %v1228_v44  ;;  %v9622_v32 = vcombine.low %v1196_v43, %v1228_v44  ;;  %v1548_v41 = vld [vmem:[%s11018_s22 + $0x1ba8] sm:$0xff] }
 0x4fa   : > { %7970 = vmatpush1.bf16.msra.mxu0 %v9300_v48  ;;  %v1259_v48 = vld [vmem:[%s11018_s22 + $0x12a0] sm:$0xff] }
 0x4fb   : > { %8011 = vmatpush1.bf16.msra.mxu1 %v9302_v49  ;;  %7971 = vmatprep.subr.bf16.mxu0 %v9365_v50  ;;  %v1291_v49 = vld [vmem:[%s11018_s22 + $0x13a0] sm:$0xff]  ;;  %v1260_v50 = vld [vmem:[%s11018_s22 + $0x12a8] sm:$0xff] }
 0x4fc   : > { %8012 = vmatprep.subr.bf16.mxu1 %v9367_v53  ;;  %v1292_v53 = vld [vmem:[%s11018_s22 + $0x13a8] sm:$0xff]  ;;  %v9685_v57 = vcombine.high %v1259_v48, %v1291_v49 }
 0x4fd   : > { %v9687_v58 = vcombine.high %v1260_v50, %v1292_v53  ;;  %v9686_v6 = vcombine.low %v1260_v50, %v1292_v53 }
 0x4fe   : > { %7972 = vmatpush1.bf16.msra.mxu0 %v9364_v60  ;;  %v1323_v60 = vld [vmem:[%s11018_s22 + $0x14a0] sm:$0xff] }
 0x4ff   : > { %8013 = vmatpush1.bf16.msra.mxu1 %v9366_v63  ;;  %7973 = vmatprep.subr.bf16.mxu0 %v9429_v0  ;;  %v1355_v63 = vld [vmem:[%s11018_s22 + $0x15a0] sm:$0xff] }
 0x500   : > { %v7669_v14 = vpop.f32.mrb[28].mxu0  ;;  %8014 = vmatprep.subr.bf16.mxu1 %v9431_v1  ;;  %v1324_v1 = vld [vmem:[%s11018_s22 + $0x14a8] sm:$0xff] }
 0x501   : > { %v7670_v18 = vadd.f32 %v7669_v14, %v1802_v4  ;;  %v7710_v19 = vpop.f32.mrb[28].mxu1  ;;  %v7671_v20 = vpop.f32.mrb[29].mxu0  ;;  %v9684_v4 = vcombine.low %v1259_v48, %v1291_v49  ;;  %v1612_v48 = vld [vmem:[%s11018_s22 + $0x1da8] sm:$0xff] }
 0x502   : > { %v7711_v25 = vadd.f32 %v7710_v19, %v1810_v8  ;;  %v7672_v29 = vadd.f32 %v7671_v20, %v1806_v9  ;;  %v7712_v30 = vpop.f32.mrb[29].mxu1  ;;  %v7673_v31 = vpop.f32.mrb[30].mxu0  ;;  %7974 = vmatpush1.bf16.msra.mxu0 %v9428_v10  ;;  %v9749_v8 = vcombine.high %v1323_v60, %v1355_v63  ;;  %v9750_v20 = vcombine.low %v1324_v1, %v1356_v2 }
 0x503   : > { %10331 = vtanh.f32 %v7670_v18  ;;  %v7713_v35 = vadd.f32 %v7712_v30, %v1814_v11  ;;  %v7714_v36 = vpop.f32.mrb[30].mxu1  ;;  %8015 = vmatpush1.bf16.msra.mxu1 %v9430_v12  ;;  %v7674_v51 = vpop.f32.mrb[31].mxu0  ;;  %7975 = vmatprep.subr.bf16.mxu0 %v9493_v13  ;;  %v9751_v11 = vcombine.high %v1324_v1, %v1356_v2  ;;  %v1387_v12 = vld [vmem:[%s11018_s22 + $0x16a0] sm:$0xff]  ;;  %v9748_v18 = vcombine.low %v1323_v60, %v1355_v63  ;;  %v1452_v31 = vld [vmem:[%s11018_s22 + $0x18a8] sm:$0xff] }
 0x504   : > { %10333 = vtanh.f32 %v7711_v25  ;;  %v7715_v39 = vpop.f32.mrb[31].mxu1  ;;  %8016 = vmatprep.subr.bf16.mxu1 %v9495_v15  ;;  %v1419_v13 = vld [vmem:[%s11018_s22 + $0x17a0] sm:$0xff]  ;;  %v1388_v15 = vld [vmem:[%s11018_s22 + $0x16a8] sm:$0xff] }
 0x505   : > { %10335 = vtanh.f32 %v7672_v29  ;;  %v9813_v23 = vcombine.high %v1387_v12, %v1419_v13  ;;  %v9815_v24 = vcombine.high %v1388_v15, %v1420_v59  ;;  %v1451_v25 = vld [vmem:[%s11018_s22 + $0x18a0] sm:$0xff]  ;;  %v9814_v36 = vcombine.low %v1388_v15, %v1420_v59  ;;  %v1676_v60 = vld [vmem:[%s11018_s22 + $0x1fa8] sm:$0xff]  ;;  %v750_v15 = vld [vmem:[%s11018_s22 + $0x2b8] sm:$0xff] }
 0x506   : > { %10337 = vtanh.f32 %v7713_v35  ;;  %7976 = vmatpush1.bf16.msra.mxu0 %v9492_v34  ;;  %v1483_v29 = vld [vmem:[%s11018_s22 + $0x19a0] sm:$0xff]  ;;  %v1484_v34 = vld [vmem:[%s11018_s22 + $0x19a8] sm:$0xff]  ;;  %v9812_v35 = vcombine.low %v1387_v12, %v1419_v13  ;;  %v749_v12 = vld [vmem:[%s11018_s22 + $0x2b0] sm:$0xff] }
 0x507   : > { %8017 = vmatpush1.bf16.msra.mxu1 %v9494_v37  ;;  %7977 = vmatprep.subr.bf16.mxu0 %v9557_v7  ;;  %v9877_v51 = vcombine.high %v1451_v25, %v1483_v29  ;;  %v9879_v37 = vcombine.high %v1452_v31, %v1484_v34  ;;  %v1515_v7 = vld [vmem:[%s11018_s22 + $0x1aa0] sm:$0xff]  ;;  %v9876_v42 = vcombine.low %v1451_v25, %v1483_v29  ;;  %v781_v13 = vld [vmem:[%s11018_s22 + $0x3b0] sm:$0xff]  ;;  %v782_v59 = vld [vmem:[%s11018_s22 + $0x3b8] sm:$0xff] }
 0x508   : > { %8018 = vmatprep.subr.bf16.mxu1 %v9559_v40  ;;  %v1547_v39 = vld [vmem:[%s11018_s22 + $0x1ba0] sm:$0xff]  ;;  %v1516_v40 = vld [vmem:[%s11018_s22 + $0x1aa8] sm:$0xff]  ;;  %v9878_v43 = vcombine.low %v1452_v31, %v1484_v34  ;;  %v846_v25 = vld [vmem:[%s11018_s22 + $0x5b8] sm:$0xff]  ;;  %v9176_v29 = vcombine.low %v749_v12, %v781_v13 }
 0x509   : > { %v9941_v44 = vcombine.high %v1515_v7, %v1547_v39  ;;  %v9940_v49 = vcombine.low %v1515_v7, %v1547_v39  ;;  %v9942_v50 = vcombine.low %v1516_v40, %v1548_v41 }
 0x50a   : > { %7978 = vmatpush1.bf16.msra.mxu0 %v9556_v45  ;;  %v9943_v45 = vcombine.high %v1516_v40, %v1548_v41 }
 0x50b   : > { %8019 = vmatpush1.bf16.msra.mxu1 %v9558_v46  ;;  %7979 = vmatprep.subr.bf16.mxu0 %v9621_v56  ;;  %v1579_v46 = vld [vmem:[%s11018_s22 + $0x1ca0] sm:$0xff] }
 0x50c   : > { %8020 = vmatprep.subr.bf16.mxu1 %v9623_v47  ;;  %v1611_v56 = vld [vmem:[%s11018_s22 + $0x1da0] sm:$0xff]  ;;  %v1580_v47 = vld [vmem:[%s11018_s22 + $0x1ca8] sm:$0xff] }
 0x50d   : > { %v10332_v0 = vpop.eup %10331  ;;  %v10005_v53 = vcombine.high %v1579_v46, %v1611_v56  ;;  %v10004_v63 = vcombine.low %v1579_v46, %v1611_v56 }
 0x50e   : > { %v10334_v3 = vpop.eup %10333  ;;  %7980 = vmatpush1.bf16.msra.mxu0 %v9620_v55  ;;  %v10007_v55 = vcombine.high %v1580_v47, %v1612_v48 }
 0x50f   : > { %v10336_v5 = vpop.eup %10335  ;;  %8021 = vmatpush1.bf16.msra.mxu1 %v9622_v32  ;;  %7981 = vmatprep.subr.bf16.mxu0 %v9685_v57  ;;  %v1643_v32 = vld [vmem:[%s11018_s22 + $0x1ea0] sm:$0xff] }
 0x510   : > { %v10338_v9 = vpop.eup %10337  ;;  %v8685_v10 = vcombine.low %v10332_v0, %v10336_v5  ;;  %8022 = vmatprep.subr.bf16.mxu1 %v9687_v58  ;;  %v1675_v57 = vld [vmem:[%s11018_s22 + $0x1fa0] sm:$0xff]  ;;  %v1644_v58 = vld [vmem:[%s11018_s22 + $0x1ea8] sm:$0xff]  ;;  %v10006_v0 = vcombine.low %v1580_v47, %v1612_v48  ;;  %v686_v5 = vld [vmem:[%s11018_s22 + $0xb8] sm:$0xff] }
 0x511   : > { %v8686_v14 = vcombine.low %v10334_v3, %v10338_v9  ;;  %v10069_v1 = vcombine.high %v1643_v32, %v1675_v57  ;;  %v10071_v2 = vcombine.high %v1644_v58, %v1676_v60  ;;  %v685_v3 = vld [vmem:[%s11018_s22 + $0xb0] sm:$0xff]  ;;  %v10070_v9 = vcombine.low %v1644_v58, %v1676_v60 }
 0x512   : > { %v8693_v62 = vrot.slane %v8685_v10, %v11392_v38  ;;  %7982 = vmatpush1.bf16.msra.mxu0 %v9684_v4  ;;  %v717_v4 = vld [vmem:[%s11018_s22 + $0x1b0] sm:$0xff] }
 0x513   : > { %v8700_v19 = vrot.slane %v8686_v14, %v11392_v38  ;;  %8023 = vmatpush1.bf16.msra.mxu1 %v9686_v6  ;;  %7983 = vmatprep.subr.bf16.mxu0 %v9749_v8  ;;  %v718_v6 = vld [vmem:[%s11018_s22 + $0x1b8] sm:$0xff]  ;;  %v10068_v8 = vcombine.low %v1643_v32, %v1675_v57  ;;  %v9113_v10 = vcombine.high %v685_v3, %v717_v4 }
 0x514   : > { %8024 = vmatprep.subr.bf16.mxu1 %v9751_v11  ;;  %v9115_v11 = vcombine.high %v686_v5, %v718_v6  ;;  %v9112_v14 = vcombine.low %v685_v3, %v717_v4  ;;  %v1102_v3 = vld [vmem:[%s11018_s22 + $0xdb8] sm:$0xff]  ;;  %v1826_v4 = vrot.slane %v11862_v61, %v11450_v17 }
 0x515   : > { %v8701_v30 = vcombine.low %v8693_v62, %v8700_v19  ;;  %v9114_v62 = vcombine.low %v686_v5, %v718_v6  ;;  %v813_v19 = vld [vmem:[%s11018_s22 + $0x4b0] sm:$0xff]  ;;  %v1822_v5 = vrot.slane %v11862_v61, %v11455_v21 }
 0x516   : > { %7984 = vmatpush1.bf16.msra.mxu0 %v9748_v18  ;;  %v9177_v18 = vcombine.high %v749_v12, %v781_v13  ;;  %v1133_v13 = vld [vmem:[%s11018_s22 + $0xeb0] sm:$0xff] }
 0x517   : > { %8877 = vst [vmem:[%s11405_s24 + $0x30] sm:$0xff] %v8701_v30  ;;  %8025 = vmatpush1.bf16.msra.mxu1 %v9750_v20  ;;  %7985 = vmatprep.subr.bf16.mxu0 %v9813_v23  ;;  %v845_v20 = vld [vmem:[%s11018_s22 + $0x5b0] sm:$0xff]  ;;  %v9179_v23 = vcombine.high %v750_v15, %v782_v59  ;;  %v9178_v30 = vcombine.low %v750_v15, %v782_v59 }
 0x518   : > { %8026 = vmatprep.subr.bf16.mxu1 %v9815_v24  ;;  %v814_v24 = vld [vmem:[%s11018_s22 + $0x4b8] sm:$0xff]  ;;  %v9241_v31 = vcombine.high %v813_v19, %v845_v20  ;;  %v9240_v7 = vcombine.low %v813_v19, %v845_v20 }
 0x519   : > { %v9243_v34 = vcombine.high %v814_v24, %v846_v25  ;;  %v9242_v39 = vcombine.low %v814_v24, %v846_v25  ;;  %v1166_v19 = vld [vmem:[%s11018_s22 + $0xfb8] sm:$0xff] }
 0x51a   : > { %7986 = vmatpush1.bf16.msra.mxu0 %v9812_v35  ;;  %v877_v35 = vld [vmem:[%s11018_s22 + $0x6b0] sm:$0xff] }
 0x51b   : > { %8027 = vmatpush1.bf16.msra.mxu1 %v9814_v36  ;;  %7987 = vmatprep.subr.bf16.mxu0 %v9877_v51  ;;  %v909_v36 = vld [vmem:[%s11018_s22 + $0x7b0] sm:$0xff]  ;;  %v878_v51 = vld [vmem:[%s11018_s22 + $0x6b8] sm:$0xff] }
 0x51c   : > { %8028 = vmatprep.subr.bf16.mxu1 %v9879_v37  ;;  %v910_v37 = vld [vmem:[%s11018_s22 + $0x7b8] sm:$0xff]  ;;  %v9305_v40 = vcombine.high %v877_v35, %v909_v36  ;;  %v9304_v46 = vcombine.low %v877_v35, %v909_v36 }
 0x51d   : > { %v9307_v41 = vcombine.high %v878_v51, %v910_v37  ;;  %v9306_v56 = vcombine.low %v878_v51, %v910_v37  ;;  %v1197_v37 = vld [vmem:[%s11018_s22 + $0x10b0] sm:$0xff] }
 0x51e   : > { %7988 = vmatpush1.bf16.msra.mxu0 %v9876_v42  ;;  %v941_v42 = vld [vmem:[%s11018_s22 + $0x8b0] sm:$0xff] }
 0x51f   : > { %8029 = vmatpush1.bf16.msra.mxu1 %v9878_v43  ;;  %7989 = vmatprep.subr.bf16.mxu0 %v9941_v44  ;;  %v973_v43 = vld [vmem:[%s11018_s22 + $0x9b0] sm:$0xff]  ;;  %v942_v44 = vld [vmem:[%s11018_s22 + $0x8b8] sm:$0xff] }
 0x520   : > { %8030 = vmatprep.subr.bf16.mxu1 %v9943_v45  ;;  %v974_v45 = vld [vmem:[%s11018_s22 + $0x9b8] sm:$0xff]  ;;  %v9369_v47 = vcombine.high %v941_v42, %v973_v43  ;;  %v9368_v32 = vcombine.low %v941_v42, %v973_v43 }
 0x521   : > { %v9371_v48 = vcombine.high %v942_v44, %v974_v45  ;;  %v9370_v57 = vcombine.low %v942_v44, %v974_v45  ;;  %v1261_v45 = vld [vmem:[%s11018_s22 + $0x12b0] sm:$0xff] }
 0x522   : > { %7990 = vmatpush1.bf16.msra.mxu0 %v9940_v49  ;;  %v1005_v49 = vld [vmem:[%s11018_s22 + $0xab0] sm:$0xff] }
 0x523   : > { %8031 = vmatpush1.bf16.msra.mxu1 %v9942_v50  ;;  %7991 = vmatprep.subr.bf16.mxu0 %v10005_v53  ;;  %v1037_v50 = vld [vmem:[%s11018_s22 + $0xbb0] sm:$0xff]  ;;  %v1006_v53 = vld [vmem:[%s11018_s22 + $0xab8] sm:$0xff] }
 0x524   : > { %8032 = vmatprep.subr.bf16.mxu1 %v10007_v55  ;;  %v1038_v55 = vld [vmem:[%s11018_s22 + $0xbb8] sm:$0xff]  ;;  %v9433_v58 = vcombine.high %v1005_v49, %v1037_v50  ;;  %v9432_v6 = vcombine.low %v1005_v49, %v1037_v50 }
 0x525   : > { %v9435_v60 = vcombine.high %v1006_v53, %v1038_v55 }
 0x526   : > { %7992 = vmatpush1.bf16.msra.mxu0 %v10004_v63  ;;  %v1069_v63 = vld [vmem:[%s11018_s22 + $0xcb0] sm:$0xff] }
 0x527   : > { %8033 = vmatpush1.bf16.msra.mxu1 %v10006_v0  ;;  %7993 = vmatprep.subr.bf16.mxu0 %v10069_v1  ;;  %v1101_v0 = vld [vmem:[%s11018_s22 + $0xdb0] sm:$0xff]  ;;  %v1818_v1 = vrot.slane %v11862_v61, %v11447_v16 }
 0x528   : > { %8034 = vmatprep.subr.bf16.mxu1 %v10071_v2  ;;  %v1070_v2 = vld [vmem:[%s11018_s22 + $0xcb8] sm:$0xff] }
 0x529   : > { %v9499_v12 = vcombine.high %v1070_v2, %v1102_v3 }
 0x52a   : > { %7994 = vmatpush1.bf16.msra.mxu0 %v10068_v8  ;;  %v1830_v8 = vrot.slane %v11862_v61, %v11458_v22  ;;  %v9496_v61 = vcombine.low %v1069_v63, %v1101_v0 }
 0x52b   : > { %8035 = vmatpush1.bf16.msra.mxu1 %v10070_v9  ;;  %8045 = vmatprep.subr.bf16.mxu0 %v9113_v10  ;;  %v9434_v9 = vcombine.low %v1006_v53, %v1038_v55  ;;  %v9497_v10 = vcombine.high %v1069_v63, %v1101_v0  ;;  %v1325_v55 = vld [vmem:[%s11018_s22 + $0x14b0] sm:$0xff] }
 0x52c   : > { %8086 = vmatprep.subr.bf16.mxu1 %v9115_v11 }
 0x52d   : > { %7996 = vmatmul.mubr.bf16.vlgmr.msra.gmra.mrb[44].mxu0 %v11123_v28 }
 0x52e   : > { %8037 = vmatmul.mubr.bf16.vlgmr.msra.gmra.mrb[44].mxu1 %v11123_v28  ;;  %8046 = vmatpush1.bf16.msra.mxu0 %v9112_v14  ;;  %v1165_v14 = vld [vmem:[%s11018_s22 + $0xfb0] sm:$0xff] }
 0x52f   : > { %8077 = vmatprep.mubr.bf16.mxu0 %v11121_v27  ;;  %8087 = vmatpush1.bf16.msra.mxu1 %v9114_v62  ;;  %v9561_v35 = vcombine.high %v1133_v13, %v1165_v14 }
 0x530   : > { %8118 = vmatprep.mubr.bf16.mxu1 %v11121_v27  ;;  %8047 = vmatprep.subr.bf16.mxu0 %v9177_v18  ;;  %v1134_v18 = vld [vmem:[%s11018_s22 + $0xeb8] sm:$0xff] }
 0x531   : > { %8088 = vmatprep.subr.bf16.mxu1 %v9179_v23  ;;  %v9563_v51 = vcombine.high %v1134_v18, %v1166_v19  ;;  %v9562_v42 = vcombine.low %v1134_v18, %v1166_v19  ;;  %v1453_v19 = vld [vmem:[%s11018_s22 + $0x18b0] sm:$0xff] }
 0x532   : > { %8048 = vmatpush1.bf16.msra.mxu0 %v9176_v29 }
 0x533   : > { %8089 = vmatpush1.bf16.msra.mxu1 %v9178_v30  ;;  %8049 = vmatprep.subr.bf16.mxu0 %v9241_v31 }
 0x534   : > { %8090 = vmatprep.subr.bf16.mxu1 %v9243_v34  ;;  %v9498_v34 = vcombine.low %v1070_v2, %v1102_v3 }
 0x536   : > { %8050 = vmatpush1.bf16.msra.mxu0 %v9240_v7  ;;  %v1229_v7 = vld [vmem:[%s11018_s22 + $0x11b0] sm:$0xff] }
 0x537   : > { %8091 = vmatpush1.bf16.msra.mxu1 %v9242_v39  ;;  %8051 = vmatprep.subr.bf16.mxu0 %v9305_v40  ;;  %v1198_v39 = vld [vmem:[%s11018_s22 + $0x10b8] sm:$0xff]  ;;  %v9625_v43 = vcombine.high %v1197_v37, %v1229_v7 }
 0x538   : > { %8092 = vmatprep.subr.bf16.mxu1 %v9307_v41  ;;  %v1230_v40 = vld [vmem:[%s11018_s22 + $0x11b8] sm:$0xff]  ;;  %v9560_v41 = vcombine.low %v1133_v13, %v1165_v14 }
 0x539   : > { %v9627_v44 = vcombine.high %v1198_v39, %v1230_v40  ;;  %v9626_v49 = vcombine.low %v1198_v39, %v1230_v40 }
 0x53a   : > { %8052 = vmatpush1.bf16.msra.mxu0 %v9304_v46  ;;  %v1293_v46 = vld [vmem:[%s11018_s22 + $0x13b0] sm:$0xff] }
 0x53b   : > { %8093 = vmatpush1.bf16.msra.mxu1 %v9306_v56  ;;  %8053 = vmatprep.subr.bf16.mxu0 %v9369_v47  ;;  %v1262_v56 = vld [vmem:[%s11018_s22 + $0x12b8] sm:$0xff]  ;;  %v9689_v50 = vcombine.high %v1261_v45, %v1293_v46  ;;  %v9688_v0 = vcombine.low %v1261_v45, %v1293_v46 }
 0x53c   : > { %8094 = vmatprep.subr.bf16.mxu1 %v9371_v48  ;;  %v1294_v47 = vld [vmem:[%s11018_s22 + $0x13b8] sm:$0xff]  ;;  %v9624_v48 = vcombine.low %v1197_v37, %v1229_v7 }
 0x53d   : > { %v9691_v53 = vcombine.high %v1262_v56, %v1294_v47  ;;  %v9690_v2 = vcombine.low %v1262_v56, %v1294_v47 }
 0x53e   : > { %8054 = vmatpush1.bf16.msra.mxu0 %v9368_v32  ;;  %v1357_v32 = vld [vmem:[%s11018_s22 + $0x15b0] sm:$0xff] }
 0x53f   : > { %8095 = vmatpush1.bf16.msra.mxu1 %v9370_v57  ;;  %8055 = vmatprep.subr.bf16.mxu0 %v9433_v58  ;;  %v1326_v58 = vld [vmem:[%s11018_s22 + $0x14b8] sm:$0xff]  ;;  %v9753_v3 = vcombine.high %v1325_v55, %v1357_v32  ;;  %v9752_v14 = vcombine.low %v1325_v55, %v1357_v32 }
 0x540   : > { %v7751_v11 = vpop.f32.mrb[32].mxu0  ;;  %8096 = vmatprep.subr.bf16.mxu1 %v9435_v60  ;;  %v1358_v60 = vld [vmem:[%s11018_s22 + $0x15b8] sm:$0xff] }
 0x541   : > { %v7752_v15 = vadd.f32 %v7751_v11, %v1818_v1  ;;  %v7792_v59 = vpop.f32.mrb[32].mxu1  ;;  %v7753_v62 = vpop.f32.mrb[33].mxu0  ;;  %v1390_v11 = vld [vmem:[%s11018_s22 + $0x16b8] sm:$0xff] }
 0x542   : > { %v7793_v20 = vadd.f32 %v7792_v59, %v1826_v4  ;;  %v7754_v23 = vadd.f32 %v7753_v62, %v1822_v5  ;;  %v7794_v24 = vpop.f32.mrb[33].mxu1  ;;  %v7755_v25 = vpop.f32.mrb[34].mxu0  ;;  %8056 = vmatpush1.bf16.msra.mxu0 %v9432_v6  ;;  %v9755_v6 = vcombine.high %v1326_v58, %v1358_v60  ;;  %v9754_v59 = vcombine.low %v1326_v58, %v1358_v60  ;;  %v687_v60 = vld [vmem:[%s11018_s22 + $0xc0] sm:$0xff] }
 0x543   : > { %10339 = vtanh.f32 %v7752_v15  ;;  %v7795_v29 = vadd.f32 %v7794_v24, %v1830_v8  ;;  %v7796_v30 = vpop.f32.mrb[34].mxu1  ;;  %8097 = vmatpush1.bf16.msra.mxu1 %v9434_v9  ;;  %v7756_v31 = vpop.f32.mrb[35].mxu0  ;;  %8057 = vmatprep.subr.bf16.mxu0 %v9497_v10  ;;  %v1389_v8 = vld [vmem:[%s11018_s22 + $0x16b0] sm:$0xff]  ;;  %v1454_v24 = vld [vmem:[%s11018_s22 + $0x18b8] sm:$0xff] }
 0x544   : > { %10341 = vtanh.f32 %v7793_v20  ;;  %v7797_v36 = vpop.f32.mrb[35].mxu1  ;;  %8098 = vmatprep.subr.bf16.mxu1 %v9499_v12  ;;  %v1421_v9 = vld [vmem:[%s11018_s22 + $0x17b0] sm:$0xff]  ;;  %v1422_v12 = vld [vmem:[%s11018_s22 + $0x17b8] sm:$0xff] }
 0x545   : > { %10343 = vtanh.f32 %v7754_v23  ;;  %v9817_v62 = vcombine.high %v1389_v8, %v1421_v9  ;;  %v9819_v18 = vcombine.high %v1390_v11, %v1422_v12  ;;  %v1485_v20 = vld [vmem:[%s11018_s22 + $0x19b0] sm:$0xff]  ;;  %v1486_v25 = vld [vmem:[%s11018_s22 + $0x19b8] sm:$0xff] }
 0x546   : > { %10345 = vtanh.f32 %v7795_v29  ;;  %8058 = vmatpush1.bf16.msra.mxu0 %v9496_v61  ;;  %v9816_v61 = vcombine.low %v1389_v8, %v1421_v9  ;;  %v9818_v29 = vcombine.low %v1390_v11, %v1422_v12  ;;  %v9881_v30 = vcombine.high %v1453_v19, %v1485_v20  ;;  %v1518_v36 = vld [vmem:[%s11018_s22 + $0x1ab8] sm:$0xff]  ;;  %v783_v8 = vld [vmem:[%s11018_s22 + $0x3c0] sm:$0xff]  ;;  %v784_v11 = vld [vmem:[%s11018_s22 + $0x3c8] sm:$0xff] }
 0x547   : > { %8099 = vmatpush1.bf16.msra.mxu1 %v9498_v34  ;;  %8059 = vmatprep.subr.bf16.mxu0 %v9561_v35  ;;  %v9883_v31 = vcombine.high %v1454_v24, %v1486_v25  ;;  %v1517_v34 = vld [vmem:[%s11018_s22 + $0x1ab0] sm:$0xff]  ;;  %v9880_v37 = vcombine.low %v1453_v19, %v1485_v20  ;;  %v9882_v7 = vcombine.low %v1454_v24, %v1486_v25  ;;  %v879_v25 = vld [vmem:[%s11018_s22 + $0x6c0] sm:$0xff] }
 0x548   : > { %8100 = vmatprep.subr.bf16.mxu1 %v9563_v51  ;;  %v1549_v35 = vld [vmem:[%s11018_s22 + $0x1bb0] sm:$0xff]  ;;  %v1550_v51 = vld [vmem:[%s11018_s22 + $0x1bb8] sm:$0xff] }
 0x549   : > { %v9945_v39 = vcombine.high %v1517_v34, %v1549_v35  ;;  %v9947_v40 = vcombine.high %v1518_v36, %v1550_v51  ;;  %v9944_v45 = vcombine.low %v1517_v34, %v1549_v35  ;;  %v9946_v46 = vcombine.low %v1518_v36, %v1550_v51  ;;  %v943_v51 = vld [vmem:[%s11018_s22 + $0x8c0] sm:$0xff] }
 0x54a   : > { %8060 = vmatpush1.bf16.msra.mxu0 %v9560_v41  ;;  %v1581_v41 = vld [vmem:[%s11018_s22 + $0x1cb0] sm:$0xff] }
 0x54b   : > { %8101 = vmatpush1.bf16.msra.mxu1 %v9562_v42  ;;  %8061 = vmatprep.subr.bf16.mxu0 %v9625_v43  ;;  %v1613_v42 = vld [vmem:[%s11018_s22 + $0x1db0] sm:$0xff]  ;;  %v1582_v43 = vld [vmem:[%s11018_s22 + $0x1cb8] sm:$0xff] }
 0x54c   : > { %8102 = vmatprep.subr.bf16.mxu1 %v9627_v44  ;;  %v1614_v44 = vld [vmem:[%s11018_s22 + $0x1db8] sm:$0xff]  ;;  %v10009_v56 = vcombine.high %v1581_v41, %v1613_v42  ;;  %v10008_v55 = vcombine.low %v1581_v41, %v1613_v42 }
 0x54d   : > { %v10340_v57 = vpop.eup %10339  ;;  %v10011_v47 = vcombine.high %v1582_v43, %v1614_v44  ;;  %v10010_v32 = vcombine.low %v1582_v43, %v1614_v44  ;;  %v1007_v44 = vld [vmem:[%s11018_s22 + $0xac0] sm:$0xff] }
 0x54e   : > { %v10342_v63 = vpop.eup %10341  ;;  %8062 = vmatpush1.bf16.msra.mxu0 %v9624_v48  ;;  %v1645_v48 = vld [vmem:[%s11018_s22 + $0x1eb0] sm:$0xff] }
 0x54f   : > { %v10344_v1 = vpop.eup %10343  ;;  %8103 = vmatpush1.bf16.msra.mxu1 %v9626_v49  ;;  %8063 = vmatprep.subr.bf16.mxu0 %v9689_v50  ;;  %v1677_v49 = vld [vmem:[%s11018_s22 + $0x1fb0] sm:$0xff]  ;;  %v1646_v50 = vld [vmem:[%s11018_s22 + $0x1eb8] sm:$0xff] }
 0x550   : > { %v10346_v4 = vpop.eup %10345  ;;  %v8702_v5 = vcombine.low %v10340_v57, %v10344_v1  ;;  %8104 = vmatprep.subr.bf16.mxu1 %v9691_v53  ;;  %v1678_v53 = vld [vmem:[%s11018_s22 + $0x1fb8] sm:$0xff]  ;;  %v10073_v57 = vcombine.high %v1645_v48, %v1677_v49  ;;  %v720_v1 = vld [vmem:[%s11018_s22 + $0x1c8] sm:$0xff] }
 0x551   : > { %v8703_v10 = vcombine.low %v10342_v63, %v10346_v4  ;;  %v10075_v58 = vcombine.high %v1646_v50, %v1678_v53  ;;  %v719_v63 = vld [vmem:[%s11018_s22 + $0x1c0] sm:$0xff] }
 0x552   : > { %v8710_v13 = vrot.slane %v8702_v5, %v11392_v38  ;;  %8064 = vmatpush1.bf16.msra.mxu0 %v9688_v0  ;;  %v688_v0 = vld [vmem:[%s11018_s22 + $0xc8] sm:$0xff]  ;;  %v9117_v4 = vcombine.high %v687_v60, %v719_v63  ;;  %v9116_v9 = vcombine.low %v687_v60, %v719_v63 }
 0x553   : > { %v8717_v15 = vrot.slane %v8703_v10, %v11392_v38  ;;  %8105 = vmatpush1.bf16.msra.mxu1 %v9690_v2  ;;  %8065 = vmatprep.subr.bf16.mxu0 %v9753_v3  ;;  %v10072_v2 = vcombine.low %v1645_v48, %v1677_v49  ;;  %v10074_v3 = vcombine.low %v1646_v50, %v1678_v53  ;;  %v752_v10 = vld [vmem:[%s11018_s22 + $0x2c8] sm:$0xff]  ;;  %v12023_v48 = vld [vmem:[%s11355_s9 + $0x20] sm:$0xff] }
 0x554   : > { %8106 = vmatprep.subr.bf16.mxu1 %v9755_v6  ;;  %v9119_v5 = vcombine.high %v688_v0, %v720_v1  ;;  %v751_v6 = vld [vmem:[%s11018_s22 + $0x2c0] sm:$0xff]  ;;  %v9118_v12 = vcombine.low %v688_v0, %v720_v1  ;;  %v9182_v20 = vcombine.low %v752_v10, %v784_v11  ;;  %v1104_v60 = vld [vmem:[%s11018_s22 + $0xdc8] sm:$0xff]  ;;  %v1842_v63 = vrot.slane %v12023_v48, %v11351_v26 }
 0x555   : > { %v8718_v23 = vcombine.low %v8710_v13, %v8717_v15  ;;  %v9181_v13 = vcombine.high %v751_v6, %v783_v8  ;;  %v847_v15 = vld [vmem:[%s11018_s22 + $0x5c0] sm:$0xff]  ;;  %v9180_v19 = vcombine.low %v751_v6, %v783_v8  ;;  %v1838_v0 = vrot.slane %v12023_v48, %v11070_v54 }
 0x556   : > { %8066 = vmatpush1.bf16.msra.mxu0 %v9752_v14  ;;  %v815_v14 = vld [vmem:[%s11018_s22 + $0x4c0] sm:$0xff] }
 0x557   : > { %8878 = vst [vmem:[%s11405_s24 + $0x38] sm:$0xff] %v8718_v23  ;;  %8107 = vmatpush1.bf16.msra.mxu1 %v9754_v59  ;;  %8067 = vmatprep.subr.bf16.mxu0 %v9817_v62  ;;  %v9183_v59 = vcombine.high %v752_v10, %v784_v11  ;;  %v816_v62 = vld [vmem:[%s11018_s22 + $0x4c8] sm:$0xff]  ;;  %v9245_v23 = vcombine.high %v815_v14, %v847_v15  ;;  %v1135_v8 = vld [vmem:[%s11018_s22 + $0xec0] sm:$0xff] }
 0x558   : > { %8108 = vmatprep.subr.bf16.mxu1 %v9819_v18  ;;  %v848_v18 = vld [vmem:[%s11018_s22 + $0x5c8] sm:$0xff] }
 0x559   : > { %v9247_v24 = vcombine.high %v816_v62, %v848_v18  ;;  %v9246_v34 = vcombine.low %v816_v62, %v848_v18 }
 0x55a   : > { %8068 = vmatpush1.bf16.msra.mxu0 %v9816_v61  ;;  %v911_v61 = vld [vmem:[%s11018_s22 + $0x7c0] sm:$0xff] }
 0x55b   : > { %8109 = vmatpush1.bf16.msra.mxu1 %v9818_v29  ;;  %8069 = vmatprep.subr.bf16.mxu0 %v9881_v30  ;;  %v880_v29 = vld [vmem:[%s11018_s22 + $0x6c8] sm:$0xff]  ;;  %v9309_v35 = vcombine.high %v879_v25, %v911_v61 }
 0x55c   : > { %8110 = vmatprep.subr.bf16.mxu1 %v9883_v31  ;;  %v912_v30 = vld [vmem:[%s11018_s22 + $0x7c8] sm:$0xff]  ;;  %v9244_v31 = vcombine.low %v815_v14, %v847_v15 }
 0x55d   : > { %v9311_v36 = vcombine.high %v880_v29, %v912_v30  ;;  %v9310_v41 = vcombine.low %v880_v29, %v912_v30  ;;  %v1168_v14 = vld [vmem:[%s11018_s22 + $0xfc8] sm:$0xff] }
 0x55e   : > { %8070 = vmatpush1.bf16.msra.mxu0 %v9880_v37  ;;  %v975_v37 = vld [vmem:[%s11018_s22 + $0x9c0] sm:$0xff] }
 0x55f   : > { %8111 = vmatpush1.bf16.msra.mxu1 %v9882_v7  ;;  %8071 = vmatprep.subr.bf16.mxu0 %v9945_v39  ;;  %v944_v7 = vld [vmem:[%s11018_s22 + $0x8c8] sm:$0xff]  ;;  %v9373_v42 = vcombine.high %v943_v51, %v975_v37 }
 0x560   : > { %8112 = vmatprep.subr.bf16.mxu1 %v9947_v40  ;;  %v976_v39 = vld [vmem:[%s11018_s22 + $0x9c8] sm:$0xff]  ;;  %v9308_v40 = vcombine.low %v879_v25, %v911_v61 }
 0x561   : > { %v9375_v43 = vcombine.high %v944_v7, %v976_v39  ;;  %v9374_v49 = vcombine.low %v944_v7, %v976_v39 }
 0x562   : > { %8072 = vmatpush1.bf16.msra.mxu0 %v9944_v45  ;;  %v1039_v45 = vld [vmem:[%s11018_s22 + $0xbc0] sm:$0xff] }
 0x563   : > { %8113 = vmatpush1.bf16.msra.mxu1 %v9946_v46  ;;  %8073 = vmatprep.subr.bf16.mxu0 %v10009_v56  ;;  %v1008_v46 = vld [vmem:[%s11018_s22 + $0xac8] sm:$0xff]  ;;  %v9437_v50 = vcombine.high %v1007_v44, %v1039_v45  ;;  %v9436_v1 = vcombine.low %v1007_v44, %v1039_v45 }
 0x564   : > { %8114 = vmatprep.subr.bf16.mxu1 %v10011_v47  ;;  %v1040_v56 = vld [vmem:[%s11018_s22 + $0xbc8] sm:$0xff]  ;;  %v9372_v47 = vcombine.low %v943_v51, %v975_v37 }
 0x565   : > { %v9439_v53 = vcombine.high %v1008_v46, %v1040_v56 }
 0x566   : > { %8074 = vmatpush1.bf16.msra.mxu0 %v10008_v55  ;;  %v1071_v55 = vld [vmem:[%s11018_s22 + $0xcc0] sm:$0xff] }
 0x567   : > { %8115 = vmatpush1.bf16.msra.mxu1 %v10010_v32  ;;  %8075 = vmatprep.subr.bf16.mxu0 %v10073_v57  ;;  %v1103_v32 = vld [vmem:[%s11018_s22 + $0xdc0] sm:$0xff]  ;;  %v1834_v57 = vrot.slane %v12023_v48, %v11067_v52 }
 0x568   : > { %8116 = vmatprep.subr.bf16.mxu1 %v10075_v58  ;;  %v1072_v58 = vld [vmem:[%s11018_s22 + $0xcc8] sm:$0xff] }
 0x569   : > { %v9503_v6 = vcombine.high %v1072_v58, %v1104_v60  ;;  %v9502_v25 = vcombine.low %v1072_v58, %v1104_v60 }
 0x56a   : > { %8076 = vmatpush1.bf16.msra.mxu0 %v10072_v2  ;;  %v1846_v2 = vrot.slane %v12023_v48, %v11361_v33 }
 0x56b   : > { %8117 = vmatpush1.bf16.msra.mxu1 %v10074_v3  ;;  %8127 = vmatprep.subr.bf16.mxu0 %v9117_v4  ;;  %v9438_v3 = vcombine.low %v1008_v46, %v1040_v56  ;;  %v9501_v4 = vcombine.high %v1071_v55, %v1103_v32 }
 0x56c   : > { %8168 = vmatprep.subr.bf16.mxu1 %v9119_v5 }
 0x56d   : > { %8078 = vmatmul.mubr.bf16.vlgmr.msra.gmra.mrb[48].mxu0 %v11123_v28 }
 0x56e   : > { %8119 = vmatmul.mubr.bf16.vlgmr.msra.gmra.mrb[48].mxu1 %v11123_v28  ;;  %8128 = vmatpush1.bf16.msra.mxu0 %v9116_v9  ;;  %v1167_v9 = vld [vmem:[%s11018_s22 + $0xfc0] sm:$0xff] }
 0x56f   : > { %8159 = vmatprep.mubr.bf16.mxu0 %v11121_v27  ;;  %8169 = vmatpush1.bf16.msra.mxu1 %v9118_v12  ;;  %v9565_v61 = vcombine.high %v1135_v8, %v1167_v9  ;;  %v9564_v51 = vcombine.low %v1135_v8, %v1167_v9  ;;  %v1424_v8 = vld [vmem:[%s11018_s22 + $0x17c8] sm:$0xff] }
 0x570   : > { %8200 = vmatprep.mubr.bf16.mxu1 %v11121_v27  ;;  %8129 = vmatprep.subr.bf16.mxu0 %v9181_v13  ;;  %v1136_v13 = vld [vmem:[%s11018_s22 + $0xec8] sm:$0xff] }
 0x571   : > { %8170 = vmatprep.subr.bf16.mxu1 %v9183_v59  ;;  %v9567_v30 = vcombine.high %v1136_v13, %v1168_v14  ;;  %v9566_v37 = vcombine.low %v1136_v13, %v1168_v14 }
 0x572   : > { %8130 = vmatpush1.bf16.msra.mxu0 %v9180_v19  ;;  %v9500_v19 = vcombine.low %v1071_v55, %v1103_v32  ;;  %v1360_v55 = vld [vmem:[%s11018_s22 + $0x15c8] sm:$0xff] }
 0x573   : > { %8171 = vmatpush1.bf16.msra.mxu1 %v9182_v20  ;;  %8131 = vmatprep.subr.bf16.mxu0 %v9245_v23 }
 0x574   : > { %8172 = vmatprep.subr.bf16.mxu1 %v9247_v24 }
 0x576   : > { %8132 = vmatpush1.bf16.msra.mxu0 %v9244_v31  ;;  %v1199_v31 = vld [vmem:[%s11018_s22 + $0x10c0] sm:$0xff] }
 0x577   : > { %8173 = vmatpush1.bf16.msra.mxu1 %v9246_v34  ;;  %8133 = vmatprep.subr.bf16.mxu0 %v9309_v35  ;;  %v1231_v34 = vld [vmem:[%s11018_s22 + $0x11c0] sm:$0xff]  ;;  %v1200_v35 = vld [vmem:[%s11018_s22 + $0x10c8] sm:$0xff] }
 0x578   : > { %8174 = vmatprep.subr.bf16.mxu1 %v9311_v36  ;;  %v1232_v36 = vld [vmem:[%s11018_s22 + $0x11c8] sm:$0xff]  ;;  %v9629_v7 = vcombine.high %v1199_v31, %v1231_v34  ;;  %v9628_v44 = vcombine.low %v1199_v31, %v1231_v34 }
 0x579   : > { %v9631_v39 = vcombine.high %v1200_v35, %v1232_v36  ;;  %v9630_v45 = vcombine.low %v1200_v35, %v1232_v36  ;;  %v1552_v31 = vld [vmem:[%s11018_s22 + $0x1bc8] sm:$0xff] }
 0x57a   : > { %8134 = vmatpush1.bf16.msra.mxu0 %v9308_v40  ;;  %v1263_v40 = vld [vmem:[%s11018_s22 + $0x12c0] sm:$0xff] }
 0x57b   : > { %8175 = vmatpush1.bf16.msra.mxu1 %v9310_v41  ;;  %8135 = vmatprep.subr.bf16.mxu0 %v9373_v42  ;;  %v1295_v41 = vld [vmem:[%s11018_s22 + $0x13c0] sm:$0xff]  ;;  %v1264_v42 = vld [vmem:[%s11018_s22 + $0x12c8] sm:$0xff] }
 0x57c   : > { %8176 = vmatprep.subr.bf16.mxu1 %v9375_v43  ;;  %v1296_v43 = vld [vmem:[%s11018_s22 + $0x13c8] sm:$0xff]  ;;  %v9693_v46 = vcombine.high %v1263_v40, %v1295_v41 }
 0x57d   : > { %v9695_v56 = vcombine.high %v1264_v42, %v1296_v43  ;;  %v9694_v60 = vcombine.low %v1264_v42, %v1296_v43 }
 0x57e   : > { %8136 = vmatpush1.bf16.msra.mxu0 %v9372_v47  ;;  %v1327_v47 = vld [vmem:[%s11018_s22 + $0x14c0] sm:$0xff] }
 0x57f   : > { %8177 = vmatpush1.bf16.msra.mxu1 %v9374_v49  ;;  %8137 = vmatprep.subr.bf16.mxu0 %v9437_v50  ;;  %v1359_v49 = vld [vmem:[%s11018_s22 + $0x15c0] sm:$0xff] }
 0x580   : > { %v7833_v5 = vpop.f32.mrb[36].mxu0  ;;  %8178 = vmatprep.subr.bf16.mxu1 %v9439_v53  ;;  %v1328_v53 = vld [vmem:[%s11018_s22 + $0x14c8] sm:$0xff] }
 0x581   : > { %v7834_v10 = vadd.f32 %v7833_v5, %v1834_v57  ;;  %v7874_v11 = vpop.f32.mrb[36].mxu1  ;;  %v7835_v12 = vpop.f32.mrb[37].mxu0  ;;  %v9692_v57 = vcombine.low %v1263_v40, %v1295_v41  ;;  %v1616_v40 = vld [vmem:[%s11018_s22 + $0x1dc8] sm:$0xff] }
 0x582   : > { %v7875_v15 = vadd.f32 %v7874_v11, %v1842_v63  ;;  %v7836_v59 = vadd.f32 %v7835_v12, %v1838_v0  ;;  %v7876_v62 = vpop.f32.mrb[37].mxu1  ;;  %v7837_v18 = vpop.f32.mrb[38].mxu0  ;;  %8138 = vmatpush1.bf16.msra.mxu0 %v9436_v1  ;;  %v9757_v63 = vcombine.high %v1327_v47, %v1359_v49  ;;  %v9758_v12 = vcombine.low %v1328_v53, %v1360_v55 }
 0x583   : > { %10347 = vtanh.f32 %v7834_v10  ;;  %v7877_v20 = vadd.f32 %v7876_v62, %v1846_v2  ;;  %v7878_v23 = vpop.f32.mrb[38].mxu1  ;;  %8179 = vmatpush1.bf16.msra.mxu1 %v9438_v3  ;;  %v7838_v24 = vpop.f32.mrb[39].mxu0  ;;  %8139 = vmatprep.subr.bf16.mxu0 %v9501_v4  ;;  %v9759_v2 = vcombine.high %v1328_v53, %v1360_v55  ;;  %v1391_v3 = vld [vmem:[%s11018_s22 + $0x16c0] sm:$0xff]  ;;  %v9756_v10 = vcombine.low %v1327_v47, %v1359_v49  ;;  %v1456_v18 = vld [vmem:[%s11018_s22 + $0x18c8] sm:$0xff] }
 0x584   : > { %10349 = vtanh.f32 %v7875_v15  ;;  %v7879_v29 = vpop.f32.mrb[39].mxu1  ;;  %8180 = vmatprep.subr.bf16.mxu1 %v9503_v6  ;;  %v1423_v4 = vld [vmem:[%s11018_s22 + $0x17c0] sm:$0xff]  ;;  %v1392_v6 = vld [vmem:[%s11018_s22 + $0x16c8] sm:$0xff] }
 0x585   : > { %10351 = vtanh.f32 %v7836_v59  ;;  %v9821_v13 = vcombine.high %v1391_v3, %v1423_v4  ;;  %v9823_v14 = vcombine.high %v1392_v6, %v1424_v8  ;;  %v1455_v15 = vld [vmem:[%s11018_s22 + $0x18c0] sm:$0xff]  ;;  %v9822_v23 = vcombine.low %v1392_v6, %v1424_v8  ;;  %v1680_v47 = vld [vmem:[%s11018_s22 + $0x1fc8] sm:$0xff]  ;;  %v754_v6 = vld [vmem:[%s11018_s22 + $0x2d8] sm:$0xff] }
 0x586   : > { %10353 = vtanh.f32 %v7877_v20  ;;  %8140 = vmatpush1.bf16.msra.mxu0 %v9500_v19  ;;  %v1487_v59 = vld [vmem:[%s11018_s22 + $0x19c0] sm:$0xff]  ;;  %v1488_v19 = vld [vmem:[%s11018_s22 + $0x19c8] sm:$0xff]  ;;  %v9820_v20 = vcombine.low %v1391_v3, %v1423_v4  ;;  %v753_v3 = vld [vmem:[%s11018_s22 + $0x2d0] sm:$0xff] }
 0x587   : > { %8181 = vmatpush1.bf16.msra.mxu1 %v9502_v25  ;;  %8141 = vmatprep.subr.bf16.mxu0 %v9565_v61  ;;  %v9885_v24 = vcombine.high %v1455_v15, %v1487_v59  ;;  %v9887_v25 = vcombine.high %v1456_v18, %v1488_v19  ;;  %v1519_v61 = vld [vmem:[%s11018_s22 + $0x1ac0] sm:$0xff]  ;;  %v9884_v34 = vcombine.low %v1455_v15, %v1487_v59  ;;  %v785_v4 = vld [vmem:[%s11018_s22 + $0x3d0] sm:$0xff]  ;;  %v786_v8 = vld [vmem:[%s11018_s22 + $0x3d8] sm:$0xff] }
 0x588   : > { %8182 = vmatprep.subr.bf16.mxu1 %v9567_v30  ;;  %v1551_v29 = vld [vmem:[%s11018_s22 + $0x1bc0] sm:$0xff]  ;;  %v1520_v30 = vld [vmem:[%s11018_s22 + $0x1ac8] sm:$0xff]  ;;  %v9886_v35 = vcombine.low %v1456_v18, %v1488_v19  ;;  %v850_v15 = vld [vmem:[%s11018_s22 + $0x5d8] sm:$0xff]  ;;  %v9184_v59 = vcombine.low %v753_v3, %v785_v4 }
 0x589   : > { %v9949_v36 = vcombine.high %v1519_v61, %v1551_v29  ;;  %v9948_v41 = vcombine.low %v1519_v61, %v1551_v29  ;;  %v9950_v42 = vcombine.low %v1520_v30, %v1552_v31 }
 0x58a   : > { %8142 = vmatpush1.bf16.msra.mxu0 %v9564_v51  ;;  %v9951_v51 = vcombine.high %v1520_v30, %v1552_v31 }
 0x58b   : > { %8183 = vmatpush1.bf16.msra.mxu1 %v9566_v37  ;;  %8143 = vmatprep.subr.bf16.mxu0 %v9629_v7  ;;  %v1583_v37 = vld [vmem:[%s11018_s22 + $0x1cc0] sm:$0xff] }
 0x58c   : > { %8184 = vmatprep.subr.bf16.mxu1 %v9631_v39  ;;  %v1615_v7 = vld [vmem:[%s11018_s22 + $0x1dc0] sm:$0xff]  ;;  %v1584_v39 = vld [vmem:[%s11018_s22 + $0x1cc8] sm:$0xff] }
 0x58d   : > { %v10348_v50 = vpop.eup %10347  ;;  %v10013_v43 = vcombine.high %v1583_v37, %v1615_v7  ;;  %v10012_v49 = vcombine.low %v1583_v37, %v1615_v7 }
 0x58e   : > { %v10350_v32 = vpop.eup %10349  ;;  %8144 = vmatpush1.bf16.msra.mxu0 %v9628_v44  ;;  %v10015_v44 = vcombine.high %v1584_v39, %v1616_v40 }
 0x58f   : > { %v10352_v58 = vpop.eup %10351  ;;  %8185 = vmatpush1.bf16.msra.mxu1 %v9630_v45  ;;  %8145 = vmatprep.subr.bf16.mxu0 %v9693_v46  ;;  %v1647_v45 = vld [vmem:[%s11018_s22 + $0x1ec0] sm:$0xff] }
 0x590   : > { %v10354_v0 = vpop.eup %10353  ;;  %v8719_v1 = vcombine.low %v10348_v50, %v10352_v58  ;;  %8186 = vmatprep.subr.bf16.mxu1 %v9695_v56  ;;  %v1679_v46 = vld [vmem:[%s11018_s22 + $0x1fc0] sm:$0xff]  ;;  %v1648_v56 = vld [vmem:[%s11018_s22 + $0x1ec8] sm:$0xff]  ;;  %v10014_v50 = vcombine.low %v1584_v39, %v1616_v40  ;;  %v690_v58 = vld [vmem:[%s11018_s22 + $0xd8] sm:$0xff] }
 0x591   : > { %v8720_v5 = vcombine.low %v10350_v32, %v10354_v0  ;;  %v10077_v53 = vcombine.high %v1647_v45, %v1679_v46  ;;  %v10079_v55 = vcombine.high %v1648_v56, %v1680_v47  ;;  %v689_v32 = vld [vmem:[%s11018_s22 + $0xd0] sm:$0xff]  ;;  %v10078_v0 = vcombine.low %v1648_v56, %v1680_v47 }
 0x592   : > { %v8727_v9 = vrot.slane %v8719_v1, %v11392_v38  ;;  %8146 = vmatpush1.bf16.msra.mxu0 %v9692_v57  ;;  %v721_v57 = vld [vmem:[%s11018_s22 + $0x1d0] sm:$0xff] }
 0x593   : > { %v8734_v11 = vrot.slane %v8720_v5, %v11392_v38  ;;  %8187 = vmatpush1.bf16.msra.mxu1 %v9694_v60  ;;  %8147 = vmatprep.subr.bf16.mxu0 %v9757_v63  ;;  %v722_v60 = vld [vmem:[%s11018_s22 + $0x1d8] sm:$0xff]  ;;  %v10076_v63 = vcombine.low %v1647_v45, %v1679_v46  ;;  %v9121_v1 = vcombine.high %v689_v32, %v721_v57 }
 0x594   : > { %8188 = vmatprep.subr.bf16.mxu1 %v9759_v2  ;;  %v9123_v2 = vcombine.high %v690_v58, %v722_v60  ;;  %v9120_v5 = vcombine.low %v689_v32, %v721_v57  ;;  %v1106_v32 = vld [vmem:[%s11018_s22 + $0xdd8] sm:$0xff]  ;;  %v1858_v57 = vrot.slane %v12023_v48, %v11450_v17 }
 0x595   : > { %v8735_v62 = vcombine.low %v8727_v9, %v8734_v11  ;;  %v9122_v9 = vcombine.low %v690_v58, %v722_v60  ;;  %v817_v11 = vld [vmem:[%s11018_s22 + $0x4d0] sm:$0xff]  ;;  %v1854_v58 = vrot.slane %v12023_v48, %v11455_v21 }
 0x596   : > { %8148 = vmatpush1.bf16.msra.mxu0 %v9756_v10  ;;  %v9185_v10 = vcombine.high %v753_v3, %v785_v4  ;;  %v1137_v4 = vld [vmem:[%s11018_s22 + $0xed0] sm:$0xff] }
 0x597   : > { %8879 = vst [vmem:[%s11405_s24 + $0x40] sm:$0xff] %v8735_v62  ;;  %8189 = vmatpush1.bf16.msra.mxu1 %v9758_v12  ;;  %8149 = vmatprep.subr.bf16.mxu0 %v9821_v13  ;;  %v849_v12 = vld [vmem:[%s11018_s22 + $0x5d0] sm:$0xff]  ;;  %v9187_v13 = vcombine.high %v754_v6, %v786_v8  ;;  %v9186_v62 = vcombine.low %v754_v6, %v786_v8 }
 0x598   : > { %8190 = vmatprep.subr.bf16.mxu1 %v9823_v14  ;;  %v818_v14 = vld [vmem:[%s11018_s22 + $0x4d8] sm:$0xff]  ;;  %v9249_v18 = vcombine.high %v817_v11, %v849_v12  ;;  %v9248_v61 = vcombine.low %v817_v11, %v849_v12 }
 0x599   : > { %v9251_v19 = vcombine.high %v818_v14, %v850_v15  ;;  %v9250_v29 = vcombine.low %v818_v14, %v850_v15  ;;  %v1170_v11 = vld [vmem:[%s11018_s22 + $0xfd8] sm:$0xff] }
 0x59a   : > { %8150 = vmatpush1.bf16.msra.mxu0 %v9820_v20  ;;  %v881_v20 = vld [vmem:[%s11018_s22 + $0x6d0] sm:$0xff] }
 0x59b   : > { %8191 = vmatpush1.bf16.msra.mxu1 %v9822_v23  ;;  %8151 = vmatprep.subr.bf16.mxu0 %v9885_v24  ;;  %v913_v23 = vld [vmem:[%s11018_s22 + $0x7d0] sm:$0xff]  ;;  %v882_v24 = vld [vmem:[%s11018_s22 + $0x6d8] sm:$0xff] }
 0x59c   : > { %8192 = vmatprep.subr.bf16.mxu1 %v9887_v25  ;;  %v914_v25 = vld [vmem:[%s11018_s22 + $0x7d8] sm:$0xff]  ;;  %v9313_v30 = vcombine.high %v881_v20, %v913_v23  ;;  %v9312_v37 = vcombine.low %v881_v20, %v913_v23 }
 0x59d   : > { %v9315_v31 = vcombine.high %v882_v24, %v914_v25  ;;  %v9314_v7 = vcombine.low %v882_v24, %v914_v25  ;;  %v1201_v25 = vld [vmem:[%s11018_s22 + $0x10d0] sm:$0xff] }
 0x59e   : > { %8152 = vmatpush1.bf16.msra.mxu0 %v9884_v34  ;;  %v945_v34 = vld [vmem:[%s11018_s22 + $0x8d0] sm:$0xff] }
 0x59f   : > { %8193 = vmatpush1.bf16.msra.mxu1 %v9886_v35  ;;  %8153 = vmatprep.subr.bf16.mxu0 %v9949_v36  ;;  %v977_v35 = vld [vmem:[%s11018_s22 + $0x9d0] sm:$0xff]  ;;  %v946_v36 = vld [vmem:[%s11018_s22 + $0x8d8] sm:$0xff] }
 0x5a0   : > { %8194 = vmatprep.subr.bf16.mxu1 %v9951_v51  ;;  %v978_v51 = vld [vmem:[%s11018_s22 + $0x9d8] sm:$0xff]  ;;  %v9377_v39 = vcombine.high %v945_v34, %v977_v35  ;;  %v9376_v45 = vcombine.low %v945_v34, %v977_v35 }
 0x5a1   : > { %v9379_v40 = vcombine.high %v946_v36, %v978_v51  ;;  %v9378_v46 = vcombine.low %v946_v36, %v978_v51  ;;  %v1265_v51 = vld [vmem:[%s11018_s22 + $0x12d0] sm:$0xff] }
 0x5a2   : > { %8154 = vmatpush1.bf16.msra.mxu0 %v9948_v41  ;;  %v1009_v41 = vld [vmem:[%s11018_s22 + $0xad0] sm:$0xff] }
 0x5a3   : > { %8195 = vmatpush1.bf16.msra.mxu1 %v9950_v42  ;;  %8155 = vmatprep.subr.bf16.mxu0 %v10013_v43  ;;  %v1041_v42 = vld [vmem:[%s11018_s22 + $0xbd0] sm:$0xff]  ;;  %v1010_v43 = vld [vmem:[%s11018_s22 + $0xad8] sm:$0xff] }
 0x5a4   : > { %8196 = vmatprep.subr.bf16.mxu1 %v10015_v44  ;;  %v1042_v44 = vld [vmem:[%s11018_s22 + $0xbd8] sm:$0xff]  ;;  %v9441_v56 = vcombine.high %v1009_v41, %v1041_v42  ;;  %v9440_v60 = vcombine.low %v1009_v41, %v1041_v42 }
 0x5a5   : > { %v9443_v47 = vcombine.high %v1010_v43, %v1042_v44 }
 0x5a6   : > { %8156 = vmatpush1.bf16.msra.mxu0 %v10012_v49  ;;  %v1073_v49 = vld [vmem:[%s11018_s22 + $0xcd0] sm:$0xff] }
 0x5a7   : > { %8197 = vmatpush1.bf16.msra.mxu1 %v10014_v50  ;;  %8157 = vmatprep.subr.bf16.mxu0 %v10077_v53  ;;  %v1105_v50 = vld [vmem:[%s11018_s22 + $0xdd0] sm:$0xff]  ;;  %v1850_v53 = vrot.slane %v12023_v48, %v11447_v16 }
 0x5a8   : > { %8198 = vmatprep.subr.bf16.mxu1 %v10079_v55  ;;  %v1074_v55 = vld [vmem:[%s11018_s22 + $0xcd8] sm:$0xff] }
 0x5a9   : > { %v9507_v3 = vcombine.high %v1074_v55, %v1106_v32 }
 0x5aa   : > { %8158 = vmatpush1.bf16.msra.mxu0 %v10076_v63  ;;  %v1862_v63 = vrot.slane %v12023_v48, %v11458_v22  ;;  %v9504_v48 = vcombine.low %v1073_v49, %v1105_v50 }
 0x5ab   : > { %8199 = vmatpush1.bf16.msra.mxu1 %v10078_v0  ;;  %8209 = vmatprep.subr.bf16.mxu0 %v9121_v1  ;;  %v9442_v0 = vcombine.low %v1010_v43, %v1042_v44  ;;  %v9505_v1 = vcombine.high %v1073_v49, %v1105_v50  ;;  %v1329_v44 = vld [vmem:[%s11018_s22 + $0x14d0] sm:$0xff] }
 0x5ac   : > { %8250 = vmatprep.subr.bf16.mxu1 %v9123_v2 }
 0x5ad   : > { %8160 = vmatmul.mubr.bf16.vlgmr.msra.gmra.mrb[52].mxu0 %v11123_v28 }
 0x5ae   : > { %8201 = vmatmul.mubr.bf16.vlgmr.msra.gmra.mrb[52].mxu1 %v11123_v28  ;;  %8210 = vmatpush1.bf16.msra.mxu0 %v9120_v5  ;;  %v1169_v5 = vld [vmem:[%s11018_s22 + $0xfd0] sm:$0xff] }
 0x5af   : > { %8241 = vmatprep.mubr.bf16.mxu0 %v11121_v27  ;;  %8251 = vmatpush1.bf16.msra.mxu1 %v9122_v9  ;;  %v9569_v20 = vcombine.high %v1137_v4, %v1169_v5 }
 0x5b0   : > { %8282 = vmatprep.mubr.bf16.mxu1 %v11121_v27  ;;  %8211 = vmatprep.subr.bf16.mxu0 %v9185_v10  ;;  %v1138_v10 = vld [vmem:[%s11018_s22 + $0xed8] sm:$0xff] }
 0x5b1   : > { %8252 = vmatprep.subr.bf16.mxu1 %v9187_v13  ;;  %v9571_v24 = vcombine.high %v1138_v10, %v1170_v11  ;;  %v9570_v34 = vcombine.low %v1138_v10, %v1170_v11  ;;  %v1457_v11 = vld [vmem:[%s11018_s22 + $0x18d0] sm:$0xff] }
 0x5b2   : > { %8212 = vmatpush1.bf16.msra.mxu0 %v9184_v59 }
 0x5b3   : > { %8253 = vmatpush1.bf16.msra.mxu1 %v9186_v62  ;;  %8213 = vmatprep.subr.bf16.mxu0 %v9249_v18 }
 0x5b4   : > { %8254 = vmatprep.subr.bf16.mxu1 %v9251_v19  ;;  %v9506_v19 = vcombine.low %v1074_v55, %v1106_v32 }
 0x5b6   : > { %8214 = vmatpush1.bf16.msra.mxu0 %v9248_v61  ;;  %v1233_v61 = vld [vmem:[%s11018_s22 + $0x11d0] sm:$0xff] }
 0x5b7   : > { %8255 = vmatpush1.bf16.msra.mxu1 %v9250_v29  ;;  %8215 = vmatprep.subr.bf16.mxu0 %v9313_v30  ;;  %v1202_v29 = vld [vmem:[%s11018_s22 + $0x10d8] sm:$0xff]  ;;  %v9633_v35 = vcombine.high %v1201_v25, %v1233_v61 }
 0x5b8   : > { %8256 = vmatprep.subr.bf16.mxu1 %v9315_v31  ;;  %v1234_v30 = vld [vmem:[%s11018_s22 + $0x11d8] sm:$0xff]  ;;  %v9568_v31 = vcombine.low %v1137_v4, %v1169_v5 }
 0x5b9   : > { %v9635_v36 = vcombine.high %v1202_v29, %v1234_v30  ;;  %v9634_v41 = vcombine.low %v1202_v29, %v1234_v30 }
 0x5ba   : > { %8216 = vmatpush1.bf16.msra.mxu0 %v9312_v37  ;;  %v1297_v37 = vld [vmem:[%s11018_s22 + $0x13d0] sm:$0xff] }
 0x5bb   : > { %8257 = vmatpush1.bf16.msra.mxu1 %v9314_v7  ;;  %8217 = vmatprep.subr.bf16.mxu0 %v9377_v39  ;;  %v1266_v7 = vld [vmem:[%s11018_s22 + $0x12d8] sm:$0xff]  ;;  %v9697_v42 = vcombine.high %v1265_v51, %v1297_v37  ;;  %v9696_v50 = vcombine.low %v1265_v51, %v1297_v37 }
 0x5bc   : > { %8258 = vmatprep.subr.bf16.mxu1 %v9379_v40  ;;  %v1298_v39 = vld [vmem:[%s11018_s22 + $0x13d8] sm:$0xff]  ;;  %v9632_v40 = vcombine.low %v1201_v25, %v1233_v61 }
 0x5bd   : > { %v9699_v43 = vcombine.high %v1266_v7, %v1298_v39  ;;  %v9698_v55 = vcombine.low %v1266_v7, %v1298_v39 }
 0x5be   : > { %8218 = vmatpush1.bf16.msra.mxu0 %v9376_v45  ;;  %v1361_v45 = vld [vmem:[%s11018_s22 + $0x15d0] sm:$0xff] }
 0x5bf   : > { %8259 = vmatpush1.bf16.msra.mxu1 %v9378_v46  ;;  %8219 = vmatprep.subr.bf16.mxu0 %v9441_v56  ;;  %v1330_v56 = vld [vmem:[%s11018_s22 + $0x14d8] sm:$0xff]  ;;  %v9761_v32 = vcombine.high %v1329_v44, %v1361_v45  ;;  %v9760_v5 = vcombine.low %v1329_v44, %v1361_v45 }
 0x5c0   : > { %v7915_v2 = vpop.f32.mrb[40].mxu0  ;;  %8260 = vmatprep.subr.bf16.mxu1 %v9443_v47  ;;  %v1362_v47 = vld [vmem:[%s11018_s22 + $0x15d8] sm:$0xff] }
 0x5c1   : > { %v7916_v6 = vadd.f32 %v7915_v2, %v1850_v53  ;;  %v7956_v8 = vpop.f32.mrb[40].mxu1  ;;  %v7917_v9 = vpop.f32.mrb[41].mxu0  ;;  %v1394_v2 = vld [vmem:[%s11018_s22 + $0x16d8] sm:$0xff] }
 0x5c2   : > { %v7957_v12 = vadd.f32 %v7956_v8, %v1858_v57  ;;  %v7918_v13 = vadd.f32 %v7917_v9, %v1854_v58  ;;  %v7958_v14 = vpop.f32.mrb[41].mxu1  ;;  %v7919_v15 = vpop.f32.mrb[42].mxu0  ;;  %8220 = vmatpush1.bf16.msra.mxu0 %v9440_v60  ;;  %v9763_v60 = vcombine.high %v1330_v56, %v1362_v47  ;;  %v9762_v8 = vcombine.low %v1330_v56, %v1362_v47  ;;  %v691_v47 = vld [vmem:[%s11018_s22 + $0xe0] sm:$0xff] }
 0x5c3   : > { %10355 = vtanh.f32 %v7916_v6  ;;  %v7959_v59 = vadd.f32 %v7958_v14, %v1862_v63  ;;  %v7960_v62 = vpop.f32.mrb[42].mxu1  ;;  %8261 = vmatpush1.bf16.msra.mxu1 %v9442_v0  ;;  %v7920_v18 = vpop.f32.mrb[43].mxu0  ;;  %8221 = vmatprep.subr.bf16.mxu0 %v9505_v1  ;;  %v1393_v63 = vld [vmem:[%s11018_s22 + $0x16d0] sm:$0xff]  ;;  %v1458_v14 = vld [vmem:[%s11018_s22 + $0x18d8] sm:$0xff] }
 0x5c4   : > { %10357 = vtanh.f32 %v7957_v12  ;;  %v7961_v23 = vpop.f32.mrb[43].mxu1  ;;  %8262 = vmatprep.subr.bf16.mxu1 %v9507_v3  ;;  %v1425_v0 = vld [vmem:[%s11018_s22 + $0x17d0] sm:$0xff]  ;;  %v1426_v3 = vld [vmem:[%s11018_s22 + $0x17d8] sm:$0xff] }
 0x5c5   : > { %10359 = vtanh.f32 %v7918_v13  ;;  %v9825_v9 = vcombine.high %v1393_v63, %v1425_v0  ;;  %v9827_v10 = vcombine.high %v1394_v2, %v1426_v3  ;;  %v1489_v12 = vld [vmem:[%s11018_s22 + $0x19d0] sm:$0xff]  ;;  %v1490_v15 = vld [vmem:[%s11018_s22 + $0x19d8] sm:$0xff] }
 0x5c6   : > { %10361 = vtanh.f32 %v7959_v59  ;;  %8222 = vmatpush1.bf16.msra.mxu0 %v9504_v48  ;;  %v9824_v48 = vcombine.low %v1393_v63, %v1425_v0  ;;  %v9826_v59 = vcombine.low %v1394_v2, %v1426_v3  ;;  %v9889_v62 = vcombine.high %v1457_v11, %v1489_v12  ;;  %v1522_v23 = vld [vmem:[%s11018_s22 + $0x1ad8] sm:$0xff]  ;;  %v787_v63 = vld [vmem:[%s11018_s22 + $0x3e0] sm:$0xff]  ;;  %v788_v2 = vld [vmem:[%s11018_s22 + $0x3e8] sm:$0xff] }
 0x5c7   : > { %8263 = vmatpush1.bf16.msra.mxu1 %v9506_v19  ;;  %8223 = vmatprep.subr.bf16.mxu0 %v9569_v20  ;;  %v9891_v18 = vcombine.high %v1458_v14, %v1490_v15  ;;  %v1521_v19 = vld [vmem:[%s11018_s22 + $0x1ad0] sm:$0xff]  ;;  %v9888_v25 = vcombine.low %v1457_v11, %v1489_v12  ;;  %v9890_v61 = vcombine.low %v1458_v14, %v1490_v15  ;;  %v883_v15 = vld [vmem:[%s11018_s22 + $0x6e0] sm:$0xff] }
 0x5c8   : > { %8264 = vmatprep.subr.bf16.mxu1 %v9571_v24  ;;  %v1553_v20 = vld [vmem:[%s11018_s22 + $0x1bd0] sm:$0xff]  ;;  %v1554_v24 = vld [vmem:[%s11018_s22 + $0x1bd8] sm:$0xff] }
 0x5c9   : > { %v9953_v29 = vcombine.high %v1521_v19, %v1553_v20  ;;  %v9955_v30 = vcombine.high %v1522_v23, %v1554_v24  ;;  %v9952_v51 = vcombine.low %v1521_v19, %v1553_v20  ;;  %v9954_v37 = vcombine.low %v1522_v23, %v1554_v24  ;;  %v947_v24 = vld [vmem:[%s11018_s22 + $0x8e0] sm:$0xff] }
 0x5ca   : > { %8224 = vmatpush1.bf16.msra.mxu0 %v9568_v31  ;;  %v1585_v31 = vld [vmem:[%s11018_s22 + $0x1cd0] sm:$0xff] }
 0x5cb   : > { %8265 = vmatpush1.bf16.msra.mxu1 %v9570_v34  ;;  %8225 = vmatprep.subr.bf16.mxu0 %v9633_v35  ;;  %v1617_v34 = vld [vmem:[%s11018_s22 + $0x1dd0] sm:$0xff]  ;;  %v1586_v35 = vld [vmem:[%s11018_s22 + $0x1cd8] sm:$0xff] }
 0x5cc   : > { %8266 = vmatprep.subr.bf16.mxu1 %v9635_v36  ;;  %v1618_v36 = vld [vmem:[%s11018_s22 + $0x1dd8] sm:$0xff]  ;;  %v10017_v7 = vcombine.high %v1585_v31, %v1617_v34  ;;  %v10016_v44 = vcombine.low %v1585_v31, %v1617_v34 }
 0x5cd   : > { %v10356_v46 = vpop.eup %10355  ;;  %v10019_v39 = vcombine.high %v1586_v35, %v1618_v36  ;;  %v10018_v45 = vcombine.low %v1586_v35, %v1618_v36  ;;  %v1011_v36 = vld [vmem:[%s11018_s22 + $0xae0] sm:$0xff] }
 0x5ce   : > { %v10358_v49 = vpop.eup %10357  ;;  %8226 = vmatpush1.bf16.msra.mxu0 %v9632_v40  ;;  %v1649_v40 = vld [vmem:[%s11018_s22 + $0x1ed0] sm:$0xff] }
 0x5cf   : > { %v10360_v53 = vpop.eup %10359  ;;  %8267 = vmatpush1.bf16.msra.mxu1 %v9634_v41  ;;  %8227 = vmatprep.subr.bf16.mxu0 %v9697_v42  ;;  %v1681_v41 = vld [vmem:[%s11018_s22 + $0x1fd0] sm:$0xff]  ;;  %v1650_v42 = vld [vmem:[%s11018_s22 + $0x1ed8] sm:$0xff] }
 0x5d0   : > { %v10362_v57 = vpop.eup %10361  ;;  %v8736_v58 = vcombine.low %v10356_v46, %v10360_v53  ;;  %8268 = vmatprep.subr.bf16.mxu1 %v9699_v43  ;;  %v1682_v43 = vld [vmem:[%s11018_s22 + $0x1fd8] sm:$0xff]  ;;  %v10081_v46 = vcombine.high %v1649_v40, %v1681_v41  ;;  %v724_v53 = vld [vmem:[%s11018_s22 + $0x1e8] sm:$0xff] }
 0x5d1   : > { %v8737_v1 = vcombine.low %v10358_v49, %v10362_v57  ;;  %v10083_v56 = vcombine.high %v1650_v42, %v1682_v43  ;;  %v723_v49 = vld [vmem:[%s11018_s22 + $0x1e0] sm:$0xff] }
 0x5d2   : > { %v8744_v4 = vrot.slane %v8736_v58, %v11392_v38  ;;  %8228 = vmatpush1.bf16.msra.mxu0 %v9696_v50  ;;  %v692_v50 = vld [vmem:[%s11018_s22 + $0xe8] sm:$0xff]  ;;  %v9125_v57 = vcombine.high %v691_v47, %v723_v49  ;;  %v9124_v0 = vcombine.low %v691_v47, %v723_v49 }
 0x5d3   : > { %v8751_v6 = vrot.slane %v8737_v1, %v11392_v38  ;;  %8269 = vmatpush1.bf16.msra.mxu1 %v9698_v55  ;;  %8229 = vmatprep.subr.bf16.mxu0 %v9761_v32  ;;  %v10080_v55 = vcombine.low %v1649_v40, %v1681_v41  ;;  %v10082_v32 = vcombine.low %v1650_v42, %v1682_v43  ;;  %v756_v1 = vld [vmem:[%s11018_s22 + $0x2e8] sm:$0xff] }
 0x5d4   : > { %8270 = vmatprep.subr.bf16.mxu1 %v9763_v60  ;;  %v9127_v58 = vcombine.high %v692_v50, %v724_v53  ;;  %v755_v60 = vld [vmem:[%s11018_s22 + $0x2e0] sm:$0xff]  ;;  %v9126_v3 = vcombine.low %v692_v50, %v724_v53  ;;  %v9190_v12 = vcombine.low %v756_v1, %v788_v2  ;;  %v12184_v40 = vld [vmem:[%s11355_s9 + $0x28] sm:$0xff] }
 0x5d5   : > { %v8752_v13 = vcombine.low %v8744_v4, %v8751_v6  ;;  %v9189_v4 = vcombine.high %v755_v60, %v787_v63  ;;  %v851_v6 = vld [vmem:[%s11018_s22 + $0x5e0] sm:$0xff]  ;;  %v9188_v11 = vcombine.low %v755_v60, %v787_v63  ;;  %v1108_v47 = vld [vmem:[%s11018_s22 + $0xde8] sm:$0xff]  ;;  %v1874_v49 = vrot.slane %v12184_v40, %v11351_v26 }
 0x5d6   : > { %8230 = vmatpush1.bf16.msra.mxu0 %v9760_v5  ;;  %v819_v5 = vld [vmem:[%s11018_s22 + $0x4e0] sm:$0xff]  ;;  %v1870_v50 = vrot.slane %v12184_v40, %v11070_v54 }
 0x5d7   : > { %8880 = vst [vmem:[%s11405_s24 + $0x48] sm:$0xff] %v8752_v13  ;;  %8271 = vmatpush1.bf16.msra.mxu1 %v9762_v8  ;;  %8231 = vmatprep.subr.bf16.mxu0 %v9825_v9  ;;  %v9191_v8 = vcombine.high %v756_v1, %v788_v2  ;;  %v820_v9 = vld [vmem:[%s11018_s22 + $0x4e8] sm:$0xff]  ;;  %v9253_v13 = vcombine.high %v819_v5, %v851_v6  ;;  %v1139_v63 = vld [vmem:[%s11018_s22 + $0xee0] sm:$0xff] }
 0x5d8   : > { %8272 = vmatprep.subr.bf16.mxu1 %v9827_v10  ;;  %v852_v10 = vld [vmem:[%s11018_s22 + $0x5e8] sm:$0xff] }
 0x5d9   : > { %v9255_v14 = vcombine.high %v820_v9, %v852_v10  ;;  %v9254_v19 = vcombine.low %v820_v9, %v852_v10 }
 0x5da   : > { %8232 = vmatpush1.bf16.msra.mxu0 %v9824_v48  ;;  %v915_v48 = vld [vmem:[%s11018_s22 + $0x7e0] sm:$0xff] }
 0x5db   : > { %8273 = vmatpush1.bf16.msra.mxu1 %v9826_v59  ;;  %8233 = vmatprep.subr.bf16.mxu0 %v9889_v62  ;;  %v884_v59 = vld [vmem:[%s11018_s22 + $0x6e8] sm:$0xff]  ;;  %v9317_v20 = vcombine.high %v883_v15, %v915_v48 }
 0x5dc   : > { %8274 = vmatprep.subr.bf16.mxu1 %v9891_v18  ;;  %v916_v62 = vld [vmem:[%s11018_s22 + $0x7e8] sm:$0xff]  ;;  %v9252_v18 = vcombine.low %v819_v5, %v851_v6 }
 0x5dd   : > { %v9319_v23 = vcombine.high %v884_v59, %v916_v62  ;;  %v9318_v31 = vcombine.low %v884_v59, %v916_v62  ;;  %v1172_v5 = vld [vmem:[%s11018_s22 + $0xfe8] sm:$0xff] }
 0x5de   : > { %8234 = vmatpush1.bf16.msra.mxu0 %v9888_v25  ;;  %v979_v25 = vld [vmem:[%s11018_s22 + $0x9e0] sm:$0xff] }
 0x5df   : > { %8275 = vmatpush1.bf16.msra.mxu1 %v9890_v61  ;;  %8235 = vmatprep.subr.bf16.mxu0 %v9953_v29  ;;  %v948_v61 = vld [vmem:[%s11018_s22 + $0x8e8] sm:$0xff]  ;;  %v9381_v34 = vcombine.high %v947_v24, %v979_v25 }
 0x5e0   : > { %8276 = vmatprep.subr.bf16.mxu1 %v9955_v30  ;;  %v980_v29 = vld [vmem:[%s11018_s22 + $0x9e8] sm:$0xff]  ;;  %v9316_v30 = vcombine.low %v883_v15, %v915_v48 }
 0x5e1   : > { %v9383_v35 = vcombine.high %v948_v61, %v980_v29  ;;  %v9382_v41 = vcombine.low %v948_v61, %v980_v29 }
 0x5e2   : > { %8236 = vmatpush1.bf16.msra.mxu0 %v9952_v51  ;;  %v1043_v51 = vld [vmem:[%s11018_s22 + $0xbe0] sm:$0xff] }
 0x5e3   : > { %8277 = vmatpush1.bf16.msra.mxu1 %v9954_v37  ;;  %8237 = vmatprep.subr.bf16.mxu0 %v10017_v7  ;;  %v1012_v37 = vld [vmem:[%s11018_s22 + $0xae8] sm:$0xff]  ;;  %v9445_v42 = vcombine.high %v1011_v36, %v1043_v51  ;;  %v9444_v53 = vcombine.low %v1011_v36, %v1043_v51 }
 0x5e4   : > { %8278 = vmatprep.subr.bf16.mxu1 %v10019_v39  ;;  %v1044_v7 = vld [vmem:[%s11018_s22 + $0xbe8] sm:$0xff]  ;;  %v9380_v39 = vcombine.low %v947_v24, %v979_v25 }
 0x5e5   : > { %v9447_v43 = vcombine.high %v1012_v37, %v1044_v7 }
 0x5e6   : > { %8238 = vmatpush1.bf16.msra.mxu0 %v10016_v44  ;;  %v1075_v44 = vld [vmem:[%s11018_s22 + $0xce0] sm:$0xff] }
 0x5e7   : > { %8279 = vmatpush1.bf16.msra.mxu1 %v10018_v45  ;;  %8239 = vmatprep.subr.bf16.mxu0 %v10081_v46  ;;  %v1107_v45 = vld [vmem:[%s11018_s22 + $0xde0] sm:$0xff]  ;;  %v1866_v46 = vrot.slane %v12184_v40, %v11067_v52 }
 0x5e8   : > { %8280 = vmatprep.subr.bf16.mxu1 %v10083_v56  ;;  %v1076_v56 = vld [vmem:[%s11018_s22 + $0xce8] sm:$0xff] }
 0x5e9   : > { %v9511_v60 = vcombine.high %v1076_v56, %v1108_v47  ;;  %v9510_v15 = vcombine.low %v1076_v56, %v1108_v47 }
 0x5ea   : > { %8240 = vmatpush1.bf16.msra.mxu0 %v10080_v55  ;;  %v1878_v55 = vrot.slane %v12184_v40, %v11361_v33 }
 0x5eb   : > { %8281 = vmatpush1.bf16.msra.mxu1 %v10082_v32  ;;  %8291 = vmatprep.subr.bf16.mxu0 %v9125_v57  ;;  %v9446_v32 = vcombine.low %v1012_v37, %v1044_v7  ;;  %v9509_v57 = vcombine.high %v1075_v44, %v1107_v45 }
 0x5ec   : > { %8332 = vmatprep.subr.bf16.mxu1 %v9127_v58 }
 0x5ed   : > { %8242 = vmatmul.mubr.bf16.vlgmr.msra.gmra.mrb[56].mxu0 %v11123_v28 }
 0x5ee   : > { %8283 = vmatmul.mubr.bf16.vlgmr.msra.gmra.mrb[56].mxu1 %v11123_v28  ;;  %8292 = vmatpush1.bf16.msra.mxu0 %v9124_v0  ;;  %v1171_v0 = vld [vmem:[%s11018_s22 + $0xfe0] sm:$0xff] }
 0x5ef   : > { %8323 = vmatprep.mubr.bf16.mxu0 %v11121_v27  ;;  %8333 = vmatpush1.bf16.msra.mxu1 %v9126_v3  ;;  %v9573_v48 = vcombine.high %v1139_v63, %v1171_v0  ;;  %v9572_v24 = vcombine.low %v1139_v63, %v1171_v0  ;;  %v1428_v63 = vld [vmem:[%s11018_s22 + $0x17e8] sm:$0xff] }
 0x5f0   : > { %8364 = vmatprep.mubr.bf16.mxu1 %v11121_v27  ;;  %8293 = vmatprep.subr.bf16.mxu0 %v9189_v4  ;;  %v1140_v4 = vld [vmem:[%s11018_s22 + $0xee8] sm:$0xff] }
 0x5f1   : > { %8334 = vmatprep.subr.bf16.mxu1 %v9191_v8  ;;  %v9575_v62 = vcombine.high %v1140_v4, %v1172_v5  ;;  %v9574_v25 = vcombine.low %v1140_v4, %v1172_v5 }
 0x5f2   : > { %8294 = vmatpush1.bf16.msra.mxu0 %v9188_v11  ;;  %v9508_v11 = vcombine.low %v1075_v44, %v1107_v45  ;;  %v1364_v44 = vld [vmem:[%s11018_s22 + $0x15e8] sm:$0xff] }
 0x5f3   : > { %8335 = vmatpush1.bf16.msra.mxu1 %v9190_v12  ;;  %8295 = vmatprep.subr.bf16.mxu0 %v9253_v13 }
 0x5f4   : > { %8336 = vmatprep.subr.bf16.mxu1 %v9255_v14 }
 0x5f6   : > { %8296 = vmatpush1.bf16.msra.mxu0 %v9252_v18  ;;  %v1203_v18 = vld [vmem:[%s11018_s22 + $0x10e0] sm:$0xff] }
 0x5f7   : > { %8337 = vmatpush1.bf16.msra.mxu1 %v9254_v19  ;;  %8297 = vmatprep.subr.bf16.mxu0 %v9317_v20  ;;  %v1235_v19 = vld [vmem:[%s11018_s22 + $0x11e0] sm:$0xff]  ;;  %v1204_v20 = vld [vmem:[%s11018_s22 + $0x10e8] sm:$0xff] }
 0x5f8   : > { %8338 = vmatprep.subr.bf16.mxu1 %v9319_v23  ;;  %v1236_v23 = vld [vmem:[%s11018_s22 + $0x11e8] sm:$0xff]  ;;  %v9637_v61 = vcombine.high %v1203_v18, %v1235_v19  ;;  %v9636_v36 = vcombine.low %v1203_v18, %v1235_v19 }
 0x5f9   : > { %v9639_v29 = vcombine.high %v1204_v20, %v1236_v23  ;;  %v9638_v51 = vcombine.low %v1204_v20, %v1236_v23  ;;  %v1556_v18 = vld [vmem:[%s11018_s22 + $0x1be8] sm:$0xff] }
 0x5fa   : > { %8298 = vmatpush1.bf16.msra.mxu0 %v9316_v30  ;;  %v1267_v30 = vld [vmem:[%s11018_s22 + $0x12e0] sm:$0xff] }
 0x5fb   : > { %8339 = vmatpush1.bf16.msra.mxu1 %v9318_v31  ;;  %8299 = vmatprep.subr.bf16.mxu0 %v9381_v34  ;;  %v1299_v31 = vld [vmem:[%s11018_s22 + $0x13e0] sm:$0xff]  ;;  %v1268_v34 = vld [vmem:[%s11018_s22 + $0x12e8] sm:$0xff] }
 0x5fc   : > { %8340 = vmatprep.subr.bf16.mxu1 %v9383_v35  ;;  %v1300_v35 = vld [vmem:[%s11018_s22 + $0x13e8] sm:$0xff]  ;;  %v9701_v37 = vcombine.high %v1267_v30, %v1299_v31 }
 0x5fd   : > { %v9703_v7 = vcombine.high %v1268_v34, %v1300_v35  ;;  %v9702_v47 = vcombine.low %v1268_v34, %v1300_v35 }
 0x5fe   : > { %8300 = vmatpush1.bf16.msra.mxu0 %v9380_v39  ;;  %v1331_v39 = vld [vmem:[%s11018_s22 + $0x14e0] sm:$0xff] }
 0x5ff   : > { %8341 = vmatpush1.bf16.msra.mxu1 %v9382_v41  ;;  %8301 = vmatprep.subr.bf16.mxu0 %v9445_v42  ;;  %v1363_v41 = vld [vmem:[%s11018_s22 + $0x15e0] sm:$0xff] }
 0x600   : > { %v7997_v58 = vpop.f32.mrb[44].mxu0  ;;  %8342 = vmatprep.subr.bf16.mxu1 %v9447_v43  ;;  %v1332_v43 = vld [vmem:[%s11018_s22 + $0x14e8] sm:$0xff] }
 0x601   : > { %v7998_v1 = vadd.f32 %v7997_v58, %v1866_v46  ;;  %v8038_v2 = vpop.f32.mrb[44].mxu1  ;;  %v7999_v3 = vpop.f32.mrb[45].mxu0  ;;  %v9700_v46 = vcombine.low %v1267_v30, %v1299_v31  ;;  %v1620_v30 = vld [vmem:[%s11018_s22 + $0x1de8] sm:$0xff] }
 0x602   : > { %v8039_v6 = vadd.f32 %v8038_v2, %v1874_v49  ;;  %v8000_v8 = vadd.f32 %v7999_v3, %v1870_v50  ;;  %v8040_v9 = vpop.f32.mrb[45].mxu1  ;;  %v8001_v10 = vpop.f32.mrb[46].mxu0  ;;  %8302 = vmatpush1.bf16.msra.mxu0 %v9444_v53  ;;  %v9765_v49 = vcombine.high %v1331_v39, %v1363_v41  ;;  %v9766_v3 = vcombine.low %v1332_v43, %v1364_v44 }
 0x603   : > { %10363 = vtanh.f32 %v7998_v1  ;;  %v8041_v12 = vadd.f32 %v8040_v9, %v1878_v55  ;;  %v8042_v13 = vpop.f32.mrb[46].mxu1  ;;  %8343 = vmatpush1.bf16.msra.mxu1 %v9446_v32  ;;  %v8002_v14 = vpop.f32.mrb[47].mxu0  ;;  %8303 = vmatprep.subr.bf16.mxu0 %v9509_v57  ;;  %v9767_v55 = vcombine.high %v1332_v43, %v1364_v44  ;;  %v1395_v32 = vld [vmem:[%s11018_s22 + $0x16e0] sm:$0xff]  ;;  %v9764_v1 = vcombine.low %v1331_v39, %v1363_v41  ;;  %v1460_v10 = vld [vmem:[%s11018_s22 + $0x18e8] sm:$0xff] }
 0x604   : > { %10365 = vtanh.f32 %v8039_v6  ;;  %v8043_v59 = vpop.f32.mrb[47].mxu1  ;;  %8344 = vmatprep.subr.bf16.mxu1 %v9511_v60  ;;  %v1427_v57 = vld [vmem:[%s11018_s22 + $0x17e0] sm:$0xff]  ;;  %v1396_v60 = vld [vmem:[%s11018_s22 + $0x16e8] sm:$0xff] }
 0x605   : > { %10367 = vtanh.f32 %v8000_v8  ;;  %v9829_v4 = vcombine.high %v1395_v32, %v1427_v57  ;;  %v9831_v5 = vcombine.high %v1396_v60, %v1428_v63  ;;  %v1459_v6 = vld [vmem:[%s11018_s22 + $0x18e0] sm:$0xff]  ;;  %v9830_v13 = vcombine.low %v1396_v60, %v1428_v63  ;;  %v1684_v39 = vld [vmem:[%s11018_s22 + $0x1fe8] sm:$0xff]  ;;  %v758_v60 = vld [vmem:[%s11018_s22 + $0x2f8] sm:$0xff] }
 0x606   : > { %10369 = vtanh.f32 %v8041_v12  ;;  %8304 = vmatpush1.bf16.msra.mxu0 %v9508_v11  ;;  %v1491_v8 = vld [vmem:[%s11018_s22 + $0x19e0] sm:$0xff]  ;;  %v1492_v11 = vld [vmem:[%s11018_s22 + $0x19e8] sm:$0xff]  ;;  %v9828_v12 = vcombine.low %v1395_v32, %v1427_v57  ;;  %v757_v32 = vld [vmem:[%s11018_s22 + $0x2f0] sm:$0xff] }
 0x607   : > { %8345 = vmatpush1.bf16.msra.mxu1 %v9510_v15  ;;  %8305 = vmatprep.subr.bf16.mxu0 %v9573_v48  ;;  %v9893_v14 = vcombine.high %v1459_v6, %v1491_v8  ;;  %v9895_v15 = vcombine.high %v1460_v10, %v1492_v11  ;;  %v1523_v48 = vld [vmem:[%s11018_s22 + $0x1ae0] sm:$0xff]  ;;  %v9892_v19 = vcombine.low %v1459_v6, %v1491_v8  ;;  %v789_v57 = vld [vmem:[%s11018_s22 + $0x3f0] sm:$0xff]  ;;  %v790_v63 = vld [vmem:[%s11018_s22 + $0x3f8] sm:$0xff] }
 0x608   : > { %8346 = vmatprep.subr.bf16.mxu1 %v9575_v62  ;;  %v1555_v59 = vld [vmem:[%s11018_s22 + $0x1be0] sm:$0xff]  ;;  %v1524_v62 = vld [vmem:[%s11018_s22 + $0x1ae8] sm:$0xff]  ;;  %v9894_v20 = vcombine.low %v1460_v10, %v1492_v11  ;;  %v854_v6 = vld [vmem:[%s11018_s22 + $0x5f8] sm:$0xff]  ;;  %v9192_v8 = vcombine.low %v757_v32, %v789_v57 }
 0x609   : > { %v9957_v23 = vcombine.high %v1523_v48, %v1555_v59  ;;  %v9956_v31 = vcombine.low %v1523_v48, %v1555_v59  ;;  %v9958_v34 = vcombine.low %v1524_v62, %v1556_v18 }
 0x60a   : > { %8306 = vmatpush1.bf16.msra.mxu0 %v9572_v24  ;;  %v9959_v24 = vcombine.high %v1524_v62, %v1556_v18  ;;  %v949_v18 = vld [vmem:[%s11018_s22 + $0x8f0] sm:$0xff] }
 0x60b   : > { %8347 = vmatpush1.bf16.msra.mxu1 %v9574_v25  ;;  %8307 = vmatprep.subr.bf16.mxu0 %v9637_v61  ;;  %v1587_v25 = vld [vmem:[%s11018_s22 + $0x1ce0] sm:$0xff] }
 0x60c   : > { %8348 = vmatprep.subr.bf16.mxu1 %v9639_v29  ;;  %v1619_v61 = vld [vmem:[%s11018_s22 + $0x1de0] sm:$0xff]  ;;  %v1588_v29 = vld [vmem:[%s11018_s22 + $0x1ce8] sm:$0xff] }
 0x60d   : > { %v10364_v42 = vpop.eup %10363  ;;  %v10021_v35 = vcombine.high %v1587_v25, %v1619_v61  ;;  %v10020_v41 = vcombine.low %v1587_v25, %v1619_v61 }
 0x60e   : > { %v10366_v45 = vpop.eup %10365  ;;  %8308 = vmatpush1.bf16.msra.mxu0 %v9636_v36  ;;  %v10023_v36 = vcombine.high %v1588_v29, %v1620_v30 }
 0x60f   : > { %v10368_v56 = vpop.eup %10367  ;;  %8349 = vmatpush1.bf16.msra.mxu1 %v9638_v51  ;;  %8309 = vmatprep.subr.bf16.mxu0 %v9701_v37  ;;  %v1651_v51 = vld [vmem:[%s11018_s22 + $0x1ee0] sm:$0xff] }
 0x610   : > { %v10370_v50 = vpop.eup %10369  ;;  %v8753_v53 = vcombine.low %v10364_v42, %v10368_v56  ;;  %8350 = vmatprep.subr.bf16.mxu1 %v9703_v7  ;;  %v1683_v37 = vld [vmem:[%s11018_s22 + $0x1fe0] sm:$0xff]  ;;  %v1652_v7 = vld [vmem:[%s11018_s22 + $0x1ee8] sm:$0xff]  ;;  %v10022_v42 = vcombine.low %v1588_v29, %v1620_v30  ;;  %v694_v56 = vld [vmem:[%s11018_s22 + $0xf8] sm:$0xff] }
 0x611   : > { %v8754_v58 = vcombine.low %v10366_v45, %v10370_v50  ;;  %v10085_v43 = vcombine.high %v1651_v51, %v1683_v37  ;;  %v10087_v44 = vcombine.high %v1652_v7, %v1684_v39  ;;  %v693_v45 = vld [vmem:[%s11018_s22 + $0xf0] sm:$0xff]  ;;  %v10086_v50 = vcombine.low %v1652_v7, %v1684_v39 }
 0x612   : > { %v8761_v0 = vrot.slane %v8753_v53, %v11392_v38  ;;  %8310 = vmatpush1.bf16.msra.mxu0 %v9700_v46  ;;  %v725_v46 = vld [vmem:[%s11018_s22 + $0x1f0] sm:$0xff] }
 0x613   : > { %v8768_v2 = vrot.slane %v8754_v58, %v11392_v38  ;;  %8351 = vmatpush1.bf16.msra.mxu1 %v9702_v47  ;;  %8311 = vmatprep.subr.bf16.mxu0 %v9765_v49  ;;  %v726_v47 = vld [vmem:[%s11018_s22 + $0x1f8] sm:$0xff]  ;;  %v10084_v49 = vcombine.low %v1651_v51, %v1683_v37  ;;  %v9129_v53 = vcombine.high %v693_v45, %v725_v46  ;;  %v1013_v30 = vld [vmem:[%s11018_s22 + $0xaf0] sm:$0xff] }
 0x614   : > { %8352 = vmatprep.subr.bf16.mxu1 %v9767_v55  ;;  %v9131_v55 = vcombine.high %v694_v56, %v726_v47  ;;  %v9128_v58 = vcombine.low %v693_v45, %v725_v46  ;;  %v1077_v39 = vld [vmem:[%s11018_s22 + $0xcf0] sm:$0xff]  ;;  %v1890_v45 = vrot.slane %v12184_v40, %v11450_v17  ;;  %v1886_v46 = vrot.slane %v12184_v40, %v11455_v21 }
 0x615   : > { %v8769_v9 = vcombine.low %v8761_v0, %v8768_v2  ;;  %v9130_v0 = vcombine.low %v694_v56, %v726_v47  ;;  %v821_v2 = vld [vmem:[%s11018_s22 + $0x4f0] sm:$0xff]  ;;  %v1894_v47 = vrot.slane %v12184_v40, %v11458_v22 }
 0x616   : > { %8312 = vmatpush1.bf16.msra.mxu0 %v9764_v1  ;;  %v9193_v1 = vcombine.high %v757_v32, %v789_v57  ;;  %v1141_v32 = vld [vmem:[%s11018_s22 + $0xef0] sm:$0xff] }
 0x617   : > { %8881 = vst [vmem:[%s11405_s24 + $0x50] sm:$0xff] %v8769_v9  ;;  %8353 = vmatpush1.bf16.msra.mxu1 %v9766_v3  ;;  %8313 = vmatprep.subr.bf16.mxu0 %v9829_v4  ;;  %v853_v3 = vld [vmem:[%s11018_s22 + $0x5f0] sm:$0xff]  ;;  %v9195_v4 = vcombine.high %v758_v60, %v790_v63  ;;  %v9194_v9 = vcombine.low %v758_v60, %v790_v63 }
 0x618   : > { %8354 = vmatprep.subr.bf16.mxu1 %v9831_v5  ;;  %v822_v5 = vld [vmem:[%s11018_s22 + $0x4f8] sm:$0xff]  ;;  %v9257_v10 = vcombine.high %v821_v2, %v853_v3  ;;  %v9256_v48 = vcombine.low %v821_v2, %v853_v3  ;;  %v1173_v57 = vld [vmem:[%s11018_s22 + $0xff0] sm:$0xff] }
 0x619   : > { %v9259_v11 = vcombine.high %v822_v5, %v854_v6  ;;  %v9258_v59 = vcombine.low %v822_v5, %v854_v6 }
 0x61a   : > { %8314 = vmatpush1.bf16.msra.mxu0 %v9828_v12  ;;  %v885_v12 = vld [vmem:[%s11018_s22 + $0x6f0] sm:$0xff] }
 0x61b   : > { %8355 = vmatpush1.bf16.msra.mxu1 %v9830_v13  ;;  %8315 = vmatprep.subr.bf16.mxu0 %v9893_v14  ;;  %v917_v13 = vld [vmem:[%s11018_s22 + $0x7f0] sm:$0xff]  ;;  %v886_v14 = vld [vmem:[%s11018_s22 + $0x6f8] sm:$0xff] }
 0x61c   : > { %8356 = vmatprep.subr.bf16.mxu1 %v9895_v15  ;;  %v918_v15 = vld [vmem:[%s11018_s22 + $0x7f8] sm:$0xff]  ;;  %v9321_v62 = vcombine.high %v885_v12, %v917_v13 }
 0x61d   : > { %v9322_v25 = vcombine.low %v886_v14, %v918_v15 }
 0x61e   : > { %8316 = vmatpush1.bf16.msra.mxu0 %v9892_v19  ;;  %v981_v19 = vld [vmem:[%s11018_s22 + $0x9f0] sm:$0xff] }
 0x61f   : > { %8357 = vmatpush1.bf16.msra.mxu1 %v9894_v20  ;;  %8317 = vmatprep.subr.bf16.mxu0 %v9957_v23  ;;  %v950_v20 = vld [vmem:[%s11018_s22 + $0x8f8] sm:$0xff]  ;;  %v9385_v61 = vcombine.high %v949_v18, %v981_v19 }
 0x620   : > { %8358 = vmatprep.subr.bf16.mxu1 %v9959_v24  ;;  %v982_v23 = vld [vmem:[%s11018_s22 + $0x9f8] sm:$0xff]  ;;  %v9320_v24 = vcombine.low %v885_v12, %v917_v13 }
 0x621   : > { %v9387_v29 = vcombine.high %v950_v20, %v982_v23  ;;  %v9386_v51 = vcombine.low %v950_v20, %v982_v23  ;;  %v1269_v20 = vld [vmem:[%s11018_s22 + $0x12f0] sm:$0xff] }
 0x622   : > { %8318 = vmatpush1.bf16.msra.mxu0 %v9956_v31  ;;  %v1045_v31 = vld [vmem:[%s11018_s22 + $0xbf0] sm:$0xff] }
 0x623   : > { %8359 = vmatpush1.bf16.msra.mxu1 %v9958_v34  ;;  %8319 = vmatprep.subr.bf16.mxu0 %v10021_v35  ;;  %v1014_v34 = vld [vmem:[%s11018_s22 + $0xaf8] sm:$0xff]  ;;  %v9449_v37 = vcombine.high %v1013_v30, %v1045_v31  ;;  %v9448_v56 = vcombine.low %v1013_v30, %v1045_v31  ;;  %v1301_v23 = vld [vmem:[%s11018_s22 + $0x13f0] sm:$0xff] }
 0x624   : > { %8360 = vmatprep.subr.bf16.mxu1 %v10023_v36  ;;  %v1046_v35 = vld [vmem:[%s11018_s22 + $0xbf8] sm:$0xff]  ;;  %v9384_v36 = vcombine.low %v949_v18, %v981_v19  ;;  %v9705_v30 = vcombine.high %v1269_v20, %v1301_v23 }
 0x625   : > { %v9451_v7 = vcombine.high %v1014_v34, %v1046_v35 }
 0x626   : > { %8320 = vmatpush1.bf16.msra.mxu0 %v10020_v41  ;;  %v1109_v41 = vld [vmem:[%s11018_s22 + $0xdf0] sm:$0xff] }
 0x627   : > { %8361 = vmatpush1.bf16.msra.mxu1 %v10022_v42  ;;  %8321 = vmatprep.subr.bf16.mxu0 %v10085_v43  ;;  %v1882_v42 = vrot.slane %v12184_v40, %v11447_v16  ;;  %v1078_v43 = vld [vmem:[%s11018_s22 + $0xcf8] sm:$0xff]  ;;  %v9512_v40 = vcombine.low %v1077_v39, %v1109_v41 }
 0x628   : > { %8362 = vmatprep.subr.bf16.mxu1 %v10087_v44  ;;  %v1110_v44 = vld [vmem:[%s11018_s22 + $0xdf8] sm:$0xff] }
 0x62a   : > { %8322 = vmatpush1.bf16.msra.mxu0 %v10084_v49  ;;  %v9450_v49 = vcombine.low %v1014_v34, %v1046_v35  ;;  %v1333_v34 = vld [vmem:[%s11018_s22 + $0x14f0] sm:$0xff] }
 0x62b   : > { %8363 = vmatpush1.bf16.msra.mxu1 %v10086_v50  ;;  %8373 = vmatprep.subr.bf16.mxu0 %v9129_v53  ;;  %v9513_v50 = vcombine.high %v1077_v39, %v1109_v41  ;;  %v1365_v35 = vld [vmem:[%s11018_s22 + $0x15f0] sm:$0xff]  ;;  %v9704_v39 = vcombine.low %v1269_v20, %v1301_v23 }
 0x62c   : > { %8414 = vmatprep.subr.bf16.mxu1 %v9131_v55  ;;  %v9515_v55 = vcombine.high %v1078_v43, %v1110_v44 }
 0x62d   : > { %8324 = vmatmul.mubr.bf16.vlgmr.msra.gmra.mrb[60].mxu0 %v11123_v28 }
 0x62e   : > { %8365 = vmatmul.mubr.bf16.vlgmr.msra.gmra.mrb[60].mxu1 %v11123_v28  ;;  %8374 = vmatpush1.bf16.msra.mxu0 %v9128_v58 }
 0x62f   : > { %8405 = vmatprep.mubr.bf16.mxu0 %v11121_v27  ;;  %8415 = vmatpush1.bf16.msra.mxu1 %v9130_v0  ;;  %v1142_v0 = vld [vmem:[%s11018_s22 + $0xef8] sm:$0xff] }
 0x630   : > { %8446 = vmatprep.mubr.bf16.mxu1 %v11121_v27  ;;  %8375 = vmatprep.subr.bf16.mxu0 %v9193_v1  ;;  %v9323_v27 = vcombine.high %v886_v14, %v918_v15  ;;  %v1174_v1 = vld [vmem:[%s11018_s22 + $0xff8] sm:$0xff]  ;;  %v1205_v14 = vld [vmem:[%s11018_s22 + $0x10f0] sm:$0xff] }
 0x631   : > { %8416 = vmatprep.subr.bf16.mxu1 %v9195_v4  ;;  %v9579_v13 = vcombine.high %v1142_v0, %v1174_v1  ;;  %v1237_v15 = vld [vmem:[%s11018_s22 + $0x11f0] sm:$0xff] }
 0x632   : > { %8376 = vmatpush1.bf16.msra.mxu0 %v9192_v8  ;;  %v9641_v18 = vcombine.high %v1205_v14, %v1237_v15 }
 0x633   : > { %8417 = vmatpush1.bf16.msra.mxu1 %v9194_v9  ;;  %8377 = vmatprep.subr.bf16.mxu0 %v9257_v10  ;;  %v9514_v10 = vcombine.low %v1078_v43, %v1110_v44  ;;  %v9769_v43 = vcombine.high %v1333_v34, %v1365_v35 }
 0x634   : > { %8418 = vmatprep.subr.bf16.mxu1 %v9259_v11  ;;  %v9577_v11 = vcombine.high %v1141_v32, %v1173_v57 }
 0x636   : > { %8378 = vmatpush1.bf16.msra.mxu0 %v9256_v48  ;;  %v1206_v48 = vld [vmem:[%s11018_s22 + $0x10f8] sm:$0xff] }
 0x637   : > { %8419 = vmatpush1.bf16.msra.mxu1 %v9258_v59  ;;  %8379 = vmatprep.subr.bf16.mxu0 %v9321_v62  ;;  %v1238_v59 = vld [vmem:[%s11018_s22 + $0x11f8] sm:$0xff]  ;;  %v9576_v62 = vcombine.low %v1141_v32, %v1173_v57  ;;  %v9768_v32 = vcombine.low %v1333_v34, %v1365_v35 }
 0x638   : > { %8420 = vmatprep.subr.bf16.mxu1 %v9323_v27  ;;  %v9578_v27 = vcombine.low %v1142_v0, %v1174_v1  ;;  %v9643_v19 = vcombine.high %v1206_v48, %v1238_v59  ;;  %v1461_v0 = vld [vmem:[%s11018_s22 + $0x18f0] sm:$0xff] }
 0x639   : > { %v1493_v1 = vld [vmem:[%s11018_s22 + $0x19f0] sm:$0xff] }
 0x63a   : > { %8380 = vmatpush1.bf16.msra.mxu0 %v9320_v24  ;;  %v1270_v24 = vld [vmem:[%s11018_s22 + $0x12f8] sm:$0xff] }
 0x63b   : > { %8421 = vmatpush1.bf16.msra.mxu1 %v9322_v25  ;;  %8381 = vmatprep.subr.bf16.mxu0 %v9385_v61  ;;  %v1302_v25 = vld [vmem:[%s11018_s22 + $0x13f8] sm:$0xff]  ;;  %v9640_v61 = vcombine.low %v1205_v14, %v1237_v15 }
 0x63c   : > { %8422 = vmatprep.subr.bf16.mxu1 %v9387_v29  ;;  %v9642_v29 = vcombine.low %v1206_v48, %v1238_v59  ;;  %v9707_v31 = vcombine.high %v1270_v24, %v1302_v25  ;;  %v1589_v59 = vld [vmem:[%s11018_s22 + $0x1cf0] sm:$0xff] }
 0x63e   : > { %8382 = vmatpush1.bf16.msra.mxu0 %v9384_v36 }
 0x63f   : > { %8423 = vmatpush1.bf16.msra.mxu1 %v9386_v51  ;;  %8383 = vmatprep.subr.bf16.mxu0 %v9449_v37  ;;  %v1334_v51 = vld [vmem:[%s11018_s22 + $0x14f8] sm:$0xff] }
 0x640   : > { %v8079_v53 = vpop.f32.mrb[48].mxu0  ;;  %8424 = vmatprep.subr.bf16.mxu1 %v9451_v7  ;;  %v1366_v37 = vld [vmem:[%s11018_s22 + $0x15f8] sm:$0xff] }
 0x641   : > { %v8080_v58 = vadd.f32 %v8079_v53, %v1882_v42  ;;  %v8120_v60 = vpop.f32.mrb[48].mxu1  ;;  %v8081_v63 = vpop.f32.mrb[49].mxu0  ;;  %v9706_v42 = vcombine.low %v1270_v24, %v1302_v25  ;;  %v1430_v53 = vld [vmem:[%s11018_s22 + $0x17f8] sm:$0xff]  ;;  %v1653_v25 = vld [vmem:[%s11018_s22 + $0x1ef0] sm:$0xff] }
 0x642   : > { %v8121_v2 = vadd.f32 %v8120_v60, %v1890_v45  ;;  %v8082_v3 = vadd.f32 %v8081_v63, %v1886_v46  ;;  %v8122_v4 = vpop.f32.mrb[49].mxu1  ;;  %v8083_v5 = vpop.f32.mrb[50].mxu0  ;;  %8384 = vmatpush1.bf16.msra.mxu0 %v9448_v56  ;;  %v9771_v46 = vcombine.high %v1334_v51, %v1366_v37  ;;  %v1397_v56 = vld [vmem:[%s11018_s22 + $0x16f0] sm:$0xff] }
 0x643   : > { %10371 = vtanh.f32 %v8080_v58  ;;  %v8123_v6 = vadd.f32 %v8122_v4, %v1894_v47  ;;  %v8124_v8 = vpop.f32.mrb[50].mxu1  ;;  %8425 = vmatpush1.bf16.msra.mxu1 %v9450_v49  ;;  %v8084_v9 = vpop.f32.mrb[51].mxu0  ;;  %8385 = vmatprep.subr.bf16.mxu0 %v9513_v50  ;;  %v1429_v47 = vld [vmem:[%s11018_s22 + $0x17f0] sm:$0xff]  ;;  %v1398_v50 = vld [vmem:[%s11018_s22 + $0x16f8] sm:$0xff]  ;;  %v9770_v58 = vcombine.low %v1334_v51, %v1366_v37 }
 0x644   : > { %10373 = vtanh.f32 %v8121_v2  ;;  %v8125_v12 = vpop.f32.mrb[51].mxu1  ;;  %8426 = vmatprep.subr.bf16.mxu1 %v9515_v55  ;;  %v9833_v60 = vcombine.high %v1397_v56, %v1429_v47  ;;  %v9835_v63 = vcombine.high %v1398_v50, %v1430_v53  ;;  %v1494_v4 = vld [vmem:[%s11018_s22 + $0x19f8] sm:$0xff]  ;;  %v9832_v5 = vcombine.low %v1397_v56, %v1429_v47  ;;  %v1525_v9 = vld [vmem:[%s11018_s22 + $0x1af0] sm:$0xff] }
 0x645   : > { %10375 = vtanh.f32 %v8082_v3  ;;  %v1462_v3 = vld [vmem:[%s11018_s22 + $0x18f8] sm:$0xff] }
 0x646   : > { %10377 = vtanh.f32 %v8123_v6  ;;  %8386 = vmatpush1.bf16.msra.mxu0 %v9512_v40  ;;  %v9834_v40 = vcombine.low %v1398_v50, %v1430_v53  ;;  %v9897_v6 = vcombine.high %v1461_v0, %v1493_v1  ;;  %v9899_v8 = vcombine.high %v1462_v3, %v1494_v4  ;;  %v1558_v12 = vld [vmem:[%s11018_s22 + $0x1bf8] sm:$0xff] }
 0x647   : > { %8427 = vmatpush1.bf16.msra.mxu1 %v9514_v10  ;;  %8387 = vmatprep.subr.bf16.mxu0 %v9577_v11  ;;  %v1557_v10 = vld [vmem:[%s11018_s22 + $0x1bf0] sm:$0xff]  ;;  %v1526_v11 = vld [vmem:[%s11018_s22 + $0x1af8] sm:$0xff]  ;;  %v9898_v14 = vcombine.low %v1462_v3, %v1494_v4 }
 0x648   : > { %8428 = vmatprep.subr.bf16.mxu1 %v9579_v13  ;;  %v9896_v13 = vcombine.low %v1461_v0, %v1493_v1  ;;  %v9961_v15 = vcombine.high %v1525_v9, %v1557_v10  ;;  %v9963_v48 = vcombine.high %v1526_v11, %v1558_v12  ;;  %v9962_v20 = vcombine.low %v1526_v11, %v1558_v12 }
 0x64a   : > { %8388 = vmatpush1.bf16.msra.mxu0 %v9576_v62  ;;  %v1621_v62 = vld [vmem:[%s11018_s22 + $0x1df0] sm:$0xff] }
 0x64b   : > { %8429 = vmatpush1.bf16.msra.mxu1 %v9578_v27  ;;  %8389 = vmatprep.subr.bf16.mxu0 %v9641_v18  ;;  %v1590_v27 = vld [vmem:[%s11018_s22 + $0x1cf8] sm:$0xff]  ;;  %v10025_v23 = vcombine.high %v1589_v59, %v1621_v62 }
 0x64c   : > { %8430 = vmatprep.subr.bf16.mxu1 %v9643_v19  ;;  %v1622_v18 = vld [vmem:[%s11018_s22 + $0x1df8] sm:$0xff]  ;;  %v9960_v19 = vcombine.low %v1525_v9, %v1557_v10 }
 0x64d   : > { %v10372_v36 = vpop.eup %10371  ;;  %v10027_v24 = vcombine.high %v1590_v27, %v1622_v18  ;;  %v10026_v34 = vcombine.low %v1590_v27, %v1622_v18 }
 0x64e   : > { %v10374_v7 = vpop.eup %10373  ;;  %8390 = vmatpush1.bf16.msra.mxu0 %v9640_v61  ;;  %v1685_v61 = vld [vmem:[%s11018_s22 + $0x1ff0] sm:$0xff] }
 0x64f   : > { %v10376_v41 = vpop.eup %10375  ;;  %8431 = vmatpush1.bf16.msra.mxu1 %v9642_v29  ;;  %8391 = vmatprep.subr.bf16.mxu0 %v9705_v30  ;;  %v1654_v29 = vld [vmem:[%s11018_s22 + $0x1ef8] sm:$0xff]  ;;  %v10089_v35 = vcombine.high %v1653_v25, %v1685_v61  ;;  %v10088_v51 = vcombine.low %v1653_v25, %v1685_v61 }
 0x650   : > { %v10378_v44 = vpop.eup %10377  ;;  %v8770_v45 = vcombine.low %v10372_v36, %v10376_v41  ;;  %8432 = vmatprep.subr.bf16.mxu1 %v9707_v31  ;;  %v1686_v30 = vld [vmem:[%s11018_s22 + $0x1ff8] sm:$0xff]  ;;  %v10024_v31 = vcombine.low %v1589_v59, %v1621_v62 }
 0x651   : > { %v8771_v49 = vcombine.low %v10374_v7, %v10378_v44  ;;  %v10091_v36 = vcombine.high %v1654_v29, %v1686_v30  ;;  %v10090_v37 = vcombine.low %v1654_v29, %v1686_v30  ;;  %v1693_v7 = vld [vmem:[%s11355_s9 + $0x30] sm:$0xff] }
 0x652   : > { %v8778_v55 = vrot.slane %v8770_v45, %v11392_v38  ;;  %8392 = vmatpush1.bf16.msra.mxu0 %v9704_v39  ;;  %v1898_v39 = vrot.slane %v1693_v7, %v11067_v52  ;;  %v1906_v41 = vrot.slane %v1693_v7, %v11351_v26  ;;  %v1926_v9 = vrot.slane %v1693_v7, %v11458_v22 }
 0x653   : > { %v8785_v57 = vrot.slane %v8771_v49, %v11392_v38  ;;  %8433 = vmatpush1.bf16.msra.mxu1 %v9706_v42  ;;  %8393 = vmatprep.subr.bf16.mxu0 %v9769_v43  ;;  %v1902_v42 = vrot.slane %v1693_v7, %v11070_v54  ;;  %v1910_v43 = vrot.slane %v1693_v7, %v11361_v33 }
 0x654   : > { %8434 = vmatprep.subr.bf16.mxu1 %v9771_v46 }
 0x655   : > { %v8786_v2 = vcombine.low %v8778_v55, %v8785_v57 }
 0x656   : > { %8394 = vmatpush1.bf16.msra.mxu0 %v9768_v32 }
 0x657   : > { %8882 = vst [vmem:[%s11405_s24 + $0x58] sm:$0xff] %v8786_v2  ;;  %8435 = vmatpush1.bf16.msra.mxu1 %v9770_v58  ;;  %8395 = vmatprep.subr.bf16.mxu0 %v9833_v60 }
 0x658   : > { %8436 = vmatprep.subr.bf16.mxu1 %v9835_v63 }
 0x65a   : > { %8396 = vmatpush1.bf16.msra.mxu0 %v9832_v5 }
 0x65b   : > { %8437 = vmatpush1.bf16.msra.mxu1 %v9834_v40  ;;  %8397 = vmatprep.subr.bf16.mxu0 %v9897_v6  ;;  %v1914_v40 = vrot.slane %v1693_v7, %v11447_v16  ;;  %v1922_v6 = vrot.slane %v1693_v7, %v11450_v17 }
 0x65c   : > { %8438 = vmatprep.subr.bf16.mxu1 %v9899_v8  ;;  %v1918_v8 = vrot.slane %v1693_v7, %v11455_v21 }
 0x65e   : > { %8398 = vmatpush1.bf16.msra.mxu0 %v9896_v13 }
 0x65f   : > { %8439 = vmatpush1.bf16.msra.mxu1 %v9898_v14  ;;  %8399 = vmatprep.subr.bf16.mxu0 %v9961_v15 }
 0x660   : > { %8440 = vmatprep.subr.bf16.mxu1 %v9963_v48 }
 0x662   : > { %8400 = vmatpush1.bf16.msra.mxu0 %v9960_v19 }
 0x663   : > { %8441 = vmatpush1.bf16.msra.mxu1 %v9962_v20  ;;  %8401 = vmatprep.subr.bf16.mxu0 %v10025_v23 }
 0x664   : > { %8442 = vmatprep.subr.bf16.mxu1 %v10027_v24 }
 0x666   : > { %8402 = vmatpush1.bf16.msra.mxu0 %v10024_v31 }
 0x667   : > { %8443 = vmatpush1.bf16.msra.mxu1 %v10026_v34  ;;  %8403 = vmatprep.subr.bf16.mxu0 %v10089_v35  ;;  %v1694_v35 = vld [vmem:[%s11355_s9 + $0x38] sm:$0xff] }
 0x668   : > { %8444 = vmatprep.subr.bf16.mxu1 %v10091_v36  ;;  %v1930_v36 = vrot.slane %v1694_v35, %v11067_v52  ;;  %v1942_v7 = vrot.slane %v1694_v35, %v11361_v33 }
 0x66a   : > { %8404 = vmatpush1.bf16.msra.mxu0 %v10088_v51  ;;  %v1938_v51 = vrot.slane %v1694_v35, %v11351_v26 }
 0x66b   : > { %8445 = vmatpush1.bf16.msra.mxu1 %v10090_v37  ;;  %v1934_v37 = vrot.slane %v1694_v35, %v11070_v54 }
 0x66d   : > { %8406 = vmatmul.mubr.bf16.vlgmr.msra.gmra.mrb[64].mxu0 %v11123_v28 }
 0x66e   : > { %8447 = vmatmul.mubr.bf16.vlgmr.msra.gmra.mrb[64].mxu1 %v11123_v28 }
 0x680   : > { %v8161_v44 = vpop.f32.mrb[52].mxu0 }
 0x681   : > { %v8162_v45 = vadd.f32 %v8161_v44, %v1898_v39  ;;  %v8202_v46 = vpop.f32.mrb[52].mxu1  ;;  %v8163_v56 = vpop.f32.mrb[53].mxu0 }
 0x682   : > { %v8203_v47 = vadd.f32 %v8202_v46, %v1906_v41  ;;  %v8164_v49 = vadd.f32 %v8163_v56, %v1902_v42  ;;  %v8204_v50 = vpop.f32.mrb[53].mxu1  ;;  %v8165_v53 = vpop.f32.mrb[54].mxu0 }
 0x683   : > { %10379 = vtanh.f32 %v8162_v45  ;;  %v8205_v55 = vadd.f32 %v8204_v50, %v1910_v43  ;;  %v8206_v28 = vpop.f32.mrb[54].mxu1  ;;  %v8166_v32 = vpop.f32.mrb[55].mxu0 }
 0x684   : > { %10381 = vtanh.f32 %v8203_v47  ;;  %v8207_v57 = vpop.f32.mrb[55].mxu1 }
 0x685   : > { %10383 = vtanh.f32 %v8164_v49 }
 0x686   : > { %10385 = vtanh.f32 %v8205_v55 }
 0x68d   : > { %v10380_v58 = vpop.eup %10379 }
 0x68e   : > { %v10382_v60 = vpop.eup %10381 }
 0x68f   : > { %v10384_v63 = vpop.eup %10383 }
 0x690   : > { %v10386_v0 = vpop.eup %10385  ;;  %v8787_v1 = vcombine.low %v10380_v58, %v10384_v63  ;;  %v1954_v63 = vrot.slane %v1694_v35, %v11450_v17 }
 0x691   : > { %v8788_v2 = vcombine.low %v10382_v60, %v10386_v0  ;;  %v1946_v60 = vrot.slane %v1694_v35, %v11447_v16  ;;  %v1950_v0 = vrot.slane %v1694_v35, %v11455_v21 }
 0x692   : > { %v8795_v3 = vrot.slane %v8787_v1, %v11392_v38  ;;  %v1958_v1 = vrot.slane %v1694_v35, %v11458_v22 }
 0x693   : > { %v8802_v4 = vrot.slane %v8788_v2, %v11392_v38 }
 0x695   : > { %v8803_v5 = vcombine.low %v8795_v3, %v8802_v4 }
 0x697   : > { %8883 = vst [vmem:[%s11405_s24 + $0x60] sm:$0xff] %v8803_v5 }
 0x6c0   : > { %v8243_v10 = vpop.f32.mrb[56].mxu0 }
 0x6c1   : > { %v8244_v11 = vadd.f32 %v8243_v10, %v1914_v40  ;;  %v8284_v12 = vpop.f32.mrb[56].mxu1  ;;  %v8245_v13 = vpop.f32.mrb[57].mxu0 }
 0x6c2   : > { %v8285_v14 = vadd.f32 %v8284_v12, %v1922_v6  ;;  %v8246_v15 = vadd.f32 %v8245_v13, %v1918_v8  ;;  %v8286_v48 = vpop.f32.mrb[57].mxu1  ;;  %v8247_v59 = vpop.f32.mrb[58].mxu0 }
 0x6c3   : > { %10387 = vtanh.f32 %v8244_v11  ;;  %v8287_v62 = vadd.f32 %v8286_v48, %v1926_v9  ;;  %v8288_v27 = vpop.f32.mrb[58].mxu1  ;;  %v8248_v18 = vpop.f32.mrb[59].mxu0 }
 0x6c4   : > { %10389 = vtanh.f32 %v8285_v14  ;;  %v8289_v19 = vpop.f32.mrb[59].mxu1 }
 0x6c5   : > { %10391 = vtanh.f32 %v8246_v15 }
 0x6c6   : > { %10393 = vtanh.f32 %v8287_v62 }
 0x6cd   : > { %v10388_v20 = vpop.eup %10387 }
 0x6ce   : > { %v10390_v23 = vpop.eup %10389 }
 0x6cf   : > { %v10392_v24 = vpop.eup %10391 }
 0x6d0   : > { %v10394_v25 = vpop.eup %10393  ;;  %v8804_v61 = vcombine.low %v10388_v20, %v10392_v24 }
 0x6d1   : > { %v8805_v29 = vcombine.low %v10390_v23, %v10394_v25 }
 0x6d2   : > { %v8812_v30 = vrot.slane %v8804_v61, %v11392_v38 }
 0x6d3   : > { %v8819_v31 = vrot.slane %v8805_v29, %v11392_v38 }
 0x6d5   : > { %v8820_v34 = vcombine.low %v8812_v30, %v8819_v31 }
 0x6d7   : > { %8884 = vst [vmem:[%s11405_s24 + $0x68] sm:$0xff] %v8820_v34 }
 0x700   : > { %v8325_v39 = vpop.f32.mrb[60].mxu0 }
 0x701   : > { %v8326_v41 = vadd.f32 %v8325_v39, %v1930_v36  ;;  %v8366_v42 = vpop.f32.mrb[60].mxu1  ;;  %v8327_v43 = vpop.f32.mrb[61].mxu0 }
 0x702   : > { %v8367_v44 = vadd.f32 %v8366_v42, %v1938_v51  ;;  %v8328_v45 = vadd.f32 %v8327_v43, %v1934_v37  ;;  %v8368_v46 = vpop.f32.mrb[61].mxu1  ;;  %v8329_v56 = vpop.f32.mrb[62].mxu0 }
 0x703   : > { %10395 = vtanh.f32 %v8326_v41  ;;  %v8369_v47 = vadd.f32 %v8368_v46, %v1942_v7  ;;  %v8370_v49 = vpop.f32.mrb[62].mxu1  ;;  %v8330_v50 = vpop.f32.mrb[63].mxu0 }
 0x704   : > { %10397 = vtanh.f32 %v8367_v44  ;;  %v8371_v52 = vpop.f32.mrb[63].mxu1 }
 0x705   : > { %10399 = vtanh.f32 %v8328_v45 }
 0x706   : > { %10401 = vtanh.f32 %v8369_v47 }
 0x70d   : > { %v10396_v54 = vpop.eup %10395 }
 0x70e   : > { %v10398_v26 = vpop.eup %10397 }
 0x70f   : > { %v10400_v33 = vpop.eup %10399 }
 0x710   : > { %v10402_v53 = vpop.eup %10401  ;;  %v8821_v55 = vcombine.low %v10396_v54, %v10400_v33 }
 0x711   : > { %v8822_v28 = vcombine.low %v10398_v26, %v10402_v53 }
 0x712   : > { %v8829_v32 = vrot.slane %v8821_v55, %v11392_v38 }
 0x713   : > { %v8836_v57 = vrot.slane %v8822_v28, %v11392_v38 }
 0x715   : > { %v8837_v58 = vcombine.low %v8829_v32, %v8836_v57 }
 0x717   : > { %8885 = vst [vmem:[%s11405_s24 + $0x70] sm:$0xff] %v8837_v58 }
 0x740   : > { %v8407_v2 = vpop.f32.mrb[64].mxu0 }
 0x741   : > { %v8408_v3 = vadd.f32 %v8407_v2, %v1946_v60  ;;  %v8448_v4 = vpop.f32.mrb[64].mxu1  ;;  %v8409_v5 = vpop.f32.mrb[65].mxu0 }
 0x742   : > { %v8449_v40 = vadd.f32 %v8448_v4, %v1954_v63  ;;  %v8410_v6 = vadd.f32 %v8409_v5, %v1950_v0  ;;  %v8450_v8 = vpop.f32.mrb[65].mxu1  ;;  %v8411_v9 = vpop.f32.mrb[66].mxu0 }
 0x743   : > { %10403 = vtanh.f32 %v8408_v3  ;;  %v8451_v10 = vadd.f32 %v8450_v8, %v1958_v1  ;;  %v8452_v11 = vpop.f32.mrb[66].mxu1  ;;  %v8412_v16 = vpop.f32.mrb[67].mxu0 }
 0x744   : > { %10405 = vtanh.f32 %v8449_v40  ;;  %v8453_v17 = vpop.f32.mrb[67].mxu1 }
 0x745   : > { %10407 = vtanh.f32 %v8410_v6 }
 0x746   : > { %10409 = vtanh.f32 %v8451_v10 }
 0x74d   : > { %v10404_v21 = vpop.eup %10403 }
 0x74e   : > { %v10406_v22 = vpop.eup %10405 }
 0x74f   : > { %v10408_v12 = vpop.eup %10407 }
 0x750   : > { %v10410_v13 = vpop.eup %10409  ;;  %v8838_v14 = vcombine.low %v10404_v21, %v10408_v12 }
 0x751   : > { %v8839_v15 = vcombine.low %v10406_v22, %v10410_v13 }
 0x752   : > { %v8846_v48 = vrot.slane %v8838_v14, %v11392_v38 }
 0x753   : > { %v8853_v59 = vrot.slane %v8839_v15, %v11392_v38 }
 0x755   : > { %v8854_v62 = vcombine.low %v8846_v48, %v8853_v59 }
 0x757   : > { %8886 = vst [vmem:[%s11405_s24 + $0x78] sm:$0xff] %v8854_v62 }
 0x758   : > { %10624 = shalt.err (!%p10621_p11)
}
 0x759   : > { %s10625_s29 = scalar_lea.hbm %s12352_s20, 2048  ;;  %s10629_s1 = scalar_lea.hbm %s12403_s7, 49152 }
 0x75a   : > { %p10626_p8 = scmp.ne.s32.totalorder %s12352_s20, %s10625_s29  ;;  %p10630_p2 = scmp.lt.u32.totalorder %s12352_s20, %s12403_s7 }
 0x75b   : > { %p10631_p12 = scmp.lt.u32.totalorder %s10629_s1, %s10625_s29  ;;  %p10633_p1 = scmp.lt.u32.totalorder %s10625_s29, %s12352_s20 }
 0x75c   : > { %p10627_p13 = pnand %p10626_p8, %p12451_p7 }
 0x75d   : > { %p10632_p9 = por %p10631_p12, %p10630_p2 }
 0x75e   : > { %p10628_p6 = pneg %p10627_p13 }
 0x75f   : > { %p10634_p5 = por %p10633_p1, %p10632_p9 }
 0x761   : > { %p10635_p4 = pnand %p10634_p5, %p10628_p6 }
 0x763   : > { %10638 = shalt.err (!%p10635_p4)
}
 0x764   : > { %10200 = dma.vmem_to_hbm [thread:$0]  (%p12451_p7), %s12354_s16, 2048, %s12352_s20, %s8888_s19  }
 0x765 PF: > { %s12452_s3 = sld [smem:[#allocation20_spill]]  ;;  %s12453_s22 = sld [smem:[#allocation23_spill]] }
 0x766   : > { %p10240_p0 = scmp.ge.s32.totalorder %s10689_s27, 2 }
 0x76b   : > { %s8914_s10 = sand.u32 1, %s12452_s3   ;;  %p12454_p3 = scmp.ne.s32.totalorder %s12453_s22, 0 }
 0x76c   : > { %s8915_s9 = scalar_lea.sflag [#allocation4], %s8914_s10 }
 0x76d   : > { %p10226_p10 = pnand %p10240_p0, %p12454_p3 }
 0x76f   : > { %10672 = dma.done.wait (!%p10226_p10), %s8915_s9, 2048  }
 0x770   : > { %10674 = vsyncadd (!%p10226_p10), %s8915_s9, 4294965248  ;;  %s12455_s27 = sld [smem:[#allocation21_spill]]  ;;  %s12456_s28 = sld [smem:[#allocation22_spill]] }
 0x771   : > { %s12457_s24 = smov %s10681_s25  ;;  %s12458_s25 = smov %s10685_s26 }
 0x776   : > { %p23_p11 = scmp.ge.s32.totalorder %s12455_s27, 26   ;;  %s12459_s26 = smov %s12456_s28 }
 0x778   :  { %25 = sbr.rel (!%p23_p11) target bundleno = 12 (0xc), region = 125 }
 0x77f   :  { %8920 = vsyncpa [#allocation3], 1 }
 0x780   :  { %8922 = vsyncpa [#allocation3 + $0x1], 1 }
 0x781   :  { %8923 = vsyncpa [#allocation6], 1 }
 0x782   :  { %8924 = vsyncpa [#allocation9], 1 }
 0x783   :  { %8925 = vsyncpa [#allocation12], 1 }
 0x784   :  { %8927 = vsyncpa [#allocation12 + $0x1], 1 }
 0x785   :  { %8928 = vsyncpa [#allocation4], 1 }
 0x786   :  { %8930 = vsyncpa [#allocation4 + $0x1], 1 }

</bundles_post_ra>
